<compile_context>
chip_gen: v5e
topology: v5e:2x2
jax: 0.10.0
libtpu: 0.0.40
codegen_flags: <defaults>
</compile_context>

<pallas_src>
import numpy as np
import jax
import jax.numpy as jnp
from jax import lax
from jax.experimental import pallas as pl
from jax.experimental.pallas import tpu as pltpu

NUM_CODES = 1024        # VectorQuantizer(1024, 4, 0.25)
EMB_DIM = 4
H0, W0 = 3, 4           # latent spatial dims: input (3, 4, 4) read as (H, W, C)
C1, C2, C3 = 32, 16, 3  # assumed decoder channel widths
COUT_PAD = 128          # lane-dense padding of the last conv's output channels

N0 = H0 * W0            # 12   (3x4 grid)
N1 = (2 * H0) * (2 * W0)  # 48   (6x8 grid)
N2 = (4 * H0) * (4 * W0)  # 192  (12x16 grid)
SEL2_OFF = 16           # sel2 segment start inside the packed sel12 buffer (16-aligned)


# --------------------------------------------------------------------------- #
# host-side: precomputed 0/1 selection taps (upsample fused into the conv)
# --------------------------------------------------------------------------- #
def _build_sel_taps(h_out, w_out, h_src, w_src):
    """(9, h_out*w_out, h_src*w_src) 0/1 taps of a SAME 3x3 conv whose input is
    the source grid nearest-upsampled by (h_out//h_src, w_out//w_src); factor 1
    is a plain conv.  Out-of-bounds taps select nothing -> implicit zero pad."""
    fh, fw = h_out // h_src, w_out // w_src
    n_out, n_src = h_out * w_out, h_src * w_src
    taps = np.zeros((9, n_out, n_src), np.float32)
    k = 0
    for di in (-1, 0, 1):
        for dj in (-1, 0, 1):
            for r in range(n_out):
                ho, wo = r // w_out, r % w_out
                hh, ww = ho + di, wo + dj
                if 0 <= hh < h_out and 0 <= ww < w_out:
                    taps[k, r, (hh // fh) * w_src + (ww // fw)] = 1.0
            k += 1
    return taps


# --------------------------------------------------------------------------- #
# the single fused kernel:  VQ  ->  decoder (convs with fused 2x upsamples)
# --------------------------------------------------------------------------- #
def fused_vq_decoder_kernel(x_ref, cb_ref, sel12_ref, sel3_ref,
                            w1_ref, w2_ref, w3_ref, o_ref):
    f32, bf16 = jnp.float32, jnp.bfloat16

    # ---- VectorQuantizer: nearest codebook entry (return quantized vectors) ----
    x = x_ref[...]                                   # (12, 4)   latent vectors, f32
    e = cb_ref[0:EMB_DIM, :]                         # (4, 1024) lane-dense codebook
    e_sq = cb_ref[EMB_DIM:EMB_DIM + 1, :]            # (1, 1024) precomputed ||e_k||^2
    xe = jnp.dot(x, e, preferred_element_type=f32)   # (12, 1024) f32 (exact argmin)
    dist = e_sq - 2.0 * xe                           # ||x||^2 dropped (argmin-invariant)
    min_d = jnp.min(dist, axis=1, keepdims=True)
    iota_k = lax.broadcasted_iota(jnp.int32, dist.shape, 1)
    # first index achieving the minimum (torch.argmin tie-break).  Kept as the
    # two-pass min/where form (jnp.argmin lowering on Mosaic is not relied upon;
    # the extra pass is ~a dozen vreg ops on a (12,1024) tile).
    idx = jnp.min(jnp.where(dist <= min_d, iota_k, NUM_CODES), axis=1, keepdims=True)
    onehot = (iota_k == idx).astype(bf16)            # exact 0/1 in bf16
    # gather selected codes: q[n, d] = sum_k onehot[n, k] * e[d, k]   (bf16 MXU)
    q = jnp.einsum("nk,dk->nd", onehot, e.astype(bf16), preferred_element_type=f32)

    # ---- shared conv helper: 9 precomputed 0/1 taps, bf16 MXU, f32 accumulate ----
    def conv(h_bf, sel_fn, w_ref, n_out, c_out):
        acc = jnp.zeros((n_out, c_out), f32)
        for k in range(9):
            # sel rows are one-hot -> sel @ h is an exact bf16 gather of h rows
            xt = jnp.dot(sel_fn(k), h_bf, preferred_element_type=f32)
            acc = acc + jnp.dot(xt.astype(bf16), w_ref[k], preferred_element_type=f32)
        return acc

    # ---- AEDecoder (assumed architecture) ----
    h = q.astype(bf16)                                                   # (12, 4)
    # conv1 on the 3x4 grid
    acc = conv(h, lambda k: sel12_ref[k, 0:N0, :], w1_ref, N0, C1)
    h = jnp.maximum(acc + cb_ref[5:6, 0:C1], 0.0).astype(bf16)           # (12, 32)
    # 2x nearest upsample fused into conv2: 6x8 output grid from the 3x4 source
    acc = conv(h, lambda k: sel12_ref[k, SEL2_OFF:SEL2_OFF + N1, :], w2_ref, N1, C2)
    h = jnp.maximum(acc + cb_ref[6:7, 0:C2], 0.0).astype(bf16)           # (48, 16)
    # 2x nearest upsample fused into conv3: 12x16 output grid from the 6x8 source
    acc = conv(h, lambda k: sel3_ref[k], w3_ref, N2, COUT_PAD)
    o_ref[...] = jax.nn.sigmoid(acc + cb_ref[7:8, 0:COUT_PAD])           # (192, 128)


# --------------------------------------------------------------------------- #
# Model wrapper
# --------------------------------------------------------------------------- #
_VMEM = pl.BlockSpec(memory_space=pltpu.MemorySpace.VMEM)


def init_params(key):
    ks = jax.random.split(key, 7)
    # --- packed (8, 1024) f32 buffer: codebook (D,K), ||e||^2, b1, b2, b3 ---
    e_dk = jax.random.normal(ks[0], (EMB_DIM, NUM_CODES), jnp.float32) * 0.1
    b1 = jax.random.normal(ks[4], (C1,), jnp.float32) * 0.01
    b2 = jax.random.normal(ks[5], (C2,), jnp.float32) * 0.01
    b3 = jax.random.normal(ks[6], (C3,), jnp.float32) * 0.01
    cb = jnp.zeros((8, NUM_CODES), jnp.float32)
    cb = cb.at[0:EMB_DIM, :].set(e_dk)
    cb = cb.at[EMB_DIM, :].set(jnp.sum(e_dk * e_dk, axis=0))   # precomputed ||e_k||^2
    cb = cb.at[5, 0:C1].set(b1)
    cb = cb.at[6, 0:C2].set(b2)
    cb = cb.at[7, 0:C3].set(b3)                                # padded lanes: bias 0

    # --- conv weights as (9, Cin, Cout), tap k = (di+1)*3 + (dj+1), bf16 operands ---
    w1 = (jax.random.normal(ks[1], (9, EMB_DIM, C1), jnp.float32) * 0.1).astype(jnp.bfloat16)
    w2 = (jax.random.normal(ks[2], (9, C1, C2), jnp.float32) * 0.1).astype(jnp.bfloat16)
    w3f = jax.random.normal(ks[3], (9, C2, C3), jnp.float32) * 0.1
    # pad last conv's output channels to 128 for a lane-dense kernel output store
    w3 = jnp.zeros((9, C2, COUT_PAD), jnp.float32).at[:, :, :C3].set(w3f).astype(jnp.bfloat16)

    # --- precomputed 0/1 selection taps (bf16 exact); upsamples fused into conv2/3 ---
    sel1 = _build_sel_taps(H0, W0, H0, W0)                 # (9, 12, 12)  plain conv
    sel2 = _build_sel_taps(2 * H0, 2 * W0, H0, W0)         # (9, 48, 12)  up2x + conv
    sel3 = _build_sel_taps(4 * H0, 4 * W0, 2 * H0, 2 * W0)  # (9, 192, 48) up2x + conv
    sel12 = np.zeros((9, SEL2_OFF + N1, N0), np.float32)   # 16-row-aligned segments
    sel12[:, 0:N0, :] = sel1
    sel12[:, SEL2_OFF:SEL2_OFF + N1, :] = sel2

    return {
        "cb": cb,
        "sel12": jnp.asarray(sel12, jnp.bfloat16),
        "sel3": jnp.asarray(sel3, jnp.bfloat16),
        "w1": w1, "w2": w2, "w3": w3,
    }


@jax.jit
def model_forward(params, latent):
    H, W, C = latent.shape                       # (3, 4, 4) channels-last latent
    x_flat = latent.reshape(H * W, C)
    out = pl.pallas_call(
        fused_vq_decoder_kernel,
        out_shape=jax.ShapeDtypeStruct((16 * H * W, COUT_PAD), jnp.float32),
        in_specs=[_VMEM] * 7,
        out_specs=_VMEM,
    )(x_flat, params["cb"], params["sel12"], params["sel3"],
      params["w1"], params["w2"], params["w3"])
    # slice away the lane padding and restore (H, W, C) layout
    return out[:, :C3].reshape(4 * H, 4 * W, C3)   # (12, 16, 3) channels-last


if __name__ == "__main__":
    key = jax.random.PRNGKey(0)
    pkey, xkey = jax.random.split(key)
    params = init_params(pkey)
    # the PyTorch forward draws its own input: torch.rand(3, 4, 4)
    latent = jax.random.uniform(xkey, (H0, W0, EMB_DIM), jnp.float32)
    img = model_forward(params, latent)
    jax.block_until_ready(img)
    assert img.shape == (4 * H0, 4 * W0, C3), img.shape
    assert bool(jnp.all(jnp.isfinite(img)))
    print("KERNEL_OK")
</pallas_src>

<mosaic_0001>
module attributes {stable_mosaic.version = 11 : i64} {
  func.func @fused_vq_decoder_kernel(%arg0: memref<12x4xf32, #tpu.memory_space<vmem>>, %arg1: memref<8x1024xf32, #tpu.memory_space<vmem>>, %arg2: memref<9x64x12xbf16, #tpu.memory_space<vmem>>, %arg3: memref<9x192x48xbf16, #tpu.memory_space<vmem>>, %arg4: memref<9x4x32xbf16, #tpu.memory_space<vmem>>, %arg5: memref<9x32x16xbf16, #tpu.memory_space<vmem>>, %arg6: memref<9x16x128xbf16, #tpu.memory_space<vmem>>, %arg7: memref<192x128xf32, #tpu.memory_space<vmem>>) attributes {dimension_semantics = [], scalar_prefetch = 0 : i64, scratch_operands = 0 : i64, tpu.core_type = #tpu.core_type<tc>} {
    %c0 = arith.constant 0 : index
    %c0_0 = arith.constant 0 : index
    %0 = vector.load %arg0[%c0, %c0_0] : memref<12x4xf32, #tpu.memory_space<vmem>>, vector<12x4xf32>
    %c0_1 = arith.constant 0 : index
    %c0_2 = arith.constant 0 : index
    %1 = vector.load %arg1[%c0_1, %c0_2] : memref<8x1024xf32, #tpu.memory_space<vmem>>, vector<4x1024xf32>
    %c4 = arith.constant 4 : index
    %c0_3 = arith.constant 0 : index
    %2 = vector.load %arg1[%c4, %c0_3] : memref<8x1024xf32, #tpu.memory_space<vmem>>, vector<1x1024xf32>
    %cst = arith.constant dense<0.000000e+00> : vector<12x1024xf32>
    %3 = tpu.matmul %0, %1, %cst {dimension_numbers = #tpu.dot_dimension_numbers<[1], [0], [0], [1], [0, 0, 1, 1], [], []>} : vector<12x4xf32>, vector<4x1024xf32>, vector<12x1024xf32> -> vector<12x1024xf32>
    %cst_4 = arith.constant 2.000000e+00 : f32
    %4 = vector.broadcast %cst_4 : f32 to vector<12x1024xf32>
    %5 = arith.mulf %4, %3 : vector<12x1024xf32>
    %6 = vector.broadcast %2 : vector<1x1024xf32> to vector<12x1024xf32>
    %7 = arith.subf %6, %5 : vector<12x1024xf32>
    %cst_5 = arith.constant dense<0x7F800000> : vector<12xf32>
    %8 = vector.multi_reduction <minimumf>, %7, %cst_5 [1] : vector<12x1024xf32> to vector<12xf32>
    %9 = vector.shape_cast %8 : vector<12xf32> to vector<12x1xf32>
    %10 = tpu.iota {dimensions = array<i32: 1>} : vector<12x1024xi32>
    %11 = vector.broadcast %9 : vector<12x1xf32> to vector<12x1024xf32>
    %12 = arith.cmpf ole, %7, %11 : vector<12x1024xf32>
    %c1024_i32 = arith.constant 1024 : i32
    %13 = vector.broadcast %c1024_i32 : i32 to vector<12x1024xi32>
    %14 = arith.select %12, %10, %13 : vector<12x1024xi1>, vector<12x1024xi32>
    %cst_6 = arith.constant dense<2147483647> : vector<12xi32>
    %15 = vector.multi_reduction <minsi>, %14, %cst_6 [1] : vector<12x1024xi32> to vector<12xi32>
    %16 = vector.shape_cast %15 : vector<12xi32> to vector<12x1xi32>
    %17 = vector.broadcast %16 : vector<12x1xi32> to vector<12x1024xi32>
    %18 = arith.cmpi eq, %10, %17 : vector<12x1024xi32>
    %19 = arith.extui %18 : vector<12x1024xi1> to vector<12x1024xi32>
    %20 = arith.sitofp %19 : vector<12x1024xi32> to vector<12x1024xf32>
    %21 = arith.truncf %20 : vector<12x1024xf32> to vector<12x1024xbf16>
    %22 = arith.truncf %1 : vector<4x1024xf32> to vector<4x1024xbf16>
    "tpu.trace_start"() <{level = 10 : i32, message = "nk,dk->nd"}> : () -> ()
    %cst_7 = arith.constant dense<0.000000e+00> : vector<12x4xf32>
    %23 = tpu.matmul %21, %22, %cst_7 {dimension_numbers = #tpu.dot_dimension_numbers<[1], [1], [0], [0], [0, 0, 1, 0], [], []>} : vector<12x1024xbf16>, vector<4x1024xbf16>, vector<12x4xf32> -> vector<12x4xf32>
    "tpu.trace_stop"() : () -> ()
    %24 = arith.truncf %23 : vector<12x4xf32> to vector<12x4xbf16>
    %cst_8 = arith.constant 0.000000e+00 : f32
    %25 = vector.broadcast %cst_8 : f32 to vector<12x32xf32>
    %c0_9 = arith.constant 0 : index
    %c0_10 = arith.constant 0 : index
    %c0_11 = arith.constant 0 : index
    %26 = vector.load %arg2[%c0_9, %c0_10, %c0_11] : memref<9x64x12xbf16, #tpu.memory_space<vmem>>, vector<1x12x12xbf16>
    %27 = vector.shape_cast %26 : vector<1x12x12xbf16> to vector<12x12xbf16>
    %cst_12 = arith.constant dense<0.000000e+00> : vector<12x4xf32>
    %28 = tpu.matmul %27, %24, %cst_12 {dimension_numbers = #tpu.dot_dimension_numbers<[1], [0], [0], [1], [0, 0, 1, 1], [], []>} : vector<12x12xbf16>, vector<12x4xbf16>, vector<12x4xf32> -> vector<12x4xf32>
    %29 = arith.truncf %28 : vector<12x4xf32> to vector<12x4xbf16>
    %c0_13 = arith.constant 0 : index
    %c0_14 = arith.constant 0 : index
    %c0_15 = arith.constant 0 : index
    %30 = vector.load %arg4[%c0_13, %c0_14, %c0_15] : memref<9x4x32xbf16, #tpu.memory_space<vmem>>, vector<1x4x32xbf16>
    %31 = vector.shape_cast %30 : vector<1x4x32xbf16> to vector<4x32xbf16>
    %cst_16 = arith.constant dense<0.000000e+00> : vector<12x32xf32>
    %32 = tpu.matmul %29, %31, %cst_16 {dimension_numbers = #tpu.dot_dimension_numbers<[1], [0], [0], [1], [0, 0, 1, 1], [], []>} : vector<12x4xbf16>, vector<4x32xbf16>, vector<12x32xf32> -> vector<12x32xf32>
    %33 = arith.addf %25, %32 : vector<12x32xf32>
    %c1 = arith.constant 1 : index
    %c0_17 = arith.constant 0 : index
    %c0_18 = arith.constant 0 : index
    %34 = vector.load %arg2[%c1, %c0_17, %c0_18] : memref<9x64x12xbf16, #tpu.memory_space<vmem>>, vector<1x12x12xbf16>
    %35 = vector.shape_cast %34 : vector<1x12x12xbf16> to vector<12x12xbf16>
    %cst_19 = arith.constant dense<0.000000e+00> : vector<12x4xf32>
    %36 = tpu.matmul %35, %24, %cst_19 {dimension_numbers = #tpu.dot_dimension_numbers<[1], [0], [0], [1], [0, 0, 1, 1], [], []>} : vector<12x12xbf16>, vector<12x4xbf16>, vector<12x4xf32> -> vector<12x4xf32>
    %37 = arith.truncf %36 : vector<12x4xf32> to vector<12x4xbf16>
    %c1_20 = arith.constant 1 : index
    %c0_21 = arith.constant 0 : index
    %c0_22 = arith.constant 0 : index
    %38 = vector.load %arg4[%c1_20, %c0_21, %c0_22] : memref<9x4x32xbf16, #tpu.memory_space<vmem>>, vector<1x4x32xbf16>
    %39 = vector.shape_cast %38 : vector<1x4x32xbf16> to vector<4x32xbf16>
    %cst_23 = arith.constant dense<0.000000e+00> : vector<12x32xf32>
    %40 = tpu.matmul %37, %39, %cst_23 {dimension_numbers = #tpu.dot_dimension_numbers<[1], [0], [0], [1], [0, 0, 1, 1], [], []>} : vector<12x4xbf16>, vector<4x32xbf16>, vector<12x32xf32> -> vector<12x32xf32>
    %41 = arith.addf %33, %40 : vector<12x32xf32>
    %c2 = arith.constant 2 : index
    %c0_24 = arith.constant 0 : index
    %c0_25 = arith.constant 0 : index
    %42 = vector.load %arg2[%c2, %c0_24, %c0_25] : memref<9x64x12xbf16, #tpu.memory_space<vmem>>, vector<1x12x12xbf16>
    %43 = vector.shape_cast %42 : vector<1x12x12xbf16> to vector<12x12xbf16>
    %cst_26 = arith.constant dense<0.000000e+00> : vector<12x4xf32>
    %44 = tpu.matmul %43, %24, %cst_26 {dimension_numbers = #tpu.dot_dimension_numbers<[1], [0], [0], [1], [0, 0, 1, 1], [], []>} : vector<12x12xbf16>, vector<12x4xbf16>, vector<12x4xf32> -> vector<12x4xf32>
    %45 = arith.truncf %44 : vector<12x4xf32> to vector<12x4xbf16>
    %c2_27 = arith.constant 2 : index
    %c0_28 = arith.constant 0 : index
    %c0_29 = arith.constant 0 : index
    %46 = vector.load %arg4[%c2_27, %c0_28, %c0_29] : memref<9x4x32xbf16, #tpu.memory_space<vmem>>, vector<1x4x32xbf16>
    %47 = vector.shape_cast %46 : vector<1x4x32xbf16> to vector<4x32xbf16>
    %cst_30 = arith.constant dense<0.000000e+00> : vector<12x32xf32>
    %48 = tpu.matmul %45, %47, %cst_30 {dimension_numbers = #tpu.dot_dimension_numbers<[1], [0], [0], [1], [0, 0, 1, 1], [], []>} : vector<12x4xbf16>, vector<4x32xbf16>, vector<12x32xf32> -> vector<12x32xf32>
    %49 = arith.addf %41, %48 : vector<12x32xf32>
    %c3 = arith.constant 3 : index
    %c0_31 = arith.constant 0 : index
    %c0_32 = arith.constant 0 : index
    %50 = vector.load %arg2[%c3, %c0_31, %c0_32] : memref<9x64x12xbf16, #tpu.memory_space<vmem>>, vector<1x12x12xbf16>
    %51 = vector.shape_cast %50 : vector<1x12x12xbf16> to vector<12x12xbf16>
    %cst_33 = arith.constant dense<0.000000e+00> : vector<12x4xf32>
    %52 = tpu.matmul %51, %24, %cst_33 {dimension_numbers = #tpu.dot_dimension_numbers<[1], [0], [0], [1], [0, 0, 1, 1], [], []>} : vector<12x12xbf16>, vector<12x4xbf16>, vector<12x4xf32> -> vector<12x4xf32>
    %53 = arith.truncf %52 : vector<12x4xf32> to vector<12x4xbf16>
    %c3_34 = arith.constant 3 : index
    %c0_35 = arith.constant 0 : index
    %c0_36 = arith.constant 0 : index
    %54 = vector.load %arg4[%c3_34, %c0_35, %c0_36] : memref<9x4x32xbf16, #tpu.memory_space<vmem>>, vector<1x4x32xbf16>
    %55 = vector.shape_cast %54 : vector<1x4x32xbf16> to vector<4x32xbf16>
    %cst_37 = arith.constant dense<0.000000e+00> : vector<12x32xf32>
    %56 = tpu.matmul %53, %55, %cst_37 {dimension_numbers = #tpu.dot_dimension_numbers<[1], [0], [0], [1], [0, 0, 1, 1], [], []>} : vector<12x4xbf16>, vector<4x32xbf16>, vector<12x32xf32> -> vector<12x32xf32>
    %57 = arith.addf %49, %56 : vector<12x32xf32>
    %c4_38 = arith.constant 4 : index
    %c0_39 = arith.constant 0 : index
    %c0_40 = arith.constant 0 : index
    %58 = vector.load %arg2[%c4_38, %c0_39, %c0_40] : memref<9x64x12xbf16, #tpu.memory_space<vmem>>, vector<1x12x12xbf16>
    %59 = vector.shape_cast %58 : vector<1x12x12xbf16> to vector<12x12xbf16>
    %cst_41 = arith.constant dense<0.000000e+00> : vector<12x4xf32>
    %60 = tpu.matmul %59, %24, %cst_41 {dimension_numbers = #tpu.dot_dimension_numbers<[1], [0], [0], [1], [0, 0, 1, 1], [], []>} : vector<12x12xbf16>, vector<12x4xbf16>, vector<12x4xf32> -> vector<12x4xf32>
    %61 = arith.truncf %60 : vector<12x4xf32> to vector<12x4xbf16>
    %c4_42 = arith.constant 4 : index
    %c0_43 = arith.constant 0 : index
    %c0_44 = arith.constant 0 : index
    %62 = vector.load %arg4[%c4_42, %c0_43, %c0_44] : memref<9x4x32xbf16, #tpu.memory_space<vmem>>, vector<1x4x32xbf16>
    %63 = vector.shape_cast %62 : vector<1x4x32xbf16> to vector<4x32xbf16>
    %cst_45 = arith.constant dense<0.000000e+00> : vector<12x32xf32>
    %64 = tpu.matmul %61, %63, %cst_45 {dimension_numbers = #tpu.dot_dimension_numbers<[1], [0], [0], [1], [0, 0, 1, 1], [], []>} : vector<12x4xbf16>, vector<4x32xbf16>, vector<12x32xf32> -> vector<12x32xf32>
    %65 = arith.addf %57, %64 : vector<12x32xf32>
    %c5 = arith.constant 5 : index
    %c0_46 = arith.constant 0 : index
    %c0_47 = arith.constant 0 : index
    %66 = vector.load %arg2[%c5, %c0_46, %c0_47] : memref<9x64x12xbf16, #tpu.memory_space<vmem>>, vector<1x12x12xbf16>
    %67 = vector.shape_cast %66 : vector<1x12x12xbf16> to vector<12x12xbf16>
    %cst_48 = arith.constant dense<0.000000e+00> : vector<12x4xf32>
    %68 = tpu.matmul %67, %24, %cst_48 {dimension_numbers = #tpu.dot_dimension_numbers<[1], [0], [0], [1], [0, 0, 1, 1], [], []>} : vector<12x12xbf16>, vector<12x4xbf16>, vector<12x4xf32> -> vector<12x4xf32>
    %69 = arith.truncf %68 : vector<12x4xf32> to vector<12x4xbf16>
    %c5_49 = arith.constant 5 : index
    %c0_50 = arith.constant 0 : index
    %c0_51 = arith.constant 0 : index
    %70 = vector.load %arg4[%c5_49, %c0_50, %c0_51] : memref<9x4x32xbf16, #tpu.memory_space<vmem>>, vector<1x4x32xbf16>
    %71 = vector.shape_cast %70 : vector<1x4x32xbf16> to vector<4x32xbf16>
    %cst_52 = arith.constant dense<0.000000e+00> : vector<12x32xf32>
    %72 = tpu.matmul %69, %71, %cst_52 {dimension_numbers = #tpu.dot_dimension_numbers<[1], [0], [0], [1], [0, 0, 1, 1], [], []>} : vector<12x4xbf16>, vector<4x32xbf16>, vector<12x32xf32> -> vector<12x32xf32>
    %73 = arith.addf %65, %72 : vector<12x32xf32>
    %c6 = arith.constant 6 : index
    %c0_53 = arith.constant 0 : index
    %c0_54 = arith.constant 0 : index
    %74 = vector.load %arg2[%c6, %c0_53, %c0_54] : memref<9x64x12xbf16, #tpu.memory_space<vmem>>, vector<1x12x12xbf16>
    %75 = vector.shape_cast %74 : vector<1x12x12xbf16> to vector<12x12xbf16>
    %cst_55 = arith.constant dense<0.000000e+00> : vector<12x4xf32>
    %76 = tpu.matmul %75, %24, %cst_55 {dimension_numbers = #tpu.dot_dimension_numbers<[1], [0], [0], [1], [0, 0, 1, 1], [], []>} : vector<12x12xbf16>, vector<12x4xbf16>, vector<12x4xf32> -> vector<12x4xf32>
    %77 = arith.truncf %76 : vector<12x4xf32> to vector<12x4xbf16>
    %c6_56 = arith.constant 6 : index
    %c0_57 = arith.constant 0 : index
    %c0_58 = arith.constant 0 : index
    %78 = vector.load %arg4[%c6_56, %c0_57, %c0_58] : memref<9x4x32xbf16, #tpu.memory_space<vmem>>, vector<1x4x32xbf16>
    %79 = vector.shape_cast %78 : vector<1x4x32xbf16> to vector<4x32xbf16>
    %cst_59 = arith.constant dense<0.000000e+00> : vector<12x32xf32>
    %80 = tpu.matmul %77, %79, %cst_59 {dimension_numbers = #tpu.dot_dimension_numbers<[1], [0], [0], [1], [0, 0, 1, 1], [], []>} : vector<12x4xbf16>, vector<4x32xbf16>, vector<12x32xf32> -> vector<12x32xf32>
    %81 = arith.addf %73, %80 : vector<12x32xf32>
    %c7 = arith.constant 7 : index
    %c0_60 = arith.constant 0 : index
    %c0_61 = arith.constant 0 : index
    %82 = vector.load %arg2[%c7, %c0_60, %c0_61] : memref<9x64x12xbf16, #tpu.memory_space<vmem>>, vector<1x12x12xbf16>
    %83 = vector.shape_cast %82 : vector<1x12x12xbf16> to vector<12x12xbf16>
    %cst_62 = arith.constant dense<0.000000e+00> : vector<12x4xf32>
    %84 = tpu.matmul %83, %24, %cst_62 {dimension_numbers = #tpu.dot_dimension_numbers<[1], [0], [0], [1], [0, 0, 1, 1], [], []>} : vector<12x12xbf16>, vector<12x4xbf16>, vector<12x4xf32> -> vector<12x4xf32>
    %85 = arith.truncf %84 : vector<12x4xf32> to vector<12x4xbf16>
    %c7_63 = arith.constant 7 : index
    %c0_64 = arith.constant 0 : index
    %c0_65 = arith.constant 0 : index
    %86 = vector.load %arg4[%c7_63, %c0_64, %c0_65] : memref<9x4x32xbf16, #tpu.memory_space<vmem>>, vector<1x4x32xbf16>
    %87 = vector.shape_cast %86 : vector<1x4x32xbf16> to vector<4x32xbf16>
    %cst_66 = arith.constant dense<0.000000e+00> : vector<12x32xf32>
    %88 = tpu.matmul %85, %87, %cst_66 {dimension_numbers = #tpu.dot_dimension_numbers<[1], [0], [0], [1], [0, 0, 1, 1], [], []>} : vector<12x4xbf16>, vector<4x32xbf16>, vector<12x32xf32> -> vector<12x32xf32>
    %89 = arith.addf %81, %88 : vector<12x32xf32>
    %c8 = arith.constant 8 : index
    %c0_67 = arith.constant 0 : index
    %c0_68 = arith.constant 0 : index
    %90 = vector.load %arg2[%c8, %c0_67, %c0_68] : memref<9x64x12xbf16, #tpu.memory_space<vmem>>, vector<1x12x12xbf16>
    %91 = vector.shape_cast %90 : vector<1x12x12xbf16> to vector<12x12xbf16>
    %cst_69 = arith.constant dense<0.000000e+00> : vector<12x4xf32>
    %92 = tpu.matmul %91, %24, %cst_69 {dimension_numbers = #tpu.dot_dimension_numbers<[1], [0], [0], [1], [0, 0, 1, 1], [], []>} : vector<12x12xbf16>, vector<12x4xbf16>, vector<12x4xf32> -> vector<12x4xf32>
    %93 = arith.truncf %92 : vector<12x4xf32> to vector<12x4xbf16>
    %c8_70 = arith.constant 8 : index
    %c0_71 = arith.constant 0 : index
    %c0_72 = arith.constant 0 : index
    %94 = vector.load %arg4[%c8_70, %c0_71, %c0_72] : memref<9x4x32xbf16, #tpu.memory_space<vmem>>, vector<1x4x32xbf16>
    %95 = vector.shape_cast %94 : vector<1x4x32xbf16> to vector<4x32xbf16>
    %cst_73 = arith.constant dense<0.000000e+00> : vector<12x32xf32>
    %96 = tpu.matmul %93, %95, %cst_73 {dimension_numbers = #tpu.dot_dimension_numbers<[1], [0], [0], [1], [0, 0, 1, 1], [], []>} : vector<12x4xbf16>, vector<4x32xbf16>, vector<12x32xf32> -> vector<12x32xf32>
    %97 = arith.addf %89, %96 : vector<12x32xf32>
    %c5_74 = arith.constant 5 : index
    %c0_75 = arith.constant 0 : index
    %98 = vector.load %arg1[%c5_74, %c0_75] : memref<8x1024xf32, #tpu.memory_space<vmem>>, vector<1x32xf32>
    %99 = vector.broadcast %98 : vector<1x32xf32> to vector<12x32xf32>
    %100 = arith.addf %97, %99 : vector<12x32xf32>
    %cst_76 = arith.constant 0.000000e+00 : f32
    %101 = vector.broadcast %cst_76 : f32 to vector<12x32xf32>
    %102 = arith.maximumf %100, %101 : vector<12x32xf32>
    %103 = arith.truncf %102 : vector<12x32xf32> to vector<12x32xbf16>
    %cst_77 = arith.constant 0.000000e+00 : f32
    %104 = vector.broadcast %cst_77 : f32 to vector<48x16xf32>
    %c0_78 = arith.constant 0 : index
    %c16 = arith.constant 16 : index
    %c0_79 = arith.constant 0 : index
    %105 = vector.load %arg2[%c0_78, %c16, %c0_79] : memref<9x64x12xbf16, #tpu.memory_space<vmem>>, vector<1x48x12xbf16>
    %106 = vector.shape_cast %105 : vector<1x48x12xbf16> to vector<48x12xbf16>
    %cst_80 = arith.constant dense<0.000000e+00> : vector<48x32xf32>
    %107 = tpu.matmul %106, %103, %cst_80 {dimension_numbers = #tpu.dot_dimension_numbers<[1], [0], [0], [1], [0, 0, 1, 1], [], []>} : vector<48x12xbf16>, vector<12x32xbf16>, vector<48x32xf32> -> vector<48x32xf32>
    %108 = arith.truncf %107 : vector<48x32xf32> to vector<48x32xbf16>
    %c0_81 = arith.constant 0 : index
    %c0_82 = arith.constant 0 : index
    %c0_83 = arith.constant 0 : index
    %109 = vector.load %arg5[%c0_81, %c0_82, %c0_83] : memref<9x32x16xbf16, #tpu.memory_space<vmem>>, vector<1x32x16xbf16>
    %110 = vector.shape_cast %109 : vector<1x32x16xbf16> to vector<32x16xbf16>
    %cst_84 = arith.constant dense<0.000000e+00> : vector<48x16xf32>
    %111 = tpu.matmul %108, %110, %cst_84 {dimension_numbers = #tpu.dot_dimension_numbers<[1], [0], [0], [1], [0, 0, 1, 1], [], []>} : vector<48x32xbf16>, vector<32x16xbf16>, vector<48x16xf32> -> vector<48x16xf32>
    %112 = arith.addf %104, %111 : vector<48x16xf32>
    %c1_85 = arith.constant 1 : index
    %c16_86 = arith.constant 16 : index
    %c0_87 = arith.constant 0 : index
    %113 = vector.load %arg2[%c1_85, %c16_86, %c0_87] : memref<9x64x12xbf16, #tpu.memory_space<vmem>>, vector<1x48x12xbf16>
    %114 = vector.shape_cast %113 : vector<1x48x12xbf16> to vector<48x12xbf16>
    %cst_88 = arith.constant dense<0.000000e+00> : vector<48x32xf32>
    %115 = tpu.matmul %114, %103, %cst_88 {dimension_numbers = #tpu.dot_dimension_numbers<[1], [0], [0], [1], [0, 0, 1, 1], [], []>} : vector<48x12xbf16>, vector<12x32xbf16>, vector<48x32xf32> -> vector<48x32xf32>
    %116 = arith.truncf %115 : vector<48x32xf32> to vector<48x32xbf16>
    %c1_89 = arith.constant 1 : index
    %c0_90 = arith.constant 0 : index
    %c0_91 = arith.constant 0 : index
    %117 = vector.load %arg5[%c1_89, %c0_90, %c0_91] : memref<9x32x16xbf16, #tpu.memory_space<vmem>>, vector<1x32x16xbf16>
    %118 = vector.shape_cast %117 : vector<1x32x16xbf16> to vector<32x16xbf16>
    %cst_92 = arith.constant dense<0.000000e+00> : vector<48x16xf32>
    %119 = tpu.matmul %116, %118, %cst_92 {dimension_numbers = #tpu.dot_dimension_numbers<[1], [0], [0], [1], [0, 0, 1, 1], [], []>} : vector<48x32xbf16>, vector<32x16xbf16>, vector<48x16xf32> -> vector<48x16xf32>
    %120 = arith.addf %112, %119 : vector<48x16xf32>
    %c2_93 = arith.constant 2 : index
    %c16_94 = arith.constant 16 : index
    %c0_95 = arith.constant 0 : index
    %121 = vector.load %arg2[%c2_93, %c16_94, %c0_95] : memref<9x64x12xbf16, #tpu.memory_space<vmem>>, vector<1x48x12xbf16>
    %122 = vector.shape_cast %121 : vector<1x48x12xbf16> to vector<48x12xbf16>
    %cst_96 = arith.constant dense<0.000000e+00> : vector<48x32xf32>
    %123 = tpu.matmul %122, %103, %cst_96 {dimension_numbers = #tpu.dot_dimension_numbers<[1], [0], [0], [1], [0, 0, 1, 1], [], []>} : vector<48x12xbf16>, vector<12x32xbf16>, vector<48x32xf32> -> vector<48x32xf32>
    %124 = arith.truncf %123 : vector<48x32xf32> to vector<48x32xbf16>
    %c2_97 = arith.constant 2 : index
    %c0_98 = arith.constant 0 : index
    %c0_99 = arith.constant 0 : index
    %125 = vector.load %arg5[%c2_97, %c0_98, %c0_99] : memref<9x32x16xbf16, #tpu.memory_space<vmem>>, vector<1x32x16xbf16>
    %126 = vector.shape_cast %125 : vector<1x32x16xbf16> to vector<32x16xbf16>
    %cst_100 = arith.constant dense<0.000000e+00> : vector<48x16xf32>
    %127 = tpu.matmul %124, %126, %cst_100 {dimension_numbers = #tpu.dot_dimension_numbers<[1], [0], [0], [1], [0, 0, 1, 1], [], []>} : vector<48x32xbf16>, vector<32x16xbf16>, vector<48x16xf32> -> vector<48x16xf32>
    %128 = arith.addf %120, %127 : vector<48x16xf32>
    %c3_101 = arith.constant 3 : index
    %c16_102 = arith.constant 16 : index
    %c0_103 = arith.constant 0 : index
    %129 = vector.load %arg2[%c3_101, %c16_102, %c0_103] : memref<9x64x12xbf16, #tpu.memory_space<vmem>>, vector<1x48x12xbf16>
    %130 = vector.shape_cast %129 : vector<1x48x12xbf16> to vector<48x12xbf16>
    %cst_104 = arith.constant dense<0.000000e+00> : vector<48x32xf32>
    %131 = tpu.matmul %130, %103, %cst_104 {dimension_numbers = #tpu.dot_dimension_numbers<[1], [0], [0], [1], [0, 0, 1, 1], [], []>} : vector<48x12xbf16>, vector<12x32xbf16>, vector<48x32xf32> -> vector<48x32xf32>
    %132 = arith.truncf %131 : vector<48x32xf32> to vector<48x32xbf16>
    %c3_105 = arith.constant 3 : index
    %c0_106 = arith.constant 0 : index
    %c0_107 = arith.constant 0 : index
    %133 = vector.load %arg5[%c3_105, %c0_106, %c0_107] : memref<9x32x16xbf16, #tpu.memory_space<vmem>>, vector<1x32x16xbf16>
    %134 = vector.shape_cast %133 : vector<1x32x16xbf16> to vector<32x16xbf16>
    %cst_108 = arith.constant dense<0.000000e+00> : vector<48x16xf32>
    %135 = tpu.matmul %132, %134, %cst_108 {dimension_numbers = #tpu.dot_dimension_numbers<[1], [0], [0], [1], [0, 0, 1, 1], [], []>} : vector<48x32xbf16>, vector<32x16xbf16>, vector<48x16xf32> -> vector<48x16xf32>
    %136 = arith.addf %128, %135 : vector<48x16xf32>
    %c4_109 = arith.constant 4 : index
    %c16_110 = arith.constant 16 : index
    %c0_111 = arith.constant 0 : index
    %137 = vector.load %arg2[%c4_109, %c16_110, %c0_111] : memref<9x64x12xbf16, #tpu.memory_space<vmem>>, vector<1x48x12xbf16>
    %138 = vector.shape_cast %137 : vector<1x48x12xbf16> to vector<48x12xbf16>
    %cst_112 = arith.constant dense<0.000000e+00> : vector<48x32xf32>
    %139 = tpu.matmul %138, %103, %cst_112 {dimension_numbers = #tpu.dot_dimension_numbers<[1], [0], [0], [1], [0, 0, 1, 1], [], []>} : vector<48x12xbf16>, vector<12x32xbf16>, vector<48x32xf32> -> vector<48x32xf32>
    %140 = arith.truncf %139 : vector<48x32xf32> to vector<48x32xbf16>
    %c4_113 = arith.constant 4 : index
    %c0_114 = arith.constant 0 : index
    %c0_115 = arith.constant 0 : index
    %141 = vector.load %arg5[%c4_113, %c0_114, %c0_115] : memref<9x32x16xbf16, #tpu.memory_space<vmem>>, vector<1x32x16xbf16>
    %142 = vector.shape_cast %141 : vector<1x32x16xbf16> to vector<32x16xbf16>
    %cst_116 = arith.constant dense<0.000000e+00> : vector<48x16xf32>
    %143 = tpu.matmul %140, %142, %cst_116 {dimension_numbers = #tpu.dot_dimension_numbers<[1], [0], [0], [1], [0, 0, 1, 1], [], []>} : vector<48x32xbf16>, vector<32x16xbf16>, vector<48x16xf32> -> vector<48x16xf32>
    %144 = arith.addf %136, %143 : vector<48x16xf32>
    %c5_117 = arith.constant 5 : index
    %c16_118 = arith.constant 16 : index
    %c0_119 = arith.constant 0 : index
    %145 = vector.load %arg2[%c5_117, %c16_118, %c0_119] : memref<9x64x12xbf16, #tpu.memory_space<vmem>>, vector<1x48x12xbf16>
    %146 = vector.shape_cast %145 : vector<1x48x12xbf16> to vector<48x12xbf16>
    %cst_120 = arith.constant dense<0.000000e+00> : vector<48x32xf32>
    %147 = tpu.matmul %146, %103, %cst_120 {dimension_numbers = #tpu.dot_dimension_numbers<[1], [0], [0], [1], [0, 0, 1, 1], [], []>} : vector<48x12xbf16>, vector<12x32xbf16>, vector<48x32xf32> -> vector<48x32xf32>
    %148 = arith.truncf %147 : vector<48x32xf32> to vector<48x32xbf16>
    %c5_121 = arith.constant 5 : index
    %c0_122 = arith.constant 0 : index
    %c0_123 = arith.constant 0 : index
    %149 = vector.load %arg5[%c5_121, %c0_122, %c0_123] : memref<9x32x16xbf16, #tpu.memory_space<vmem>>, vector<1x32x16xbf16>
    %150 = vector.shape_cast %149 : vector<1x32x16xbf16> to vector<32x16xbf16>
    %cst_124 = arith.constant dense<0.000000e+00> : vector<48x16xf32>
    %151 = tpu.matmul %148, %150, %cst_124 {dimension_numbers = #tpu.dot_dimension_numbers<[1], [0], [0], [1], [0, 0, 1, 1], [], []>} : vector<48x32xbf16>, vector<32x16xbf16>, vector<48x16xf32> -> vector<48x16xf32>
    %152 = arith.addf %144, %151 : vector<48x16xf32>
    %c6_125 = arith.constant 6 : index
    %c16_126 = arith.constant 16 : index
    %c0_127 = arith.constant 0 : index
    %153 = vector.load %arg2[%c6_125, %c16_126, %c0_127] : memref<9x64x12xbf16, #tpu.memory_space<vmem>>, vector<1x48x12xbf16>
    %154 = vector.shape_cast %153 : vector<1x48x12xbf16> to vector<48x12xbf16>
    %cst_128 = arith.constant dense<0.000000e+00> : vector<48x32xf32>
    %155 = tpu.matmul %154, %103, %cst_128 {dimension_numbers = #tpu.dot_dimension_numbers<[1], [0], [0], [1], [0, 0, 1, 1], [], []>} : vector<48x12xbf16>, vector<12x32xbf16>, vector<48x32xf32> -> vector<48x32xf32>
    %156 = arith.truncf %155 : vector<48x32xf32> to vector<48x32xbf16>
    %c6_129 = arith.constant 6 : index
    %c0_130 = arith.constant 0 : index
    %c0_131 = arith.constant 0 : index
    %157 = vector.load %arg5[%c6_129, %c0_130, %c0_131] : memref<9x32x16xbf16, #tpu.memory_space<vmem>>, vector<1x32x16xbf16>
    %158 = vector.shape_cast %157 : vector<1x32x16xbf16> to vector<32x16xbf16>
    %cst_132 = arith.constant dense<0.000000e+00> : vector<48x16xf32>
    %159 = tpu.matmul %156, %158, %cst_132 {dimension_numbers = #tpu.dot_dimension_numbers<[1], [0], [0], [1], [0, 0, 1, 1], [], []>} : vector<48x32xbf16>, vector<32x16xbf16>, vector<48x16xf32> -> vector<48x16xf32>
    %160 = arith.addf %152, %159 : vector<48x16xf32>
    %c7_133 = arith.constant 7 : index
    %c16_134 = arith.constant 16 : index
    %c0_135 = arith.constant 0 : index
    %161 = vector.load %arg2[%c7_133, %c16_134, %c0_135] : memref<9x64x12xbf16, #tpu.memory_space<vmem>>, vector<1x48x12xbf16>
    %162 = vector.shape_cast %161 : vector<1x48x12xbf16> to vector<48x12xbf16>
    %cst_136 = arith.constant dense<0.000000e+00> : vector<48x32xf32>
    %163 = tpu.matmul %162, %103, %cst_136 {dimension_numbers = #tpu.dot_dimension_numbers<[1], [0], [0], [1], [0, 0, 1, 1], [], []>} : vector<48x12xbf16>, vector<12x32xbf16>, vector<48x32xf32> -> vector<48x32xf32>
    %164 = arith.truncf %163 : vector<48x32xf32> to vector<48x32xbf16>
    %c7_137 = arith.constant 7 : index
    %c0_138 = arith.constant 0 : index
    %c0_139 = arith.constant 0 : index
    %165 = vector.load %arg5[%c7_137, %c0_138, %c0_139] : memref<9x32x16xbf16, #tpu.memory_space<vmem>>, vector<1x32x16xbf16>
    %166 = vector.shape_cast %165 : vector<1x32x16xbf16> to vector<32x16xbf16>
    %cst_140 = arith.constant dense<0.000000e+00> : vector<48x16xf32>
    %167 = tpu.matmul %164, %166, %cst_140 {dimension_numbers = #tpu.dot_dimension_numbers<[1], [0], [0], [1], [0, 0, 1, 1], [], []>} : vector<48x32xbf16>, vector<32x16xbf16>, vector<48x16xf32> -> vector<48x16xf32>
    %168 = arith.addf %160, %167 : vector<48x16xf32>
    %c8_141 = arith.constant 8 : index
    %c16_142 = arith.constant 16 : index
    %c0_143 = arith.constant 0 : index
    %169 = vector.load %arg2[%c8_141, %c16_142, %c0_143] : memref<9x64x12xbf16, #tpu.memory_space<vmem>>, vector<1x48x12xbf16>
    %170 = vector.shape_cast %169 : vector<1x48x12xbf16> to vector<48x12xbf16>
    %cst_144 = arith.constant dense<0.000000e+00> : vector<48x32xf32>
    %171 = tpu.matmul %170, %103, %cst_144 {dimension_numbers = #tpu.dot_dimension_numbers<[1], [0], [0], [1], [0, 0, 1, 1], [], []>} : vector<48x12xbf16>, vector<12x32xbf16>, vector<48x32xf32> -> vector<48x32xf32>
    %172 = arith.truncf %171 : vector<48x32xf32> to vector<48x32xbf16>
    %c8_145 = arith.constant 8 : index
    %c0_146 = arith.constant 0 : index
    %c0_147 = arith.constant 0 : index
    %173 = vector.load %arg5[%c8_145, %c0_146, %c0_147] : memref<9x32x16xbf16, #tpu.memory_space<vmem>>, vector<1x32x16xbf16>
    %174 = vector.shape_cast %173 : vector<1x32x16xbf16> to vector<32x16xbf16>
    %cst_148 = arith.constant dense<0.000000e+00> : vector<48x16xf32>
    %175 = tpu.matmul %172, %174, %cst_148 {dimension_numbers = #tpu.dot_dimension_numbers<[1], [0], [0], [1], [0, 0, 1, 1], [], []>} : vector<48x32xbf16>, vector<32x16xbf16>, vector<48x16xf32> -> vector<48x16xf32>
    %176 = arith.addf %168, %175 : vector<48x16xf32>
    %c6_149 = arith.constant 6 : index
    %c0_150 = arith.constant 0 : index
    %177 = vector.load %arg1[%c6_149, %c0_150] : memref<8x1024xf32, #tpu.memory_space<vmem>>, vector<1x16xf32>
    %178 = vector.broadcast %177 : vector<1x16xf32> to vector<48x16xf32>
    %179 = arith.addf %176, %178 : vector<48x16xf32>
    %cst_151 = arith.constant 0.000000e+00 : f32
    %180 = vector.broadcast %cst_151 : f32 to vector<48x16xf32>
    %181 = arith.maximumf %179, %180 : vector<48x16xf32>
    %182 = arith.truncf %181 : vector<48x16xf32> to vector<48x16xbf16>
    %cst_152 = arith.constant 0.000000e+00 : f32
    %183 = vector.broadcast %cst_152 : f32 to vector<192x128xf32>
    %c0_153 = arith.constant 0 : index
    %c0_154 = arith.constant 0 : index
    %c0_155 = arith.constant 0 : index
    %184 = vector.load %arg3[%c0_153, %c0_154, %c0_155] : memref<9x192x48xbf16, #tpu.memory_space<vmem>>, vector<1x192x48xbf16>
    %185 = vector.shape_cast %184 : vector<1x192x48xbf16> to vector<192x48xbf16>
    %cst_156 = arith.constant dense<0.000000e+00> : vector<192x16xf32>
    %186 = tpu.matmul %185, %182, %cst_156 {dimension_numbers = #tpu.dot_dimension_numbers<[1], [0], [0], [1], [0, 0, 1, 1], [], []>} : vector<192x48xbf16>, vector<48x16xbf16>, vector<192x16xf32> -> vector<192x16xf32>
    %187 = arith.truncf %186 : vector<192x16xf32> to vector<192x16xbf16>
    %c0_157 = arith.constant 0 : index
    %c0_158 = arith.constant 0 : index
    %c0_159 = arith.constant 0 : index
    %188 = vector.load %arg6[%c0_157, %c0_158, %c0_159] : memref<9x16x128xbf16, #tpu.memory_space<vmem>>, vector<1x16x128xbf16>
    %189 = vector.shape_cast %188 : vector<1x16x128xbf16> to vector<16x128xbf16>
    %cst_160 = arith.constant dense<0.000000e+00> : vector<192x128xf32>
    %190 = tpu.matmul %187, %189, %cst_160 {dimension_numbers = #tpu.dot_dimension_numbers<[1], [0], [0], [1], [0, 0, 1, 1], [], []>} : vector<192x16xbf16>, vector<16x128xbf16>, vector<192x128xf32> -> vector<192x128xf32>
    %191 = arith.addf %183, %190 : vector<192x128xf32>
    %c1_161 = arith.constant 1 : index
    %c0_162 = arith.constant 0 : index
    %c0_163 = arith.constant 0 : index
    %192 = vector.load %arg3[%c1_161, %c0_162, %c0_163] : memref<9x192x48xbf16, #tpu.memory_space<vmem>>, vector<1x192x48xbf16>
    %193 = vector.shape_cast %192 : vector<1x192x48xbf16> to vector<192x48xbf16>
    %cst_164 = arith.constant dense<0.000000e+00> : vector<192x16xf32>
    %194 = tpu.matmul %193, %182, %cst_164 {dimension_numbers = #tpu.dot_dimension_numbers<[1], [0], [0], [1], [0, 0, 1, 1], [], []>} : vector<192x48xbf16>, vector<48x16xbf16>, vector<192x16xf32> -> vector<192x16xf32>
    %195 = arith.truncf %194 : vector<192x16xf32> to vector<192x16xbf16>
    %c1_165 = arith.constant 1 : index
    %c0_166 = arith.constant 0 : index
    %c0_167 = arith.constant 0 : index
    %196 = vector.load %arg6[%c1_165, %c0_166, %c0_167] : memref<9x16x128xbf16, #tpu.memory_space<vmem>>, vector<1x16x128xbf16>
    %197 = vector.shape_cast %196 : vector<1x16x128xbf16> to vector<16x128xbf16>
    %cst_168 = arith.constant dense<0.000000e+00> : vector<192x128xf32>
    %198 = tpu.matmul %195, %197, %cst_168 {dimension_numbers = #tpu.dot_dimension_numbers<[1], [0], [0], [1], [0, 0, 1, 1], [], []>} : vector<192x16xbf16>, vector<16x128xbf16>, vector<192x128xf32> -> vector<192x128xf32>
    %199 = arith.addf %191, %198 : vector<192x128xf32>
    %c2_169 = arith.constant 2 : index
    %c0_170 = arith.constant 0 : index
    %c0_171 = arith.constant 0 : index
    %200 = vector.load %arg3[%c2_169, %c0_170, %c0_171] : memref<9x192x48xbf16, #tpu.memory_space<vmem>>, vector<1x192x48xbf16>
    %201 = vector.shape_cast %200 : vector<1x192x48xbf16> to vector<192x48xbf16>
    %cst_172 = arith.constant dense<0.000000e+00> : vector<192x16xf32>
    %202 = tpu.matmul %201, %182, %cst_172 {dimension_numbers = #tpu.dot_dimension_numbers<[1], [0], [0], [1], [0, 0, 1, 1], [], []>} : vector<192x48xbf16>, vector<48x16xbf16>, vector<192x16xf32> -> vector<192x16xf32>
    %203 = arith.truncf %202 : vector<192x16xf32> to vector<192x16xbf16>
    %c2_173 = arith.constant 2 : index
    %c0_174 = arith.constant 0 : index
    %c0_175 = arith.constant 0 : index
    %204 = vector.load %arg6[%c2_173, %c0_174, %c0_175] : memref<9x16x128xbf16, #tpu.memory_space<vmem>>, vector<1x16x128xbf16>
    %205 = vector.shape_cast %204 : vector<1x16x128xbf16> to vector<16x128xbf16>
    %cst_176 = arith.constant dense<0.000000e+00> : vector<192x128xf32>
    %206 = tpu.matmul %203, %205, %cst_176 {dimension_numbers = #tpu.dot_dimension_numbers<[1], [0], [0], [1], [0, 0, 1, 1], [], []>} : vector<192x16xbf16>, vector<16x128xbf16>, vector<192x128xf32> -> vector<192x128xf32>
    %207 = arith.addf %199, %206 : vector<192x128xf32>
    %c3_177 = arith.constant 3 : index
    %c0_178 = arith.constant 0 : index
    %c0_179 = arith.constant 0 : index
    %208 = vector.load %arg3[%c3_177, %c0_178, %c0_179] : memref<9x192x48xbf16, #tpu.memory_space<vmem>>, vector<1x192x48xbf16>
    %209 = vector.shape_cast %208 : vector<1x192x48xbf16> to vector<192x48xbf16>
    %cst_180 = arith.constant dense<0.000000e+00> : vector<192x16xf32>
    %210 = tpu.matmul %209, %182, %cst_180 {dimension_numbers = #tpu.dot_dimension_numbers<[1], [0], [0], [1], [0, 0, 1, 1], [], []>} : vector<192x48xbf16>, vector<48x16xbf16>, vector<192x16xf32> -> vector<192x16xf32>
    %211 = arith.truncf %210 : vector<192x16xf32> to vector<192x16xbf16>
    %c3_181 = arith.constant 3 : index
    %c0_182 = arith.constant 0 : index
    %c0_183 = arith.constant 0 : index
    %212 = vector.load %arg6[%c3_181, %c0_182, %c0_183] : memref<9x16x128xbf16, #tpu.memory_space<vmem>>, vector<1x16x128xbf16>
    %213 = vector.shape_cast %212 : vector<1x16x128xbf16> to vector<16x128xbf16>
    %cst_184 = arith.constant dense<0.000000e+00> : vector<192x128xf32>
    %214 = tpu.matmul %211, %213, %cst_184 {dimension_numbers = #tpu.dot_dimension_numbers<[1], [0], [0], [1], [0, 0, 1, 1], [], []>} : vector<192x16xbf16>, vector<16x128xbf16>, vector<192x128xf32> -> vector<192x128xf32>
    %215 = arith.addf %207, %214 : vector<192x128xf32>
    %c4_185 = arith.constant 4 : index
    %c0_186 = arith.constant 0 : index
    %c0_187 = arith.constant 0 : index
    %216 = vector.load %arg3[%c4_185, %c0_186, %c0_187] : memref<9x192x48xbf16, #tpu.memory_space<vmem>>, vector<1x192x48xbf16>
    %217 = vector.shape_cast %216 : vector<1x192x48xbf16> to vector<192x48xbf16>
    %cst_188 = arith.constant dense<0.000000e+00> : vector<192x16xf32>
    %218 = tpu.matmul %217, %182, %cst_188 {dimension_numbers = #tpu.dot_dimension_numbers<[1], [0], [0], [1], [0, 0, 1, 1], [], []>} : vector<192x48xbf16>, vector<48x16xbf16>, vector<192x16xf32> -> vector<192x16xf32>
    %219 = arith.truncf %218 : vector<192x16xf32> to vector<192x16xbf16>
    %c4_189 = arith.constant 4 : index
    %c0_190 = arith.constant 0 : index
    %c0_191 = arith.constant 0 : index
    %220 = vector.load %arg6[%c4_189, %c0_190, %c0_191] : memref<9x16x128xbf16, #tpu.memory_space<vmem>>, vector<1x16x128xbf16>
    %221 = vector.shape_cast %220 : vector<1x16x128xbf16> to vector<16x128xbf16>
    %cst_192 = arith.constant dense<0.000000e+00> : vector<192x128xf32>
    %222 = tpu.matmul %219, %221, %cst_192 {dimension_numbers = #tpu.dot_dimension_numbers<[1], [0], [0], [1], [0, 0, 1, 1], [], []>} : vector<192x16xbf16>, vector<16x128xbf16>, vector<192x128xf32> -> vector<192x128xf32>
    %223 = arith.addf %215, %222 : vector<192x128xf32>
    %c5_193 = arith.constant 5 : index
    %c0_194 = arith.constant 0 : index
    %c0_195 = arith.constant 0 : index
    %224 = vector.load %arg3[%c5_193, %c0_194, %c0_195] : memref<9x192x48xbf16, #tpu.memory_space<vmem>>, vector<1x192x48xbf16>
    %225 = vector.shape_cast %224 : vector<1x192x48xbf16> to vector<192x48xbf16>
    %cst_196 = arith.constant dense<0.000000e+00> : vector<192x16xf32>
    %226 = tpu.matmul %225, %182, %cst_196 {dimension_numbers = #tpu.dot_dimension_numbers<[1], [0], [0], [1], [0, 0, 1, 1], [], []>} : vector<192x48xbf16>, vector<48x16xbf16>, vector<192x16xf32> -> vector<192x16xf32>
    %227 = arith.truncf %226 : vector<192x16xf32> to vector<192x16xbf16>
    %c5_197 = arith.constant 5 : index
    %c0_198 = arith.constant 0 : index
    %c0_199 = arith.constant 0 : index
    %228 = vector.load %arg6[%c5_197, %c0_198, %c0_199] : memref<9x16x128xbf16, #tpu.memory_space<vmem>>, vector<1x16x128xbf16>
    %229 = vector.shape_cast %228 : vector<1x16x128xbf16> to vector<16x128xbf16>
    %cst_200 = arith.constant dense<0.000000e+00> : vector<192x128xf32>
    %230 = tpu.matmul %227, %229, %cst_200 {dimension_numbers = #tpu.dot_dimension_numbers<[1], [0], [0], [1], [0, 0, 1, 1], [], []>} : vector<192x16xbf16>, vector<16x128xbf16>, vector<192x128xf32> -> vector<192x128xf32>
    %231 = arith.addf %223, %230 : vector<192x128xf32>
    %c6_201 = arith.constant 6 : index
    %c0_202 = arith.constant 0 : index
    %c0_203 = arith.constant 0 : index
    %232 = vector.load %arg3[%c6_201, %c0_202, %c0_203] : memref<9x192x48xbf16, #tpu.memory_space<vmem>>, vector<1x192x48xbf16>
    %233 = vector.shape_cast %232 : vector<1x192x48xbf16> to vector<192x48xbf16>
    %cst_204 = arith.constant dense<0.000000e+00> : vector<192x16xf32>
    %234 = tpu.matmul %233, %182, %cst_204 {dimension_numbers = #tpu.dot_dimension_numbers<[1], [0], [0], [1], [0, 0, 1, 1], [], []>} : vector<192x48xbf16>, vector<48x16xbf16>, vector<192x16xf32> -> vector<192x16xf32>
    %235 = arith.truncf %234 : vector<192x16xf32> to vector<192x16xbf16>
    %c6_205 = arith.constant 6 : index
    %c0_206 = arith.constant 0 : index
    %c0_207 = arith.constant 0 : index
    %236 = vector.load %arg6[%c6_205, %c0_206, %c0_207] : memref<9x16x128xbf16, #tpu.memory_space<vmem>>, vector<1x16x128xbf16>
    %237 = vector.shape_cast %236 : vector<1x16x128xbf16> to vector<16x128xbf16>
    %cst_208 = arith.constant dense<0.000000e+00> : vector<192x128xf32>
    %238 = tpu.matmul %235, %237, %cst_208 {dimension_numbers = #tpu.dot_dimension_numbers<[1], [0], [0], [1], [0, 0, 1, 1], [], []>} : vector<192x16xbf16>, vector<16x128xbf16>, vector<192x128xf32> -> vector<192x128xf32>
    %239 = arith.addf %231, %238 : vector<192x128xf32>
    %c7_209 = arith.constant 7 : index
    %c0_210 = arith.constant 0 : index
    %c0_211 = arith.constant 0 : index
    %240 = vector.load %arg3[%c7_209, %c0_210, %c0_211] : memref<9x192x48xbf16, #tpu.memory_space<vmem>>, vector<1x192x48xbf16>
    %241 = vector.shape_cast %240 : vector<1x192x48xbf16> to vector<192x48xbf16>
    %cst_212 = arith.constant dense<0.000000e+00> : vector<192x16xf32>
    %242 = tpu.matmul %241, %182, %cst_212 {dimension_numbers = #tpu.dot_dimension_numbers<[1], [0], [0], [1], [0, 0, 1, 1], [], []>} : vector<192x48xbf16>, vector<48x16xbf16>, vector<192x16xf32> -> vector<192x16xf32>
    %243 = arith.truncf %242 : vector<192x16xf32> to vector<192x16xbf16>
    %c7_213 = arith.constant 7 : index
    %c0_214 = arith.constant 0 : index
    %c0_215 = arith.constant 0 : index
    %244 = vector.load %arg6[%c7_213, %c0_214, %c0_215] : memref<9x16x128xbf16, #tpu.memory_space<vmem>>, vector<1x16x128xbf16>
    %245 = vector.shape_cast %244 : vector<1x16x128xbf16> to vector<16x128xbf16>
    %cst_216 = arith.constant dense<0.000000e+00> : vector<192x128xf32>
    %246 = tpu.matmul %243, %245, %cst_216 {dimension_numbers = #tpu.dot_dimension_numbers<[1], [0], [0], [1], [0, 0, 1, 1], [], []>} : vector<192x16xbf16>, vector<16x128xbf16>, vector<192x128xf32> -> vector<192x128xf32>
    %247 = arith.addf %239, %246 : vector<192x128xf32>
    %c8_217 = arith.constant 8 : index
    %c0_218 = arith.constant 0 : index
    %c0_219 = arith.constant 0 : index
    %248 = vector.load %arg3[%c8_217, %c0_218, %c0_219] : memref<9x192x48xbf16, #tpu.memory_space<vmem>>, vector<1x192x48xbf16>
    %249 = vector.shape_cast %248 : vector<1x192x48xbf16> to vector<192x48xbf16>
    %cst_220 = arith.constant dense<0.000000e+00> : vector<192x16xf32>
    %250 = tpu.matmul %249, %182, %cst_220 {dimension_numbers = #tpu.dot_dimension_numbers<[1], [0], [0], [1], [0, 0, 1, 1], [], []>} : vector<192x48xbf16>, vector<48x16xbf16>, vector<192x16xf32> -> vector<192x16xf32>
    %251 = arith.truncf %250 : vector<192x16xf32> to vector<192x16xbf16>
    %c8_221 = arith.constant 8 : index
    %c0_222 = arith.constant 0 : index
    %c0_223 = arith.constant 0 : index
    %252 = vector.load %arg6[%c8_221, %c0_222, %c0_223] : memref<9x16x128xbf16, #tpu.memory_space<vmem>>, vector<1x16x128xbf16>
    %253 = vector.shape_cast %252 : vector<1x16x128xbf16> to vector<16x128xbf16>
    %cst_224 = arith.constant dense<0.000000e+00> : vector<192x128xf32>
    %254 = tpu.matmul %251, %253, %cst_224 {dimension_numbers = #tpu.dot_dimension_numbers<[1], [0], [0], [1], [0, 0, 1, 1], [], []>} : vector<192x16xbf16>, vector<16x128xbf16>, vector<192x128xf32> -> vector<192x128xf32>
    %255 = arith.addf %247, %254 : vector<192x128xf32>
    %c7_225 = arith.constant 7 : index
    %c0_226 = arith.constant 0 : index
    %256 = vector.load %arg1[%c7_225, %c0_226] : memref<8x1024xf32, #tpu.memory_space<vmem>>, vector<1x128xf32>
    %257 = vector.broadcast %256 : vector<1x128xf32> to vector<192x128xf32>
    %258 = arith.addf %255, %257 : vector<192x128xf32>
    %259 = arith.negf %258 : vector<192x128xf32>
    %260 = math.exp %259 : vector<192x128xf32>
    %cst_227 = arith.constant 1.000000e+00 : f32
    %261 = vector.broadcast %cst_227 : f32 to vector<192x128xf32>
    %262 = arith.addf %261, %260 : vector<192x128xf32>
    %263 = arith.divf %261, %262 : vector<192x128xf32>
    %c0_228 = arith.constant 0 : index
    %c0_229 = arith.constant 0 : index
    %264 = vector.load %arg7[%c0_228, %c0_229] : memref<192x128xf32, #tpu.memory_space<vmem>>, vector<192x128xf32>
    tpu.vector_store %arg7[%c0_228, %c0_229], %263 {strides = array<i32>} : memref<192x128xf32, #tpu.memory_space<vmem>>, vector<192x128xf32>,
    return
  }
}

</mosaic_0001>

<bundles_post_ra>
// kernel: model_forward.1
= control target key start
LH: loop header
LB: loop body
LE: loop exit
PB: predicated region body
PF: predicated region fallthrough
CT: control target
= control target key end

     0   :  { %vm48_vm0 = vcmask 1043456   ;;  %vm8935_vm1 = vcmask 31744   ;;  %s8927_s1 = inlined_call_operand.vmem [shape: f32[8,1024], index: 1, kind: input, shape index: {}]   ;;  %s8928_s0 = inlined_call_operand.vmem [shape: f32[12,4], index: 0, kind: input, shape index: {}]   ;;  %s8929_s4 = inlined_call_operand.vmem [shape: bf16[9,4,32], index: 4, kind: input, shape index: {}]   ;;  %s8930_s2 = inlined_call_operand.vmem [shape: bf16[9,64,12], index: 2, kind: input, shape index: {}]   ;;  %s8931_s5 = inlined_call_operand.vmem [shape: bf16[9,32,16], index: 5, kind: input, shape index: {}]   ;;  %s8932_s6 = inlined_call_operand.vmem [shape: bf16[9,16,128], index: 6, kind: input, shape index: {}]   ;;  %s8933_s3 = inlined_call_operand.vmem [shape: bf16[9,192,48], index: 3, kind: input, shape index: {}]   ;;  %s8934_s7 = inlined_call_operand.vmem [shape: f32[192,128], index: 7, kind: output, shape index: {}]  }
   0x1   :  { %v29_v0 = vld [vmem:[%s8927_s1] sm:$0xf]  ;;  %v30_v1 = vld [vmem:[%s8927_s1 + $0x8] sm:$0xf]  ;;  %v31_v2 = vld [vmem:[%s8927_s1 + $0x10] sm:$0xf] }
   0x2   :  { %5617 = vmatpush.msk.msra.mxu0 %vm48_vm0, %v29_v0  ;;  %5620 = vmatpush.msk.msra.mxu1 %vm48_vm0, %v30_v1  ;;  %v32_v3 = vld [vmem:[%s8927_s1 + $0x18] sm:$0xf]  ;;  %v27_v4 = vld [vmem:[%s8928_s0] sm:$0xff]  ;;  %v34_v6 = vld [vmem:[%s8927_s1 + $0x28] sm:$0xf]  ;;  %v493_v7 = vpack.c.bf16 %v29_v0, %v29_v0  ;;  %v494_v8 = vpack.c.bf16 %v30_v1, %v30_v1  ;;  %v495_v11 = vpack.c.bf16 %v31_v2, %v31_v2 }
   0x3   :  { %5623 = vmatpush.msk.msra.mxu2 %vm48_vm0, %v31_v2  ;;  %5626 = vmatpush.msk.msra.mxu3 %vm48_vm0, %v32_v3  ;;  %v33_v5 = vld [vmem:[%s8927_s1 + $0x20] sm:$0xf]  ;;  %v35_v9 = vld [vmem:[%s8927_s1 + $0x30] sm:$0xf]  ;;  %v36_v10 = vld [vmem:[%s8927_s1 + $0x38] sm:$0xf]  ;;  %v496_v12 = vpack.c.bf16 %v32_v3, %v32_v3  ;;  %v498_v15 = vpack.c.bf16 %v34_v6, %v34_v6 }
   0x4   :  { %5618 = vmatmul.msk.f32.vlgmr.msra.gmra.mxu0 %vm8935_vm1, %v27_v4  ;;  %5621 = vmatmul.msk.f32.vlgmr.msra.gmra.mxu1 %vm8935_vm1, %v27_v4  ;;  %v28_v13 = vld [vmem:[%s8928_s0 + $0x8] sm:$0xf]  ;;  %v497_v14 = vpack.c.bf16 %v33_v5, %v33_v5  ;;  %v499_v16 = vpack.c.bf16 %v35_v9, %v35_v9  ;;  %v500_v17 = vpack.c.bf16 %v36_v10, %v36_v10  ;;  %v5615_v28 = vld [vmem:[%s8927_s1 + $0x4] ss:$8 sm:$0xf] }
   0x5   :  { %5624 = vmatmul.msk.f32.vlgmr.msra.gmra.mxu2 %vm8935_vm1, %v27_v4  ;;  %5627 = vmatmul.msk.f32.vlgmr.msra.gmra.mxu3 %vm8935_vm1, %v27_v4  ;;  %v5616_v29 = vld [vmem:[%s8927_s1 + $0x4] ss:$8 sm:$0xf0] }
   0x6   :  { %5629 = vmatpush.msk.msrb.mxu0 %vm48_vm0, %v33_v5  ;;  %5632 = vmatpush.msk.msrb.mxu1 %vm48_vm0, %v34_v6  ;;  %v7357_v30 = vor.u32 %v5616_v29, %v5615_v28 }
   0x7   :  { %5635 = vmatpush.msk.msrb.mxu2 %vm48_vm0, %v35_v9  ;;  %5638 = vmatpush.msk.msrb.mxu3 %vm48_vm0, %v36_v10 }
   0x8   :  { %508 = vmatpush.bf16.xpose.msra.mxu0 %v493_v7  ;;  %522 = vmatpush.bf16.xpose.msra.mxu1 %v494_v8  ;;  %v276_v37 = vperm.slane %v7357_v30, 2  ;;  %v277_v38 = vperm.slane %v7357_v30, 3  ;;  %v274_v41 = vperm.slane %v7357_v30, 0  ;;  %v275_v42 = vperm.slane %v7357_v30, 1 }
   0x9   :  { %536 = vmatpush.bf16.xpose.msra.mxu2 %v495_v11  ;;  %550 = vmatpush.bf16.xpose.msra.mxu3 %v496_v12  ;;  %v278_v47 = vperm.slane %v7357_v30, 4  ;;  %v279_v48 = vperm.slane %v7357_v30, 5  ;;  %v280_v53 = vperm.slane %v7357_v30, 6  ;;  %v281_v54 = vperm.slane %v7357_v30, 7 }
   0xc   :  { %5619 = vmatmul.msk.f32.gmra.mxu0 %vm8935_vm1, %v28_v13  ;;  %5622 = vmatmul.msk.f32.gmra.mxu1 %vm8935_vm1, %v28_v13 }
   0xd   :  { %5625 = vmatmul.msk.f32.gmra.mxu2 %vm8935_vm1, %v28_v13  ;;  %5628 = vmatmul.msk.f32.gmra.mxu3 %vm8935_vm1, %v28_v13 }
  0x14   :  { %5630 = vmatmul.msk.f32.vlgmr.msrb.gmra.mxu0 %vm8935_vm1, %v27_v4  ;;  %5633 = vmatmul.msk.f32.vlgmr.msrb.gmra.mxu1 %vm8935_vm1, %v27_v4 }
  0x15   :  { %5636 = vmatmul.msk.f32.vlgmr.msrb.gmra.mxu2 %vm8935_vm1, %v27_v4  ;;  %5639 = vmatmul.msk.f32.vlgmr.msrb.gmra.mxu3 %vm8935_vm1, %v27_v4 }
  0x16   :  { %564 = vmatpush.bf16.xpose.msrb.mxu0 %v497_v14  ;;  %578 = vmatpush.bf16.xpose.msrb.mxu1 %v498_v15 }
  0x17   :  { %592 = vmatpush.bf16.xpose.msrb.mxu2 %v499_v16  ;;  %606 = vmatpush.bf16.xpose.msrb.mxu3 %v500_v17 }
  0x1c   :  { %5631 = vmatmul.msk.f32.gmra.mxu0 %vm8935_vm1, %v28_v13  ;;  %5634 = vmatmul.msk.f32.gmra.mxu1 %vm8935_vm1, %v28_v13 }
  0x1d   :  { %5637 = vmatmul.msk.f32.gmra.mxu2 %vm8935_vm1, %v28_v13  ;;  %5640 = vmatmul.msk.f32.gmra.mxu3 %vm8935_vm1, %v28_v13 }
  0x81   :  { %v90_v18 = vpop.f32.mrf.mxu0  ;;  %v113_v19 = vpop.f32.mrf.mxu1 }
  0x82   :  { %v257_v59 = vmul.f32 2.0, %v90_v18  ;;  %v258_v60 = vmul.f32 2.0, %v113_v19 }
  0x84   :  { %v7395_v17 = vsub.f32 %v274_v41, %v257_v59  ;;  %v7397_v18 = vsub.f32 %v275_v42, %v258_v60 }
  0x88   :  { %v136_v20 = vpop.f32.mrf.mxu2  ;;  %v159_v21 = vpop.f32.mrf.mxu3 }
  0x89   :  { %v93_v22 = vpop.f32.mrf.mxu0  ;;  %v116_v23 = vpop.f32.mrf.mxu1  ;;  %v259_v55 = vmul.f32 2.0, %v136_v20  ;;  %v260_v56 = vmul.f32 2.0, %v159_v21 }
  0x8a   :  { %v265_v33 = vmul.f32 2.0, %v93_v22  ;;  %v266_v34 = vmul.f32 2.0, %v116_v23 }
  0x8b   :  { %v7391_v9 = vsub.f32 %v276_v37, %v259_v55  ;;  %v7393_v10 = vsub.f32 %v277_v38, %v260_v56 }
  0x8c   :  { %v7369_v49 = vsub.f32 %v274_v41, %v265_v33  ;;  %v7371_v50 = vsub.f32 %v275_v42, %v266_v34 }
  0x8e   :  { %v315_v61 = vsel %vm48_vm0, %v7369_v49, inf  ;;  %v316_v62 = vsel %vm48_vm0, %v7371_v50, inf }
  0x90   :  { %v139_v24 = vpop.f32.mrf.mxu2  ;;  %v162_v25 = vpop.f32.mrf.mxu3 }
  0x91   :  { %v182_v26 = vpop.f32.mrf.mxu0  ;;  %v205_v27 = vpop.f32.mrf.mxu1  ;;  %v267_v31 = vmul.f32 2.0, %v139_v24  ;;  %v268_v32 = vmul.f32 2.0, %v162_v25  ;;  %v306_v25 = vmin.f32 %v7395_v17, %v7391_v9 }
  0x92   :  { %v261_v5 = vmul.f32 2.0, %v182_v26  ;;  %v262_v6 = vmul.f32 2.0, %v205_v27  ;;  %v307_v26 = vmin.f32 %v7397_v18, %v7393_v10 }
  0x93   :  { %v7363_v45 = vsub.f32 %v276_v37, %v267_v31  ;;  %v7365_v46 = vsub.f32 %v277_v38, %v268_v32 }
  0x94   :  { %v7401_v21 = vsub.f32 %v278_v47, %v261_v5  ;;  %v7403_v22 = vsub.f32 %v279_v48, %v262_v6 }
  0x95   :  { %v317_v57 = vsel %vm48_vm0, %v7363_v45, inf  ;;  %v319_v58 = vsel %vm48_vm0, %v7365_v46, inf }
  0x96   :  { %v318_v7 = vmin.f32 %v315_v61, %v317_v57  ;;  %v320_v8 = vmin.f32 %v316_v62, %v319_v58  ;;  %v308_v30 = vmin.f32 %v306_v25, %v7401_v21  ;;  %v309_v31 = vmin.f32 %v307_v26, %v7403_v22 }
  0x98   :  { %v228_v35 = vpop.f32.mrf.mxu2  ;;  %v251_v36 = vpop.f32.mrf.mxu3 }
  0x99   :  { %v185_v39 = vpop.f32.mrf.mxu0  ;;  %v208_v40 = vpop.f32.mrf.mxu1  ;;  %v263_v13 = vmul.f32 2.0, %v228_v35  ;;  %v264_v14 = vmul.f32 2.0, %v251_v36  ;;  %v332_v35 = vlaneseq }
  0x9a   :  { %v269_v43 = vmul.f32 2.0, %v185_v39  ;;  %v270_v44 = vmul.f32 2.0, %v208_v40 }
  0x9b   :  { %v7409_v27 = vsub.f32 %v280_v53, %v263_v13  ;;  %v7411_v28 = vsub.f32 %v281_v54, %v264_v14  ;;  %v7417_v36 = vand.u32 127, %v332_v35 }
  0x9c   :  { %v7373_v51 = vsub.f32 %v278_v47, %v269_v43  ;;  %v7375_v52 = vsub.f32 %v279_v48, %v270_v44 }
  0x9d   :  { %v310_v32 = vmin.f32 %v308_v30, %v7409_v27  ;;  %v311_v33 = vmin.f32 %v309_v31, %v7411_v28  ;;  %v7420_v37 = vadd.s32 128, %v7417_v36  ;;  %v7423_v38 = vadd.s32 256, %v7417_v36 }
  0x9e   :  { %v321_v3 = vsel %vm48_vm0, %v7373_v51, inf  ;;  %v323_v4 = vsel %vm48_vm0, %v7375_v52, inf  ;;  %v7426_v39 = vadd.s32 384, %v7417_v36  ;;  %v7429_v41 = vadd.s32 512, %v7417_v36 }
  0x9f   :  { %v322_v15 = vmin.f32 %v318_v7, %v321_v3  ;;  %v324_v16 = vmin.f32 %v320_v8, %v323_v4  ;;  %v312_v34 = vmin.f32 %v310_v32, %v311_v33  ;;  %v7432_v42 = vadd.s32 640, %v7417_v36 }
  0xa0   :  { %v231_v63 = vpop.f32.mrf.mxu2  ;;  %v254_v0 = vpop.f32.mrf.mxu3  ;;  %v7435_v43 = vadd.s32 768, %v7417_v36  ;;  %v7442_v44 = vadd.s32 896, %v7417_v36 }
  0xa1   :  { %v271_v1 = vmul.f32 2.0, %v231_v63  ;;  %v272_v2 = vmul.f32 2.0, %v254_v0 }
  0xa3   :  { %v304_v11 = vsub.f32 %v280_v53, %v271_v1  ;;  %v305_v12 = vsub.f32 %v281_v54, %v272_v2 }
  0xa5   :  { %v325_v19 = vsel %vm48_vm0, %v304_v11, inf  ;;  %v327_v20 = vsel %vm48_vm0, %v305_v12, inf }
  0xa6   :  { %v326_v23 = vmin.f32 %v322_v15, %v325_v19  ;;  %v328_v24 = vmin.f32 %v324_v16, %v327_v20 }
  0xa8   :  { %v329_v29 = vmin.f32 %v326_v23, %v328_v24 }
  0xaa   :  { %330 = vmin.xlane.f32.xlu0 %v329_v29 }
  0xb2   :  { %313 = vmin.xlane.f32.xlu0 %v312_v34 }
 0x11d   :  { %v331_v40 = vpop.xlane.xlu0 %330 }
 0x11e   :  { %vm349_vm2 = vcmp.le.f32.partialorder %v7369_v49, %v331_v40  ;;  %vm350_vm3 = vcmp.le.f32.partialorder %v7371_v50, %v331_v40  ;;  %vm351_vm4 = vcmp.le.f32.partialorder %v7363_v45, %v331_v40  ;;  %vm352_vm5 = vcmp.le.f32.partialorder %v7365_v46, %v331_v40 }
 0x11f   :  { %vm353_vm6 = vcmp.le.f32.partialorder %v7373_v51, %v331_v40  ;;  %vm354_vm7 = vcmp.le.f32.partialorder %v7375_v52, %v331_v40  ;;  %vm355_vm8 = vcmp.le.f32.partialorder %v304_v11, %v331_v40  ;;  %v365_v47 = vsel %vm349_vm2, %v7417_v36, 1024 }
 0x120   :  { %v366_v48 = vsel %vm350_vm3, %v7420_v37, 1024  ;;  %v367_v49 = vsel %vm351_vm4, %v7423_v38, 1024  ;;  %v368_v50 = vsel %vm352_vm5, %v7426_v39, 1024  ;;  %vm356_vm9 = vcmp.le.f32.partialorder %v305_v12, %v331_v40 }
 0x121   :  { %v369_v45 = vsel %vm353_vm6, %v7429_v41, 1024  ;;  %v370_v46 = vsel %vm354_vm7, %v7432_v42, 1024  ;;  %v371_v53 = vsel %vm355_vm8, %v7435_v43, 1024  ;;  %v401_v51 = vsel %vm48_vm0, %v365_v47, 2147483647 }
 0x122   :  { %v402_v52 = vsel %vm48_vm0, %v366_v48, 2147483647  ;;  %v403_v54 = vsel %vm48_vm0, %v367_v49, 2147483647  ;;  %v406_v55 = vsel %vm48_vm0, %v368_v50, 2147483647 }
 0x123   :  { %vm404_vm10 = vcmp.lt.s32.totalorder %v401_v51, %v403_v54  ;;  %v372_v56 = vsel %vm356_vm9, %v7442_v44, 1024  ;;  %vm407_vm11 = vcmp.lt.s32.totalorder %v402_v52, %v406_v55  ;;  %v409_v59 = vsel %vm48_vm0, %v369_v45, 2147483647 }
 0x124   :  { %v405_v57 = vsel %vm404_vm10, %v401_v51, %v403_v54  ;;  %v412_v60 = vsel %vm48_vm0, %v370_v46, 2147483647  ;;  %v415_v61 = vsel %vm48_vm0, %v371_v53, 2147483647  ;;  %v408_v62 = vsel %vm407_vm11, %v402_v52, %v406_v55 }
 0x125   :  { %v314_v58 = vpop.xlane.xlu0 %313  ;;  %vm410_vm4 = vcmp.lt.s32.totalorder %v405_v57, %v409_v59  ;;  %v418_v4 = vsel %vm48_vm0, %v372_v56, 2147483647  ;;  %vm413_vm9 = vcmp.lt.s32.totalorder %v408_v62, %v412_v60  ;;  %v7256_v46 = vmov 1.0|1.0  }
 0x126   :  { %vm341_vm12 = vcmp.le.f32.partialorder %v7395_v17, %v314_v58  ;;  %vm342_vm13 = vcmp.le.f32.partialorder %v7397_v18, %v314_v58  ;;  %vm343_vm14 = vcmp.le.f32.partialorder %v7391_v9, %v314_v58  ;;  %vm344_vm15 = vcmp.le.f32.partialorder %v7393_v10, %v314_v58 }
 0x127   :  { %vm345_vm2 = vcmp.le.f32.partialorder %v7401_v21, %v314_v58  ;;  %vm346_vm3 = vcmp.le.f32.partialorder %v7403_v22, %v314_v58  ;;  %v357_v63 = vsel %vm341_vm12, %v7417_v36, 1024  ;;  %v358_v0 = vsel %vm342_vm13, %v7420_v37, 1024 }
 0x128   :  { %v359_v1 = vsel %vm343_vm14, %v7423_v38, 1024  ;;  %v360_v2 = vsel %vm344_vm15, %v7426_v39, 1024  ;;  %vm347_vm5 = vcmp.le.f32.partialorder %v7409_v27, %v314_v58  ;;  %vm348_vm6 = vcmp.le.f32.partialorder %v7411_v28, %v314_v58 }
 0x129   :  { %v361_v3 = vsel %vm345_vm2, %v7429_v41, 1024  ;;  %vm373_vm7 = vcmp.lt.s32.totalorder %v357_v63, %v359_v1  ;;  %vm375_vm8 = vcmp.lt.s32.totalorder %v358_v0, %v360_v2  ;;  %v411_v5 = vsel %vm410_vm4, %v405_v57, %v409_v59 }
 0x12a   :  { %v362_v6 = vsel %vm346_vm3, %v7432_v42, 1024  ;;  %v374_v7 = vsel %vm373_vm7, %v357_v63, %v359_v1  ;;  %v376_v8 = vsel %vm375_vm8, %v358_v0, %v360_v2  ;;  %v414_v9 = vsel %vm413_vm9, %v408_v62, %v412_v60 }
 0x12b   :  { %vm377_vm10 = vcmp.lt.s32.totalorder %v374_v7, %v361_v3  ;;  %vm379_vm11 = vcmp.lt.s32.totalorder %v376_v8, %v362_v6  ;;  %vm416_vm12 = vcmp.lt.s32.totalorder %v411_v5, %v415_v61  ;;  %vm419_vm13 = vcmp.lt.s32.totalorder %v414_v9, %v418_v4 }
 0x12c   :  { %v363_v10 = vsel %vm347_vm5, %v7435_v43, 1024  ;;  %v364_v11 = vsel %vm348_vm6, %v7442_v44, 1024  ;;  %v378_v12 = vsel %vm377_vm10, %v374_v7, %v361_v3  ;;  %v380_v13 = vsel %vm379_vm11, %v376_v8, %v362_v6 }
 0x12d   :  { %vm381_vm0 = vcmp.lt.s32.totalorder %v378_v12, %v363_v10  ;;  %vm383_vm14 = vcmp.lt.s32.totalorder %v380_v13, %v364_v11  ;;  %v417_v16 = vsel %vm416_vm12, %v411_v5, %v415_v61  ;;  %v420_v17 = vsel %vm419_vm13, %v414_v9, %v418_v4 }
 0x12e   :  { %v382_v14 = vsel %vm381_vm0, %v378_v12, %v363_v10  ;;  %v384_v15 = vsel %vm383_vm14, %v380_v13, %v364_v11  ;;  %vm421_vm2 = vcmp.lt.s32.totalorder %v417_v16, %v420_v17  ;;  %v5675_v11 = vld [vmem:[%s8930_s2] sm:$0xf]  ;;  %v6981_v12 = vld [vmem:[%s8930_s2] sm:$0x30] }
 0x12f   :  { %vm385_vm15 = vcmp.lt.s32.totalorder %v382_v14, %v384_v15  ;;  %v422_v21 = vsel %vm421_vm2, %v417_v16, %v420_v17  ;;  %v5682_v13 = vld [vmem:[%s8930_s2 + $0x20] sm:$0xf]  ;;  %v5676_v17 = vor.u32 %v6981_v12, %v5675_v11 }
 0x130   :  { %v386_v18 = vsel %vm385_vm15, %v382_v14, %v384_v15  ;;  %v424_v22 = vshra.s32 %v422_v21, 16  ;;  %v423_v28 = vand.u32 65535, %v422_v21  ;;  %v6982_v14 = vld [vmem:[%s8930_s2 + $0x20] sm:$0x30] }
 0x131   :  { %v388_v19 = vshra.s32 %v386_v18, 16  ;;  %v387_v24 = vand.u32 65535, %v386_v18  ;;  %v5683_v18 = vor.u32 %v6982_v14, %v5682_v13  ;;  %v5740_v13 = vld [vmem:[%s8929_s4 + $0xe] sm:$0x3] }
 0x132   :  { %v426_v23 = vcvt.s32.f32 %v424_v22  ;;  %v425_v30 = vcvt.s32.f32 %v423_v28  ;;  %v5710_v22 = vld [vmem:[%s8930_s2 + $0x80] sm:$0xf] }
 0x133   :  { %v390_v20 = vcvt.s32.f32 %v388_v19  ;;  %v389_v26 = vcvt.s32.f32 %v387_v24  ;;  %v5692_v19 = vld [vmem:[%s8930_s2 + $0x40] sm:$0xf] }
 0x135   :  { %391 = vmin.xlane.f32.xlu1 %v390_v20 }
 0x13d   :  { %427 = vmin.xlane.f32.xlu1 %v426_v23 }
 0x1a8   :  { %v392_v25 = vpop.xlane.xlu1 %391 }
 0x1a9   :  { %vm393_vm3 = vcmp.eq.f32.partialorder %v390_v20, %v392_v25  ;;  %v398_v33 = vcvt.f32.s32 %v392_v25  ;;  %v6983_v20 = vld [vmem:[%s8930_s2 + $0x40] sm:$0x30]  ;;  %v644_v25 = vld [vmem:[%s8929_s4] sm:$0x3] }
 0x1aa   :  { %v394_v27 = vsel %vm393_vm3, %v389_v26, inf  ;;  %v5693_v21 = vor.u32 %v6983_v20, %v5692_v19 }
 0x1ab   :  { %395 = vmin.xlane.f32.xlu2 %v394_v27  ;;  %v399_v40 = vshll.u32 %v398_v33, 16  ;;  %v5695_v27 = vld [vmem:[%s8929_s4 + $0x4] sm:$0x3] }
 0x1b0   :  { %v428_v29 = vpop.xlane.xlu1 %427 }
 0x1b1   :  { %vm429_vm4 = vcmp.eq.f32.partialorder %v426_v23, %v428_v29  ;;  %v434_v34 = vcvt.f32.s32 %v428_v29  ;;  %v6985_v23 = vld [vmem:[%s8930_s2 + $0x80] sm:$0x30]  ;;  %v5728_v29 = vld [vmem:[%s8930_s2 + $0xc0] sm:$0xf] }
 0x1b2   :  { %v430_v31 = vsel %vm429_vm4, %v425_v30, inf  ;;  %v5711_v24 = vor.u32 %v6985_v23, %v5710_v22  ;;  %v6987_v30 = vld [vmem:[%s8930_s2 + $0xc0] sm:$0x30] }
 0x1b3   :  { %431 = vmin.xlane.f32.xlu2 %v430_v31  ;;  %v435_v48 = vshll.u32 %v434_v34, 16  ;;  %v5729_v31 = vor.u32 %v6987_v30, %v5728_v29 }
 0x21e   :  { %v396_v32 = vpop.xlane.xlu2 %395 }
 0x21f   :  { %v397_v35 = vcvt.f32.s32 %v396_v32 }
 0x221   :  { %v400_v49 = vadd.s32 %v399_v40, %v397_v35 }
 0x223   :  { %vm437_vm5 = vcmp.eq.s32.totalorder %v7417_v36, %v400_v49  ;;  %vm438_vm10 = vcmp.eq.s32.totalorder %v7420_v37, %v400_v49  ;;  %vm439_vm13 = vcmp.eq.s32.totalorder %v7423_v38, %v400_v49  ;;  %vm440_vm15 = vcmp.eq.s32.totalorder %v7426_v39, %v400_v49 }
 0x224   :  { %vm441_vm4 = vcmp.eq.s32.totalorder %v7429_v41, %v400_v49 }
 0x226   :  { %v432_v47 = vpop.xlane.xlu2 %431 }
 0x227   :  { %v433_v50 = vcvt.f32.s32 %v432_v47 }
 0x229   :  { %v436_v45 = vadd.s32 %v435_v48, %v433_v50  ;;  %v5746_v48 = vld [vmem:[%s8930_s2 + $0x100] sm:$0xf] }
 0x22b   :  { %vm445_vm6 = vcmp.eq.s32.totalorder %v7417_v36, %v436_v45  ;;  %vm446_vm7 = vcmp.eq.s32.totalorder %v7420_v37, %v436_v45  ;;  %vm447_vm8 = vcmp.eq.s32.totalorder %v7423_v38, %v436_v45  ;;  %vm448_vm11 = vcmp.eq.s32.totalorder %v7426_v39, %v436_v45  ;;  %v5685_v38 = vld [vmem:[%s8929_s4 + $0x2] sm:$0x3] }
 0x22c   :  { %vm5657_vm9 = vmpackc.low %vm445_vm6, %vm437_vm5  ;;  %vm449_vm0 = vcmp.eq.s32.totalorder %v7429_v41, %v436_v45  ;;  %vm450_vm2 = vcmp.eq.s32.totalorder %v7432_v42, %v436_v45  ;;  %vm451_vm5 = vcmp.eq.s32.totalorder %v7435_v43, %v436_v45 }
 0x22d   :  { %5658 = vmatmul.msk.bf16.vlgmr.msra.gmra.mxu0 %vm5657_vm9, %v7256_v46  ;;  %vm5659_vm12 = vmpackc.low %vm446_vm7, %vm438_vm10  ;;  %vm442_vm7 = vcmp.eq.s32.totalorder %v7432_v42, %v400_v49  ;;  %vm452_vm9 = vcmp.eq.s32.totalorder %v7442_v44, %v436_v45 }
 0x22e   :  { %5660 = vmatmul.msk.bf16.vlgmr.msra.gmra.mxu1 %vm5659_vm12, %v7256_v46  ;;  %vm5661_vm14 = vmpackc.low %vm447_vm8, %vm439_vm13  ;;  %vm443_vm12 = vcmp.eq.s32.totalorder %v7435_v43, %v400_v49  ;;  %vm444_vm13 = vcmp.eq.s32.totalorder %v7442_v44, %v400_v49  ;;  %v6989_v49 = vld [vmem:[%s8930_s2 + $0x100] sm:$0x30] }
 0x22f   :  { %5662 = vmatmul.msk.bf16.vlgmr.msra.gmra.mxu2 %vm5661_vm14, %v7256_v46  ;;  %vm5663_vm3 = vmpackc.low %vm448_vm11, %vm440_vm15  ;;  %vm676_vm11 = vcmask 1041408   ;;  %vm8936_vm14 = vcmask 31744   ;;  %v5747_v50 = vor.u32 %v6989_v49, %v5746_v48 }
 0x230   :  { %5664 = vmatmul.msk.bf16.vlgmr.msra.gmra.mxu3 %vm5663_vm3, %v7256_v46  ;;  %vm5665_vm6 = vmpackc.low %vm449_vm0, %vm441_vm4  ;;  %v678_v42 = vsel %vm676_vm11, %v5685_v38, 0  ;;  %vm621_vm0 = vcmask 97280   ;;  %v698_v26 = vsel %vm676_vm11, %v644_v25, 0  ;;  %v746_v28 = vsel %vm676_vm11, %v5695_v27, 0 }
 0x231   :  { %vm5667_vm10 = vmpackc.low %vm450_vm2, %vm442_vm7  ;;  %687 = vmatpush.bf16.msra.mxu2 %v678_v42  ;;  %707 = vmatpush.bf16.msra.mxu3 %v698_v26  ;;  %v6986_v42 = vld [vmem:[%s8930_s2 + $0xa0] sm:$0x30]  ;;  %v996_v14 = vsel %vm676_vm11, %v5740_v13, 0 }
 0x232   :  { %vm5669_vm8 = vmpackc.low %vm451_vm5, %vm443_vm12  ;;  %vm2178_vm12 = vcmask 392192  }
 0x233   :  { %vm5671_vm1 = vmpackc.low %vm452_vm9, %vm444_vm13 }
 0x234   :  { %vm8937_vm15 = vmmov %vm8936_vm14 }
 0x235   :  { %vm8938_vm2 = vmmov %vm8936_vm14 }
 0x236   :  { %vm8939_vm3 = vmmov %vm8938_vm2 }
 0x237   :  { %vm8940_vm4 = vmmov %vm8938_vm2 }
 0x238   :  { %vm8941_vm5 = vmmov %vm8938_vm2 }
 0x239   :  { %vm8943_vm7 = vmmov %vm8938_vm2 }
 0x23a   :  { %vm8944_vm9 = vmmov %vm8938_vm2 }
 0x23d   :  { %5666 = vmatmul.msk.bf16.vlgmr.msrb.gmra.mxu0 %vm5665_vm6, %v7256_v46  ;;  %vm8942_vm6 = vmmov %vm8938_vm2 }
 0x23e   :  { %5668 = vmatmul.msk.bf16.vlgmr.msrb.gmra.mxu1 %vm5667_vm10, %v7256_v46  ;;  %vm1208_vm10 = vcmask 261120  }
 0x23f   :  { %5670 = vmatmul.msk.bf16.vlgmr.msrb.gmra.mxu2 %vm5669_vm8, %v7256_v46  ;;  %vm2509_vm8 = vcmask 130048  }
 0x240   :  { %5672 = vmatmul.msk.bf16.vlgmr.msrb.gmra.mxu3 %vm5671_vm1, %v7256_v46  ;;  %vm625_vm1 = vcmask 1045504   ;;  %v5701_v46 = vld [vmem:[%s8930_s2 + $0x60] sm:$0xf] }
 0x2aa   :  { %v510_v36 = vpop.f32.mrf.mxu0 }
 0x2ab   :  { %v524_v37 = vpop.f32.mrf.mxu1 }
 0x2ac   :  { %v525_v52 = vadd.f32 %v524_v37, %v510_v36  ;;  %v6984_v36 = vld [vmem:[%s8930_s2 + $0x60] sm:$0x30] }
 0x2ad   :  { %v5702_v37 = vor.u32 %v6984_v36, %v5701_v46 }
 0x2b2   :  { %v538_v39 = vpop.f32.mrf.mxu2  ;;  %v512_v41 = vpop.f32.mrf.mxu0 }
 0x2b3   :  { %v552_v43 = vpop.f32.mrf.mxu3  ;;  %v526_v53 = vpop.f32.mrf.mxu1  ;;  %v539_v55 = vadd.f32 %v538_v39, %v525_v52 }
 0x2b4   :  { %v527_v56 = vadd.f32 %v526_v53, %v512_v41  ;;  %v5719_v41 = vld [vmem:[%s8930_s2 + $0xa0] sm:$0xf] }
 0x2b5   :  { %v553_v59 = vadd.f32 %v552_v43, %v539_v55  ;;  %v5720_v43 = vor.u32 %v6986_v42, %v5719_v41  ;;  %v5737_v53 = vld [vmem:[%s8930_s2 + $0xe0] sm:$0xf] }
 0x2ba   :  { %v540_v44 = vpop.f32.mrf.mxu2  ;;  %v566_v51 = vpop.f32.mrf.mxu0 }
 0x2bb   :  { %v554_v54 = vpop.f32.mrf.mxu3  ;;  %v580_v57 = vpop.f32.mrf.mxu1  ;;  %v541_v58 = vadd.f32 %v540_v44, %v527_v56  ;;  %v567_v63 = vadd.f32 %v566_v51, %v553_v59  ;;  %v6988_v44 = vld [vmem:[%s8930_s2 + $0xe0] sm:$0x30] }
 0x2bc   :  { %v5738_v51 = vor.u32 %v6988_v44, %v5737_v53  ;;  %v1064_v44 = vld [vmem:[%s8927_s1 + $0x5] ss:$0 sm:$0xff] }
 0x2bd   :  { %v555_v62 = vadd.f32 %v554_v54, %v541_v58  ;;  %v581_v2 = vadd.f32 %v580_v57, %v567_v63  ;;  %v5713_v54 = vld [vmem:[%s8929_s4 + $0x8] sm:$0x3]  ;;  %v5704_v58 = vld [vmem:[%s8929_s4 + $0x6] sm:$0x3] }
 0x2be   :  { %v846_v56 = vsel %vm676_vm11, %v5713_v54, 0 }
 0x2c2   :  { %v594_v60 = vpop.f32.mrf.mxu2  ;;  %v568_v61 = vpop.f32.mrf.mxu0 }
 0x2c3   :  { %v608_v0 = vpop.f32.mrf.mxu3  ;;  %v569_v1 = vadd.f32 %v568_v61, %v555_v62  ;;  %v582_v3 = vpop.f32.mrf.mxu1  ;;  %v595_v4 = vadd.f32 %v594_v60, %v581_v2  ;;  %v796_v60 = vsel %vm676_vm11, %v5704_v58, 0  ;;  %v5731_v62 = vld [vmem:[%s8929_s4 + $0xc] sm:$0x3] }
 0x2c4   :  { %805 = vmatpush.bf16.msrb.mxu3 %v796_v60 }
 0x2c5   :  { %v583_v5 = vadd.f32 %v582_v3, %v569_v1  ;;  %v609_v9 = vadd.f32 %v608_v0, %v595_v4  ;;  %v946_v0 = vsel %vm676_vm11, %v5731_v62, 0  ;;  %v5722_v3 = vld [vmem:[%s8929_s4 + $0xa] sm:$0x3] }
 0x2c6   :  { %v6990_v62 = vld [vmem:[%s8930_s2 + $0x8] sm:$0xff] }
 0x2ca   :  { %v596_v6 = vpop.f32.mrf.mxu2 }
 0x2cb   :  { %v597_v7 = vadd.f32 %v596_v6, %v583_v5  ;;  %v610_v8 = vpop.f32.mrf.mxu3  ;;  %v896_v5 = vsel %vm676_vm11, %v5722_v3, 0  ;;  %v6997_v3 = vld [vmem:[%s8930_s2 + $0x38] sm:$0xff] }
 0x2cd   :  { %v611_v10 = vadd.f32 %v610_v8, %v597_v7  ;;  %v5749_v7 = vld [vmem:[%s8929_s4 + $0x10] sm:$0x3] }
 0x2cf   :  { %v613_v15 = vpack.c.bf16 %v611_v10, %v609_v9  ;;  %v1046_v9 = vsel %vm676_vm11, %v5749_v7, 0  ;;  %v7010_v7 = vld [vmem:[%s8930_s2 + $0x88] sm:$0xff] }
 0x2d1   :  { %v627_v16 = vsel %vm625_vm1, %v613_v15, 0 }
 0x2d2   :  { %636 = vmatpush.bf16.msra.mxu0 %v627_v16  ;;  %663 = vmatpush.bf16.msra.mxu1 %v627_v16 }
 0x2d3   :  { %782 = vmatpush.bf16.msrb.mxu2 %v627_v16 }
 0x2d5   :  { %5677 = vmatmul.msk.bf16.vlgmr.msra.gmra.mxu0 %vm621_vm0, %v5676_v17  ;;  %5684 = vmatmul.msk.bf16.vlgmr.msra.gmra.mxu1 %vm621_vm0, %v5683_v18 }
 0x2d6   :  { %732 = vmatpush.bf16.msrb.mxu0 %v627_v16  ;;  %755 = vmatpush.bf16.msrb.mxu1 %v746_v28 }
 0x2da   :  { %832 = vmatpush.bf16.msra.mxu0 %v627_v16  ;;  %855 = vmatpush.bf16.msra.mxu1 %v846_v56 }
 0x2e5   :  { %5694 = vmatmul.msk.bf16.vlgmr.msrb.gmra.mxu0 %vm621_vm0, %v5693_v21 }
 0x2e6   :  { %932 = vmatpush.bf16.msrb.mxu0 %v627_v16 }
 0x2f5   :  { %5712 = vmatmul.msk.bf16.vlgmr.msra.gmra.mxu0 %vm621_vm0, %v5711_v24 }
 0x2f6   :  { %1032 = vmatpush.bf16.msra.mxu0 %v627_v16 }
 0x305   :  { %5730 = vmatmul.msk.bf16.vlgmr.msrb.gmra.mxu0 %vm621_vm0, %v5729_v31  ;;  %v6999_v31 = vld [vmem:[%s8931_s5 + $0x18] sm:$0xff] }
 0x306   :  { %1224 = vmatpush.bf16.msrb.mxu0 %v6999_v31 }
 0x315   :  { %5748 = vmatmul.msk.bf16.vlgmr.msra.gmra.mxu0 %vm621_vm0, %v5747_v50 }
 0x352   :  { %v638_v32 = vpop.f32.mrf.mxu0  ;;  %v665_v33 = vpop.f32.mrf.mxu1 }
 0x35a   :  { %v640_v34 = vpop.f32.mrf.mxu0  ;;  %v667_v35 = vpop.f32.mrf.mxu1 }
 0x35b   :  { %v643_v40 = vpack.c.bf16 %v640_v34, %v638_v32  ;;  %v670_v47 = vpack.c.bf16 %v667_v35, %v665_v33  ;;  %v6998_v33 = vld [vmem:[%s8931_s5 + $0x10] sm:$0xff] }
 0x35c   :  { %1225 = vmatpush.bf16.msrb.mxu0 %v6998_v33  ;;  %v7020_v33 = vld [vmem:[%s8930_s2 + $0xc8] sm:$0xff] }
 0x35d   :  { %5686 = vmatmul.msk.bf16.vlgmr.msra.gmra.mxu2 %vm8936_vm14, %v670_v47  ;;  %5687 = vmatmul.msk.bf16.vlgmr.msra.gmra.mxu3 %vm8937_vm15, %v643_v40 }
 0x35e   :  { %882 = vmatpush.bf16.msra.mxu2 %v627_v16  ;;  %905 = vmatpush.bf16.msra.mxu3 %v896_v5  ;;  %v7001_v5 = vld [vmem:[%s8930_s2 + $0x50] sm:$0xff] }
 0x362   :  { %v734_v45 = vpop.f32.mrf.mxu0 }
 0x36a   :  { %v736_v38 = vpop.f32.mrf.mxu0 }
 0x36b   :  { %v739_v39 = vpack.c.bf16 %v736_v38, %v734_v45 }
 0x36d   :  { %5696 = vmatmul.msk.bf16.vlgmr.msrb.gmra.mxu1 %vm8938_vm2, %v739_v39  ;;  %5703 = vmatmul.msk.bf16.vlgmr.msrb.gmra.mxu2 %vm621_vm0, %v5702_v37 }
 0x36e   :  { %982 = vmatpush.bf16.msrb.mxu2 %v627_v16  ;;  %955 = vmatpush.bf16.msrb.mxu1 %v946_v0  ;;  %v6991_v0 = vld [vmem:[%s8930_s2 + $0x10] sm:$0xff] }
 0x372   :  { %v834_v52 = vpop.f32.mrf.mxu0 }
 0x37a   :  { %v836_v55 = vpop.f32.mrf.mxu0 }
 0x37b   :  { %v839_v57 = vpack.c.bf16 %v836_v55, %v834_v52 }
 0x37d   :  { %5721 = vmatmul.msk.bf16.vlgmr.msra.gmra.mxu2 %vm621_vm0, %v5720_v43  ;;  %5714 = vmatmul.msk.bf16.vlgmr.msra.gmra.mxu1 %vm8939_vm3, %v839_v57 }
 0x37e   :  { %1055 = vmatpush.bf16.msra.mxu1 %v1046_v9  ;;  %v6993_v9 = vld [vmem:[%s8931_s5] sm:$0xff] }
 0x382   :  { %v934_v59 = vpop.f32.mrf.mxu0 }
 0x38a   :  { %v936_v63 = vpop.f32.mrf.mxu0 }
 0x38b   :  { %v939_v1 = vpack.c.bf16 %v936_v63, %v934_v59  ;;  %v6995_v63 = vld [vmem:[%s8930_s2 + $0x28] sm:$0xff] }
 0x38d   :  { %5739 = vmatmul.msk.bf16.vlgmr.msrb.gmra.mxu2 %vm621_vm0, %v5738_v51  ;;  %5732 = vmatmul.msk.bf16.vlgmr.msrb.gmra.mxu1 %vm8940_vm4, %v939_v1  ;;  %v6996_v1 = vld [vmem:[%s8930_s2 + $0x30] sm:$0xff] }
 0x392   :  { %v1034_v4 = vpop.f32.mrf.mxu0 }
 0x39a   :  { %v1036_v8 = vpop.f32.mrf.mxu0 }
 0x39b   :  { %v1039_v10 = vpack.c.bf16 %v1036_v8, %v1034_v4  ;;  %v7000_v4 = vld [vmem:[%s8930_s2 + $0x48] sm:$0xff] }
 0x39c   :  { %v6994_v8 = vld [vmem:[%s8931_s5 + $0x8] sm:$0xff] }
 0x39d   :  { %5750 = vmatmul.msk.bf16.vlgmr.msra.gmra.mxu1 %vm8941_vm5, %v1039_v10 }
 0x39e   :  { %1269 = vmatpush.bf16.msrb.mxu1 %v6994_v8 }
 0x3a2   :  { %1270 = vmatpush.bf16.msrb.mxu1 %v6993_v9  ;;  %v7008_v9 = vld [vmem:[%s8931_s5 + $0x30] sm:$0xff] }
 0x3e0   :  { %v689_v61 = vpop.f32.mrf.mxu2  ;;  %v709_v22 = vpop.f32.mrf.mxu3 }
 0x3e1   :  { %v710_v32 = vadd.f32 %v709_v22, %v689_v61 }
 0x3e8   :  { %v691_v2 = vpop.f32.mrf.mxu2  ;;  %v711_v24 = vpop.f32.mrf.mxu3 }
 0x3e9   :  { %v712_v48 = vadd.f32 %v711_v24, %v691_v2  ;;  %v6992_v2 = vld [vmem:[%s8930_s2 + $0x18] sm:$0xff]  ;;  %v7003_v24 = vld [vmem:[%s8931_s5 + $0x20] sm:$0xff] }
 0x3ea   :  { %v757_v21 = vpop.f32.mrf.mxu1 }
 0x3eb   :  { %v762_v34 = vadd.f32 %v757_v21, %v710_v32 }
 0x3f0   :  { %v784_v6 = vpop.f32.mrf.mxu2 }
 0x3f2   :  { %v759_v23 = vpop.f32.mrf.mxu1 }
 0x3f3   :  { %v763_v49 = vadd.f32 %v759_v23, %v712_v48 }
 0x3f8   :  { %v786_v11 = vpop.f32.mrf.mxu2 }
 0x3f9   :  { %v789_v12 = vpack.c.bf16 %v786_v11, %v784_v6  ;;  %v7002_v6 = vld [vmem:[%s8930_s2 + $0x58] sm:$0xff] }
 0x3fa   :  { %v857_v25 = vpop.f32.mrf.mxu1 }
 0x3fb   :  { %5705 = vmatmul.msk.bf16.vlgmr.msrb.gmra.mxu3 %vm8942_vm6, %v789_v12 }
 0x3fc   :  { %1005 = vmatpush.bf16.msrb.mxu3 %v996_v14 }
 0x400   :  { %v884_v15 = vpop.f32.mrf.mxu2 }
 0x402   :  { %v859_v27 = vpop.f32.mrf.mxu1 }
 0x408   :  { %v886_v16 = vpop.f32.mrf.mxu2 }
 0x409   :  { %v889_v17 = vpack.c.bf16 %v886_v16, %v884_v15 }
 0x40a   :  { %v957_v29 = vpop.f32.mrf.mxu1 }
 0x40b   :  { %5723 = vmatmul.msk.bf16.vlgmr.msra.gmra.mxu3 %vm8943_vm7, %v889_v17 }
 0x410   :  { %v984_v18 = vpop.f32.mrf.mxu2 }
 0x412   :  { %v959_v35 = vpop.f32.mrf.mxu1 }
 0x418   :  { %v986_v19 = vpop.f32.mrf.mxu2 }
 0x419   :  { %v989_v20 = vpack.c.bf16 %v986_v19, %v984_v18  ;;  %v7011_v18 = vld [vmem:[%s8930_s2 + $0x90] sm:$0xff]  ;;  %v7004_v19 = vld [vmem:[%s8931_s5 + $0x28] sm:$0xff] }
 0x41a   :  { %v1057_v36 = vpop.f32.mrf.mxu1 }
 0x41b   :  { %5741 = vmatmul.msk.bf16.vlgmr.msrb.gmra.mxu3 %vm8944_vm9, %v989_v20 }
 0x422   :  { %v1059_v54 = vpop.f32.mrf.mxu1 }
 0x47e   :  { %v807_v26 = vpop.f32.mrf.mxu3 }
 0x47f   :  { %v812_v40 = vadd.f32 %v807_v26, %v762_v34  ;;  %v7005_v34 = vld [vmem:[%s8930_s2 + $0x68] sm:$0xff] }
 0x481   :  { %v862_v50 = vadd.f32 %v857_v25, %v812_v40 }
 0x486   :  { %v809_v28 = vpop.f32.mrf.mxu3 }
 0x487   :  { %v813_v45 = vadd.f32 %v809_v28, %v763_v49  ;;  %v7006_v49 = vld [vmem:[%s8930_s2 + $0x70] sm:$0xff] }
 0x489   :  { %v863_v38 = vadd.f32 %v859_v27, %v813_v45  ;;  %v7012_v27 = vld [vmem:[%s8930_s2 + $0x98] sm:$0xff] }
 0x48e   :  { %v907_v30 = vpop.f32.mrf.mxu3 }
 0x48f   :  { %v912_v46 = vadd.f32 %v907_v30, %v862_v50 }
 0x491   :  { %v962_v39 = vadd.f32 %v957_v29, %v912_v46  ;;  %v7022_v46 = vld [vmem:[%s8930_s2 + $0xd8] sm:$0xff] }
 0x496   :  { %v909_v47 = vpop.f32.mrf.mxu3 }
 0x497   :  { %v913_v41 = vadd.f32 %v909_v47, %v863_v38  ;;  %v7021_v47 = vld [vmem:[%s8930_s2 + $0xd0] sm:$0xff] }
 0x499   :  { %v963_v53 = vadd.f32 %v959_v35, %v913_v41  ;;  %v7030_v41 = vld [vmem:[%s8930_s2 + $0x108] sm:$0xff] }
 0x49e   :  { %v1007_v37 = vpop.f32.mrf.mxu3 }
 0x49f   :  { %v1012_v42 = vadd.f32 %v1007_v37, %v962_v39  ;;  %v7007_v37 = vld [vmem:[%s8930_s2 + $0x78] sm:$0xff] }
 0x4a1   :  { %v1062_v43 = vadd.f32 %v1057_v36, %v1012_v42  ;;  %v7015_v42 = vld [vmem:[%s8930_s2 + $0xa8] sm:$0xff] }
 0x4a3   :  { %v1065_v55 = vadd.f32 %v1064_v44, %v1062_v43  ;;  %v7031_v43 = vld [vmem:[%s8930_s2 + $0x110] sm:$0xff] }
 0x4a5   :  { %v1067_v58 = vmax.f32 %v1065_v55, 0.0 }
 0x4a6   :  { %v1009_v51 = vpop.f32.mrf.mxu3 }
 0x4a7   :  { %v1013_v52 = vadd.f32 %v1009_v51, %v963_v53  ;;  %v7016_v53 = vld [vmem:[%s8930_s2 + $0xb0] sm:$0xff] }
 0x4a9   :  { %v1063_v56 = vadd.f32 %v1059_v54, %v1013_v52  ;;  %v7017_v52 = vld [vmem:[%s8930_s2 + $0xb8] sm:$0xff] }
 0x4ab   :  { %v1066_v57 = vadd.f32 %v1064_v44, %v1063_v56  ;;  %v7032_v44 = vld [vmem:[%s8930_s2 + $0x118] sm:$0xff] }
 0x4ad   :  { %v1068_v59 = vmax.f32 %v1066_v57, 0.0  ;;  %v7014_v57 = vld [vmem:[%s8931_s5 + $0x48] sm:$0xff] }
 0x4af   :  { %v1069_v60 = vpack.c.bf16 %v1068_v59, %v1067_v58  ;;  %v7013_v59 = vld [vmem:[%s8931_s5 + $0x40] sm:$0xff] }
 0x4b1   :  { %v7617_v61 = vsel %vm625_vm1, %v1069_v60, 0 }
 0x4b2   :  { %1110 = vmatpush.bf16.msra.mxu2 %v7617_v61  ;;  %1171 = vmatpush.bf16.msra.mxu3 %v7617_v61 }
 0x4b3   :  { %1437 = vmatpush.bf16.msra.mxu0 %v7617_v61 }
 0x4b5   :  { %5763 = vmatmul.msk.bf16.vlgmr.msra.gmra.mxu2 %vm621_vm0, %v6990_v62  ;;  %5784 = vmatmul.msk.bf16.vlgmr.msra.gmra.mxu3 %vm621_vm0, %v6995_v63 }
 0x4b6   :  { %1324 = vmatpush.bf16.msrb.mxu2 %v7617_v61  ;;  %1376 = vmatpush.bf16.msrb.mxu3 %v7004_v19  ;;  %v7027_v19 = vld [vmem:[%s8930_s2 + $0xf8] sm:$0xff] }
 0x4ba   :  { %1550 = vmatpush.bf16.msra.mxu2 %v7617_v61  ;;  %1377 = vmatpush.bf16.msrb.mxu3 %v7003_v24 }
 0x4be   :  { %1602 = vmatpush.bf16.msra.mxu3 %v7014_v57 }
 0x4c2   :  { %1603 = vmatpush.bf16.msra.mxu3 %v7013_v59  ;;  %v7029_v59 = vld [vmem:[%s8931_s5 + $0x78] sm:$0xff] }
 0x4c5   :  { %5764 = vmatmul.msk.bf16.gmra.mxu2 %vm621_vm0, %v6991_v0  ;;  %5785 = vmatmul.msk.bf16.gmra.mxu3 %vm621_vm0, %v6996_v1  ;;  %v7025_v0 = vld [vmem:[%s8930_s2 + $0xe8] sm:$0xff] }
 0x4d5   :  { %5765 = vmatmul.msk.bf16.gmra.mxu2 %vm621_vm0, %v6992_v2  ;;  %5786 = vmatmul.msk.bf16.gmra.mxu3 %vm621_vm0, %v6997_v3  ;;  %v7009_v3 = vld [vmem:[%s8931_s5 + $0x38] sm:$0xff] }
 0x4d6   :  { %1489 = vmatpush.bf16.msra.mxu1 %v7009_v3 }
 0x4da   :  { %1490 = vmatpush.bf16.msra.mxu1 %v7008_v9 }
 0x4e5   :  { %5831 = vmatmul.msk.bf16.vlgmr.msrb.gmra.mxu2 %vm621_vm0, %v7000_v4 }
 0x4e6   :  { %1776 = vmatpush.bf16.msrb.mxu2 %v7617_v61 }
 0x4f5   :  { %5832 = vmatmul.msk.bf16.gmra.mxu2 %vm621_vm0, %v7001_v5 }
 0x505   :  { %5833 = vmatmul.msk.bf16.gmra.mxu2 %vm621_vm0, %v7002_v6 }
 0x515   :  { %5903 = vmatmul.msk.bf16.vlgmr.msra.gmra.mxu2 %vm621_vm0, %v7010_v7 }
 0x516   :  { %2002 = vmatpush.bf16.msra.mxu2 %v7617_v61 }
 0x525   :  { %5904 = vmatmul.msk.bf16.gmra.mxu2 %vm621_vm0, %v7011_v18 }
 0x535   :  { %5905 = vmatmul.msk.bf16.gmra.mxu2 %vm621_vm0, %v7012_v27 }
 0x538   :  { %v1112_v10 = vpop.f32.mrf.mxu2  ;;  %v1173_v11 = vpop.f32.mrf.mxu3 }
 0x540   :  { %v1114_v12 = vpop.f32.mrf.mxu2  ;;  %v1175_v13 = vpop.f32.mrf.mxu3 }
 0x541   :  { %v1127_v14 = vpack.c.bf16 %v1114_v12, %v1112_v10  ;;  %v1188_v15 = vpack.c.bf16 %v1175_v13, %v1173_v11  ;;  %v7026_v11 = vld [vmem:[%s8930_s2 + $0xf0] sm:$0xff] }
 0x543   :  { %5799 = vmatmul.msk.bf16.vlgmr.msrb.gmra.mxu0 %vm1208_vm10, %v1188_v15  ;;  %5810 = vmatmul.msk.bf16.vlgmr.msrb.gmra.mxu1 %vm1208_vm10, %v1127_v14 }
 0x544   :  { %1663 = vmatpush.bf16.msrb.mxu0 %v7617_v61 }
 0x545   :  { %5975 = vmatmul.msk.bf16.vlgmr.msrb.gmra.mxu2 %vm621_vm0, %v7020_v33 }
 0x548   :  { %v1117_v16 = vpop.f32.mrf.mxu2  ;;  %v1178_v17 = vpop.f32.mrf.mxu3 }
 0x550   :  { %v1119_v20 = vpop.f32.mrf.mxu2  ;;  %v1180_v21 = vpop.f32.mrf.mxu3 }
 0x551   :  { %v1128_v22 = vpack.c.bf16 %v1119_v20, %v1117_v16  ;;  %v1189_v23 = vpack.c.bf16 %v1180_v21, %v1178_v17  ;;  %v7024_v21 = vld [vmem:[%s8931_s5 + $0x68] sm:$0xff] }
 0x553   :  { %5800 = vmatmul.msk.bf16.gmra.mxu0 %vm1208_vm10, %v1189_v23  ;;  %5811 = vmatmul.msk.bf16.gmra.mxu1 %vm1208_vm10, %v1128_v22  ;;  %v7023_v22 = vld [vmem:[%s8931_s5 + $0x60] sm:$0xff] }
 0x555   :  { %5976 = vmatmul.msk.bf16.gmra.mxu2 %vm621_vm0, %v7021_v47 }
 0x558   :  { %v1122_v25 = vpop.f32.mrf.mxu2  ;;  %v1183_v26 = vpop.f32.mrf.mxu3 }
 0x560   :  { %v1124_v28 = vpop.f32.mrf.mxu2  ;;  %v1185_v29 = vpop.f32.mrf.mxu3 }
 0x561   :  { %v1129_v30 = vpack.c.bf16 %v1124_v28, %v1122_v25  ;;  %v1190_v31 = vpack.c.bf16 %v1185_v29, %v1183_v26 }
 0x563   :  { %5801 = vmatmul.msk.bf16.gmra.mxu0 %vm1208_vm10, %v1190_v31  ;;  %5812 = vmatmul.msk.bf16.gmra.mxu1 %vm1208_vm10, %v1129_v30 }
 0x565   :  { %5977 = vmatmul.msk.bf16.gmra.mxu2 %vm621_vm0, %v7022_v46 }
 0x568   :  { %v1326_v32 = vpop.f32.mrf.mxu2 }
 0x570   :  { %v1328_v35 = vpop.f32.mrf.mxu2 }
 0x571   :  { %v1341_v40 = vpack.c.bf16 %v1328_v35, %v1326_v32  ;;  %v7019_v32 = vld [vmem:[%s8931_s5 + $0x58] sm:$0xff] }
 0x572   :  { %1715 = vmatpush.bf16.msrb.mxu1 %v7019_v32 }
 0x573   :  { %5846 = vmatmul.msk.bf16.vlgmr.msrb.gmra.mxu3 %vm1208_vm10, %v1341_v40  ;;  %5867 = vmatmul.msk.bf16.vlgmr.msra.gmra.mxu0 %vm621_vm0, %v7005_v34 }
 0x574   :  { %1889 = vmatpush.bf16.msra.mxu0 %v7617_v61  ;;  %1828 = vmatpush.bf16.msrb.mxu3 %v7024_v21 }
 0x575   :  { %6047 = vmatmul.msk.bf16.vlgmr.msra.gmra.mxu2 %vm621_vm0, %v7030_v41 }
 0x578   :  { %v1331_v48 = vpop.f32.mrf.mxu2  ;;  %1829 = vmatpush.bf16.msrb.mxu3 %v7023_v22 }
 0x580   :  { %v1333_v50 = vpop.f32.mrf.mxu2 }
 0x581   :  { %v1342_v45 = vpack.c.bf16 %v1333_v50, %v1331_v48 }
 0x583   :  { %5847 = vmatmul.msk.bf16.gmra.mxu3 %vm1208_vm10, %v1342_v45  ;;  %5868 = vmatmul.msk.bf16.gmra.mxu0 %vm621_vm0, %v7006_v49  ;;  %v7018_v49 = vld [vmem:[%s8931_s5 + $0x50] sm:$0xff] }
 0x584   :  { %1716 = vmatpush.bf16.msrb.mxu1 %v7018_v49 }
 0x585   :  { %6048 = vmatmul.msk.bf16.gmra.mxu2 %vm621_vm0, %v7031_v43 }
 0x588   :  { %v1336_v36 = vpop.f32.mrf.mxu2 }
 0x590   :  { %v1338_v38 = vpop.f32.mrf.mxu2 }
 0x591   :  { %v1343_v39 = vpack.c.bf16 %v1338_v38, %v1336_v36 }
 0x593   :  { %5848 = vmatmul.msk.bf16.gmra.mxu3 %vm1208_vm10, %v1343_v39  ;;  %5869 = vmatmul.msk.bf16.gmra.mxu0 %vm621_vm0, %v7007_v37 }
 0x595   :  { %6049 = vmatmul.msk.bf16.gmra.mxu2 %vm621_vm0, %v7032_v44  ;;  %v7034_v44 = vld [vmem:[%s8931_s5 + $0x88] sm:$0xff] }
 0x598   :  { %v1552_v51 = vpop.f32.mrf.mxu2 }
 0x5a0   :  { %v1554_v58 = vpop.f32.mrf.mxu2 }
 0x5a1   :  { %v1567_v60 = vpack.c.bf16 %v1554_v58, %v1552_v51  ;;  %v7033_v51 = vld [vmem:[%s8931_s5 + $0x80] sm:$0xff] }
 0x5a3   :  { %5939 = vmatmul.msk.bf16.vlgmr.msrb.gmra.mxu0 %vm621_vm0, %v7015_v42  ;;  %5918 = vmatmul.msk.bf16.vlgmr.msra.gmra.mxu3 %vm1208_vm10, %v1567_v60 }
 0x5a4   :  { %2054 = vmatpush.bf16.msra.mxu3 %v7034_v44 }
 0x5a8   :  { %v1557_v63 = vpop.f32.mrf.mxu2  ;;  %2055 = vmatpush.bf16.msra.mxu3 %v7033_v51 }
 0x5b0   :  { %v1559_v5 = vpop.f32.mrf.mxu2 }
 0x5b1   :  { %v1568_v6 = vpack.c.bf16 %v1559_v5, %v1557_v63 }
 0x5b3   :  { %5940 = vmatmul.msk.bf16.gmra.mxu0 %vm621_vm0, %v7016_v53  ;;  %5919 = vmatmul.msk.bf16.gmra.mxu3 %vm1208_vm10, %v1568_v6 }
 0x5b8   :  { %v1562_v10 = vpop.f32.mrf.mxu2 }
 0x5c0   :  { %v1227_v54 = vpop.f32.mrf.mxu0  ;;  %v1272_v55 = vpop.f32.mrf.mxu1 }
 0x5c1   :  { %v1273_v56 = vadd.f32 %v1272_v55, %v1227_v54  ;;  %v1564_v15 = vpop.f32.mrf.mxu2 }
 0x5c2   :  { %v1569_v16 = vpack.c.bf16 %v1564_v15, %v1562_v10 }
 0x5c3   :  { %5941 = vmatmul.msk.bf16.gmra.mxu0 %vm621_vm0, %v7017_v52 }
 0x5c4   :  { %5920 = vmatmul.msk.bf16.gmra.mxu3 %vm1208_vm10, %v1569_v16 }
 0x5c8   :  { %v7751_v61 = vpop.f32.mrf.mxu0  ;;  %v7753_v62 = vpop.f32.mrf.mxu1 }
 0x5c9   :  { %v1778_v18 = vpop.f32.mrf.mxu2 }
 0x5d0   :  { %v1232_v1 = vpop.f32.mrf.mxu0  ;;  %v1277_v2 = vpop.f32.mrf.mxu1 }
 0x5d1   :  { %v1278_v4 = vadd.f32 %v1277_v2, %v1232_v1  ;;  %v1780_v23 = vpop.f32.mrf.mxu2  ;;  %v7028_v2 = vld [vmem:[%s8931_s5 + $0x70] sm:$0xff] }
 0x5d2   :  { %v1793_v25 = vpack.c.bf16 %v1780_v23, %v1778_v18 }
 0x5d3   :  { %6011 = vmatmul.msk.bf16.vlgmr.msra.gmra.mxu0 %vm621_vm0, %v7025_v0 }
 0x5d4   :  { %5990 = vmatmul.msk.bf16.vlgmr.msrb.gmra.mxu3 %vm1208_vm10, %v1793_v25 }
 0x5d8   :  { %v7763_v7 = vpop.f32.mrf.mxu0  ;;  %v7765_v8 = vpop.f32.mrf.mxu1 }
 0x5d9   :  { %v1783_v29 = vpop.f32.mrf.mxu2 }
 0x5e0   :  { %v1237_v12 = vpop.f32.mrf.mxu0  ;;  %v1282_v13 = vpop.f32.mrf.mxu1 }
 0x5e1   :  { %v1283_v14 = vadd.f32 %v1282_v13, %v1237_v12  ;;  %v1785_v33 = vpop.f32.mrf.mxu2 }
 0x5e2   :  { %v1794_v35 = vpack.c.bf16 %v1785_v33, %v1783_v29 }
 0x5e3   :  { %6012 = vmatmul.msk.bf16.gmra.mxu0 %vm621_vm0, %v7026_v11 }
 0x5e4   :  { %5991 = vmatmul.msk.bf16.gmra.mxu3 %vm1208_vm10, %v1794_v35 }
 0x5e8   :  { %v7775_v17 = vpop.f32.mrf.mxu0  ;;  %v1284_v22 = vpop.f32.mrf.mxu1 }
 0x5e9   :  { %v1788_v50 = vpop.f32.mrf.mxu2 }
 0x5f0   :  { %v1439_v20 = vpop.f32.mrf.mxu0 }
 0x5f1   :  { %v1790_v36 = vpop.f32.mrf.mxu2 }
 0x5f2   :  { %v1795_v38 = vpack.c.bf16 %v1790_v36, %v1788_v50 }
 0x5f3   :  { %6013 = vmatmul.msk.bf16.gmra.mxu0 %vm621_vm0, %v7027_v19 }
 0x5f4   :  { %5992 = vmatmul.msk.bf16.gmra.mxu3 %vm1208_vm10, %v1795_v38 }
 0x5f6   :  { %v1379_v24 = vpop.f32.mrf.mxu3 }
 0x5f7   :  { %v7788_v26 = vadd.f32 %v1379_v24, %v1273_v56 }
 0x5f8   :  { %v1441_v27 = vpop.f32.mrf.mxu0 }
 0x5f9   :  { %v1454_v28 = vpack.c.bf16 %v1441_v27, %v1439_v20  ;;  %v2004_v43 = vpop.f32.mrf.mxu2 }
 0x5fb   :  { %5882 = vmatmul.msk.bf16.vlgmr.msra.gmra.mxu1 %vm1208_vm10, %v1454_v28 }
 0x5fc   :  { %1941 = vmatpush.bf16.msra.mxu1 %v7029_v59 }
 0x5fe   :  { %v7792_v30 = vpop.f32.mrf.mxu3 }
 0x600   :  { %v1444_v31 = vpop.f32.mrf.mxu0  ;;  %1942 = vmatpush.bf16.msra.mxu1 %v7028_v2 }
 0x601   :  { %v2006_v52 = vpop.f32.mrf.mxu2 }
 0x602   :  { %v2019_v54 = vpack.c.bf16 %v2006_v52, %v2004_v43 }
 0x604   :  { %6062 = vmatmul.msk.bf16.vlgmr.msra.gmra.mxu3 %vm1208_vm10, %v2019_v54 }
 0x606   :  { %v1384_v34 = vpop.f32.mrf.mxu3 }
 0x607   :  { %v7797_v40 = vadd.f32 %v1384_v34, %v1278_v4 }
 0x608   :  { %v1446_v47 = vpop.f32.mrf.mxu0 }
 0x609   :  { %v1455_v48 = vpack.c.bf16 %v1446_v47, %v1444_v31  ;;  %v2009_v57 = vpop.f32.mrf.mxu2 }
 0x60b   :  { %5883 = vmatmul.msk.bf16.gmra.mxu1 %vm1208_vm10, %v1455_v48 }
 0x60e   :  { %v7804_v45 = vpop.f32.mrf.mxu3 }
 0x610   :  { %v1449_v46 = vpop.f32.mrf.mxu0 }
 0x611   :  { %v2011_v60 = vpop.f32.mrf.mxu2 }
 0x612   :  { %v2020_v63 = vpack.c.bf16 %v2011_v60, %v2009_v57 }
 0x614   :  { %6063 = vmatmul.msk.bf16.gmra.mxu3 %vm1208_vm10, %v2020_v63 }
 0x616   :  { %v1389_v37 = vpop.f32.mrf.mxu3 }
 0x617   :  { %v7806_v39 = vadd.f32 %v1389_v37, %v1283_v14 }
 0x618   :  { %v1451_v41 = vpop.f32.mrf.mxu0 }
 0x619   :  { %v1456_v42 = vpack.c.bf16 %v1451_v41, %v1449_v46  ;;  %v2014_v3 = vpop.f32.mrf.mxu2 }
 0x61b   :  { %5884 = vmatmul.msk.bf16.gmra.mxu1 %vm1208_vm10, %v1456_v42 }
 0x61e   :  { %v1391_v11 = vpop.f32.mrf.mxu3 }
 0x620   :  { %v1665_v53 = vpop.f32.mrf.mxu0 }
 0x621   :  { %v2016_v5 = vpop.f32.mrf.mxu2 }
 0x622   :  { %v2021_v6 = vpack.c.bf16 %v2016_v5, %v2014_v3  ;;  %v1280_v3 = vadd.f32 %v7765_v8, %v7763_v7 }
 0x624   :  { %6064 = vmatmul.msk.bf16.gmra.mxu3 %vm1208_vm10, %v2021_v6  ;;  %v1397_v5 = vadd.f32 %v7804_v45, %v1280_v3  ;;  %v7056_v3 = vld [vmem:[%s8933_s3 + $0xa0] sm:$0xff] }
 0x626   :  { %v1605_v14 = vpop.f32.mrf.mxu3 }
 0x628   :  { %v1667_v55 = vpop.f32.mrf.mxu0 }
 0x629   :  { %v1680_v56 = vpack.c.bf16 %v1667_v55, %v1665_v53 }
 0x62b   :  { %5954 = vmatmul.msk.bf16.vlgmr.msrb.gmra.mxu1 %vm1208_vm10, %v1680_v56 }
 0x62e   :  { %v7829_v18 = vpop.f32.mrf.mxu3 }
 0x630   :  { %v1670_v58 = vpop.f32.mrf.mxu0 }
 0x636   :  { %v1610_v21 = vpop.f32.mrf.mxu3 }
 0x638   :  { %v1672_v0 = vpop.f32.mrf.mxu0 }
 0x639   :  { %v1681_v1 = vpack.c.bf16 %v1672_v0, %v1670_v58 }
 0x63b   :  { %5955 = vmatmul.msk.bf16.gmra.mxu1 %vm1208_vm10, %v1681_v1 }
 0x63e   :  { %v1612_v24 = vpop.f32.mrf.mxu3 }
 0x640   :  { %v1675_v4 = vpop.f32.mrf.mxu0 }
 0x647   :  { %v1615_v33 = vpop.f32.mrf.mxu3 }
 0x648   :  { %v1677_v9 = vpop.f32.mrf.mxu0 }
 0x649   :  { %v1682_v10 = vpack.c.bf16 %v1677_v9, %v1675_v4  ;;  %v1275_v9 = vadd.f32 %v7753_v62, %v7751_v61 }
 0x64b   :  { %5956 = vmatmul.msk.bf16.gmra.mxu1 %vm1208_vm10, %v1682_v10  ;;  %v1285_v10 = vadd.f32 %v1284_v22, %v7775_v17 }
 0x64f   :  { %v1617_v47 = vpop.f32.mrf.mxu3 }
 0x650   :  { %v1891_v12 = vpop.f32.mrf.mxu0 }
 0x657   :  { %v1831_v50 = vpop.f32.mrf.mxu3 }
 0x658   :  { %v1893_v13 = vpop.f32.mrf.mxu0 }
 0x659   :  { %v1906_v15 = vpack.c.bf16 %v1893_v13, %v1891_v12  ;;  %v1395_v13 = vadd.f32 %v7792_v30, %v1275_v9  ;;  %v7057_v9 = vld [vmem:[%s8933_s3 + $0xa8] sm:$0xff] }
 0x65b   :  { %6026 = vmatmul.msk.bf16.vlgmr.msra.gmra.mxu1 %vm1208_vm10, %v1906_v15 }
 0x65f   :  { %v1833_v38 = vpop.f32.mrf.mxu3 }
 0x660   :  { %v1896_v16 = vpop.f32.mrf.mxu0 }
 0x667   :  { %v1836_v42 = vpop.f32.mrf.mxu3 }
 0x668   :  { %v1898_v19 = vpop.f32.mrf.mxu0 }
 0x669   :  { %v1907_v20 = vpack.c.bf16 %v1898_v19, %v1896_v16 }
 0x66b   :  { %6027 = vmatmul.msk.bf16.gmra.mxu1 %vm1208_vm10, %v1907_v20 }
 0x66f   :  { %v1838_v51 = vpop.f32.mrf.mxu3 }
 0x670   :  { %v1901_v23 = vpop.f32.mrf.mxu0 }
 0x678   :  { %v1492_v25 = vpop.f32.mrf.mxu1  ;;  %v1903_v27 = vpop.f32.mrf.mxu0 }
 0x679   :  { %v1507_v28 = vadd.f32 %v1492_v25, %v7788_v26  ;;  %v1908_v29 = vpack.c.bf16 %v1903_v27, %v1901_v23 }
 0x67b   :  { %6028 = vmatmul.msk.bf16.gmra.mxu1 %vm1208_vm10, %v1908_v29  ;;  %v1620_v31 = vadd.f32 %v1605_v14, %v1507_v28  ;;  %v1399_v14 = vadd.f32 %v1391_v11, %v1285_v10  ;;  %v7039_v10 = vld [vmem:[%s8933_s3 + $0x20] sm:$0xff] }
 0x680   :  { %v1494_v32 = vpop.f32.mrf.mxu1 }
 0x681   :  { %v1508_v15 = vadd.f32 %v1494_v32, %v1395_v13  ;;  %v7045_v13 = vld [vmem:[%s8933_s3 + $0x50] sm:$0xff] }
 0x683   :  { %v1621_v8 = vadd.f32 %v7829_v18, %v1508_v15  ;;  %v7040_v15 = vld [vmem:[%s8933_s3 + $0x28] sm:$0xff] }
 0x688   :  { %v1497_v34 = vpop.f32.mrf.mxu1 }
 0x689   :  { %v1509_v35 = vadd.f32 %v1497_v34, %v7797_v40  ;;  %v1841_v40 = vpop.f32.mrf.mxu3  ;;  %v2078_v34 = vld [vmem:[%s8927_s1 + $0x6] ss:$0 sm:$0xff] }
 0x68b   :  { %v1622_v48 = vadd.f32 %v1610_v21, %v1509_v35 }
 0x690   :  { %v1499_v49 = vpop.f32.mrf.mxu1 }
 0x691   :  { %v1843_v57 = vpop.f32.mrf.mxu3  ;;  %v1510_v12 = vadd.f32 %v1499_v49, %v1397_v5  ;;  %v7051_v5 = vld [vmem:[%s8933_s3 + $0x78] sm:$0xff] }
 0x693   :  { %v1623_v19 = vadd.f32 %v1612_v24, %v1510_v12  ;;  %v7052_v12 = vld [vmem:[%s8933_s3 + $0x80] sm:$0xff] }
 0x698   :  { %v1502_v46 = vpop.f32.mrf.mxu1 }
 0x699   :  { %v1511_v36 = vadd.f32 %v1502_v46, %v7806_v39  ;;  %v2057_v59 = vpop.f32.mrf.mxu3 }
 0x69b   :  { %v1624_v37 = vadd.f32 %v1615_v33, %v1511_v36 }
 0x6a0   :  { %v1504_v41 = vpop.f32.mrf.mxu1 }
 0x6a1   :  { %v2059_v39 = vpop.f32.mrf.mxu3  ;;  %v1512_v16 = vadd.f32 %v1504_v41, %v1399_v14  ;;  %v7058_v14 = vld [vmem:[%s8933_s3 + $0xb0] sm:$0xff] }
 0x6a3   :  { %v1625_v45 = vadd.f32 %v1617_v47, %v1512_v16  ;;  %v7053_v16 = vld [vmem:[%s8933_s3 + $0x88] sm:$0xff] }
 0x6a8   :  { %v1718_v26 = vpop.f32.mrf.mxu1 }
 0x6a9   :  { %v1733_v43 = vadd.f32 %v1718_v26, %v1620_v31  ;;  %v2062_v1 = vpop.f32.mrf.mxu3 }
 0x6ab   :  { %v1846_v53 = vadd.f32 %v1831_v50, %v1733_v43 }
 0x6b0   :  { %v1720_v44 = vpop.f32.mrf.mxu1 }
 0x6b1   :  { %v2064_v4 = vpop.f32.mrf.mxu3  ;;  %v1734_v27 = vadd.f32 %v1720_v44, %v1621_v8  ;;  %v7061_v8 = vld [vmem:[%s8933_s3 + $0xc0] sm:$0xff] }
 0x6b3   :  { %v1847_v22 = vadd.f32 %v1833_v38, %v1734_v27 }
 0x6b8   :  { %v1723_v52 = vpop.f32.mrf.mxu1 }
 0x6b9   :  { %v1735_v54 = vadd.f32 %v1723_v52, %v1622_v48  ;;  %v2067_v23 = vpop.f32.mrf.mxu3 }
 0x6bb   :  { %v1848_v55 = vadd.f32 %v1836_v42, %v1735_v54 }
 0x6c0   :  { %v1725_v56 = vpop.f32.mrf.mxu1 }
 0x6c1   :  { %v1736_v21 = vadd.f32 %v1725_v56, %v1623_v19  ;;  %v2069_v18 = vpop.f32.mrf.mxu3  ;;  %v7060_v56 = vld [vmem:[%s8932_s6 + $0x8] sm:$0xff]  ;;  %v7046_v19 = vld [vmem:[%s8933_s3 + $0x58] sm:$0xff] }
 0x6c3   :  { %v1849_v61 = vadd.f32 %v1838_v51, %v1736_v21  ;;  %v7041_v21 = vld [vmem:[%s8933_s3 + $0x30] sm:$0xff] }
 0x6c8   :  { %v1728_v58 = vpop.f32.mrf.mxu1 }
 0x6c9   :  { %v1737_v20 = vadd.f32 %v1728_v58, %v1624_v37  ;;  %v7042_v58 = vld [vmem:[%s8933_s3 + $0x38] sm:$0xff] }
 0x6cb   :  { %v1850_v25 = vadd.f32 %v1841_v40, %v1737_v20  ;;  %v7059_v20 = vld [vmem:[%s8933_s3 + $0xb8] sm:$0xff] }
 0x6d0   :  { %v1730_v60 = vpop.f32.mrf.mxu1 }
 0x6d1   :  { %v1738_v28 = vadd.f32 %v1730_v60, %v1625_v45  ;;  %v7036_v60 = vld [vmem:[%s8933_s3 + $0x8] sm:$0xff] }
 0x6d3   :  { %v1851_v11 = vadd.f32 %v1843_v57, %v1738_v28  ;;  %v7035_v57 = vld [vmem:[%s8933_s3] sm:$0xff] }
 0x6d8   :  { %v1944_v63 = vpop.f32.mrf.mxu1 }
 0x6d9   :  { %v1959_v35 = vadd.f32 %v1944_v63, %v1846_v53  ;;  %v7049_v63 = vld [vmem:[%s8933_s3 + $0x68] sm:$0xff] }
 0x6db   :  { %v2072_v37 = vadd.f32 %v2057_v59, %v1959_v35  ;;  %v7048_v59 = vld [vmem:[%s8933_s3 + $0x60] sm:$0xff] }
 0x6dd   :  { %v2079_v51 = vadd.f32 %v2078_v34, %v2072_v37 }
 0x6e0   :  { %v1946_v0 = vpop.f32.mrf.mxu1 }
 0x6e1   :  { %v1960_v32 = vadd.f32 %v1946_v0, %v1847_v22  ;;  %v7037_v0 = vld [vmem:[%s8933_s3 + $0x10] sm:$0xff] }
 0x6e2   :  { %v7063_v22 = vld [vmem:[%s8933_s3 + $0xd0] sm:$0xff] }
 0x6e3   :  { %v2073_v50 = vadd.f32 %v2059_v39, %v1960_v32  ;;  %v7055_v39 = vld [vmem:[%s8933_s3 + $0x98] sm:$0xff] }
 0x6e5   :  { %v2080_v42 = vadd.f32 %v2078_v34, %v2073_v50 }
 0x6e7   :  { %v2086_v53 = vmax.f32 %v2080_v42, 0.0 }
 0x6e8   :  { %v1949_v2 = vpop.f32.mrf.mxu1 }
 0x6e9   :  { %v1961_v29 = vadd.f32 %v1949_v2, %v1848_v55  ;;  %v2085_v55 = vmax.f32 %v2079_v51, 0.0  ;;  %v7043_v2 = vld [vmem:[%s8933_s3 + $0x40] sm:$0xff] }
 0x6eb   :  { %v2074_v47 = vadd.f32 %v2062_v1, %v1961_v29  ;;  %v7859_v40 = vpack.c.bf16 %v2086_v53, %v2085_v55  ;;  %v7050_v1 = vld [vmem:[%s8933_s3 + $0x70] sm:$0xff] }
 0x6ed   :  { %v2081_v38 = vadd.f32 %v2078_v34, %v2074_v47 }
 0x6ef   :  { %v2087_v52 = vmax.f32 %v2081_v38, 0.0 }
 0x6f0   :  { %v1951_v6 = vpop.f32.mrf.mxu1 }
 0x6f1   :  { %v1962_v17 = vadd.f32 %v1951_v6, %v1849_v61  ;;  %v7044_v6 = vld [vmem:[%s8933_s3 + $0x48] sm:$0xff] }
 0x6f3   :  { %v2075_v24 = vadd.f32 %v2064_v4, %v1962_v17  ;;  %v7038_v4 = vld [vmem:[%s8933_s3 + $0x18] sm:$0xff] }
 0x6f5   :  { %v2082_v46 = vadd.f32 %v2078_v34, %v2075_v24 }
 0x6f7   :  { %v2088_v43 = vmax.f32 %v2082_v46, 0.0 }
 0x6f8   :  { %v1954_v7 = vpop.f32.mrf.mxu1 }
 0x6f9   :  { %v1963_v62 = vadd.f32 %v1954_v7, %v1850_v25  ;;  %v7853_v54 = vpack.c.bf16 %v2088_v43, %v2087_v52  ;;  %v7047_v7 = vld [vmem:[%s8932_s6] sm:$0xff]  ;;  %v7062_v25 = vld [vmem:[%s8933_s3 + $0xc8] sm:$0xff] }
 0x6fb   :  { %v2076_v30 = vadd.f32 %v2067_v23, %v1963_v62  ;;  %v7054_v23 = vld [vmem:[%s8933_s3 + $0x90] sm:$0xff] }
 0x6fd   :  { %v2083_v48 = vadd.f32 %v2078_v34, %v2076_v30 }
 0x6ff   :  { %v2089_v41 = vmax.f32 %v2083_v48, 0.0 }
 0x700   :  { %v1956_v31 = vpop.f32.mrf.mxu1 }
 0x701   :  { %v1964_v33 = vadd.f32 %v1956_v31, %v1851_v11 }
 0x703   :  { %v2077_v49 = vadd.f32 %v2069_v18, %v1964_v33  ;;  %v7064_v33 = vld [vmem:[%s8933_s3 + $0xd8] sm:$0xff] }
 0x705   :  { %v2084_v36 = vadd.f32 %v2078_v34, %v2077_v49 }
 0x707   :  { %v2090_v26 = vmax.f32 %v2084_v36, 0.0  ;;  %v7065_v36 = vld [vmem:[%s8933_s3 + $0xe0] sm:$0xff] }
 0x709   :  { %v7847_v44 = vpack.c.bf16 %v2090_v26, %v2089_v41  ;;  %v7073_v26 = vld [vmem:[%s8932_s6 + $0x10] sm:$0xff] }
 0x70b   :  { %2220 = vmatpush.bf16.msrb.mxu0 %v7847_v44  ;;  %7152 = vmatpush.bf16.msrb.mxu2 %v7847_v44 }
 0x70c   :  { %2424 = vmatpush.bf16.msrb.mxu1 %v7847_v44  ;;  %7155 = vmatpush.bf16.msrb.mxu3 %v7847_v44 }
 0x70f   :  { %2221 = vmatpush.bf16.msrb.mxu0 %v7853_v54  ;;  %7153 = vmatpush.bf16.msrb.mxu2 %v7853_v54 }
 0x710   :  { %2425 = vmatpush.bf16.msrb.mxu1 %v7853_v54  ;;  %7156 = vmatpush.bf16.msrb.mxu3 %v7853_v54 }
 0x713   :  { %2222 = vmatpush.bf16.msrb.mxu0 %v7859_v40  ;;  %7154 = vmatpush.bf16.msrb.mxu2 %v7859_v40 }
 0x714   :  { %2426 = vmatpush.bf16.msrb.mxu1 %v7859_v40  ;;  %7157 = vmatpush.bf16.msrb.mxu3 %v7859_v40 }
 0x716   :  { %6113 = vmatmul.msk.bf16.vlgmr.msrb.gmra.mxu0 %vm2178_vm12, %v7035_v57  ;;  %6120 = vmatmul.msk.bf16.vlgmr.msrb.gmra.mxu2 %vm2178_vm12, %v7042_v58 }
 0x717   :  { %2852 = vmatpush.bf16.msra.mxu0 %v7847_v44  ;;  %2553 = vmatpush.bf16.msra.mxu2 %v7060_v56  ;;  %v7066_v56 = vld [vmem:[%s8933_s3 + $0xe8] sm:$0xff] }
 0x718   :  { %6197 = vmatmul.msk.bf16.vlgmr.msrb.gmra.mxu1 %vm2178_vm12, %v7048_v59  ;;  %6204 = vmatmul.msk.bf16.vlgmr.msrb.gmra.mxu3 %vm2178_vm12, %v7055_v39 }
 0x719   :  { %2664 = vmatpush.bf16.msra.mxu3 %v7047_v7  ;;  %2980 = vmatpush.bf16.msra.mxu1 %v7073_v26 }
 0x71b   :  { %3192 = vmatpush.bf16.msrb.mxu2 %v7847_v44  ;;  %2853 = vmatpush.bf16.msra.mxu0 %v7853_v54 }
 0x71f   :  { %3193 = vmatpush.bf16.msrb.mxu2 %v7853_v54  ;;  %2854 = vmatpush.bf16.msra.mxu0 %v7859_v40 }
 0x723   :  { %3532 = vmatpush.bf16.msrb.mxu0 %v7847_v44  ;;  %3194 = vmatpush.bf16.msrb.mxu2 %v7859_v40 }
 0x726   :  { %6114 = vmatmul.msk.bf16.gmra.mxu0 %vm2178_vm12, %v7036_v60  ;;  %6121 = vmatmul.msk.bf16.gmra.mxu2 %vm2178_vm12, %v7043_v2 }
 0x727   :  { %3533 = vmatpush.bf16.msrb.mxu0 %v7853_v54 }
 0x728   :  { %6198 = vmatmul.msk.bf16.gmra.mxu1 %vm2178_vm12, %v7049_v63  ;;  %6205 = vmatmul.msk.bf16.gmra.mxu3 %vm2178_vm12, %v7056_v3  ;;  %v7067_v3 = vld [vmem:[%s8933_s3 + $0xf0] sm:$0xff] }
 0x72b   :  { %3534 = vmatpush.bf16.msrb.mxu0 %v7859_v40 }
 0x736   :  { %6115 = vmatmul.msk.bf16.gmra.mxu0 %vm2178_vm12, %v7037_v0  ;;  %6122 = vmatmul.msk.bf16.gmra.mxu2 %vm2178_vm12, %v7044_v6 }
 0x738   :  { %6199 = vmatmul.msk.bf16.gmra.mxu1 %vm2178_vm12, %v7050_v1  ;;  %6206 = vmatmul.msk.bf16.gmra.mxu3 %vm2178_vm12, %v7057_v9 }
 0x746   :  { %6116 = vmatmul.msk.bf16.gmra.mxu0 %vm2178_vm12, %v7038_v4  ;;  %6123 = vmatmul.msk.bf16.gmra.mxu2 %vm2178_vm12, %v7045_v13 }
 0x748   :  { %6200 = vmatmul.msk.bf16.gmra.mxu1 %vm2178_vm12, %v7051_v5  ;;  %6207 = vmatmul.msk.bf16.gmra.mxu3 %vm2178_vm12, %v7058_v14 }
 0x756   :  { %6117 = vmatmul.msk.bf16.gmra.mxu0 %vm2178_vm12, %v7039_v10  ;;  %6124 = vmatmul.msk.bf16.gmra.mxu2 %vm2178_vm12, %v7046_v19  ;;  %v7068_v19 = vld [vmem:[%s8933_s3 + $0xf8] sm:$0xff] }
 0x758   :  { %6201 = vmatmul.msk.bf16.gmra.mxu1 %vm2178_vm12, %v7052_v12  ;;  %6208 = vmatmul.msk.bf16.gmra.mxu3 %vm2178_vm12, %v7059_v20 }
 0x766   :  { %6118 = vmatmul.msk.bf16.gmra.mxu0 %vm2178_vm12, %v7040_v15 }
 0x768   :  { %6202 = vmatmul.msk.bf16.gmra.mxu1 %vm2178_vm12, %v7053_v16 }
 0x776   :  { %6119 = vmatmul.msk.bf16.gmra.mxu0 %vm2178_vm12, %v7041_v21 }
 0x778   :  { %6203 = vmatmul.msk.bf16.gmra.mxu1 %vm2178_vm12, %v7054_v23 }
 0x786   :  { %6315 = vmatmul.msk.bf16.vlgmr.msra.gmra.mxu0 %vm2178_vm12, %v7061_v8 }
 0x787   :  { %4212 = vmatpush.bf16.msra.mxu0 %v7847_v44 }
 0x78b   :  { %4213 = vmatpush.bf16.msra.mxu0 %v7853_v54 }
 0x78f   :  { %4214 = vmatpush.bf16.msra.mxu0 %v7859_v40 }
 0x793   :  { %v2224_v45 = vpop.f32.mrf.mxu0 }
 0x795   :  { %v2428_v27 = vpop.f32.mrf.mxu1 }
 0x796   :  { %6316 = vmatmul.msk.bf16.gmra.mxu0 %vm2178_vm12, %v7062_v25 }
 0x799   :  { %v8006_v46 = vpop.f32.mrf.mxu2 }
 0x79b   :  { %v2226_v28 = vpop.f32.mrf.mxu0  ;;  %v8002_v50 = vpop.f32.mrf.mxu3 }
 0x79c   :  { %v2284_v61 = vpack.c.bf16 %v2226_v28, %v2224_v45  ;;  %v7069_v28 = vld [vmem:[%s8933_s3 + $0x100] sm:$0xff] }
 0x79d   :  { %v2430_v62 = vpop.f32.mrf.mxu1 }
 0x79e   :  { %v2488_v17 = vpack.c.bf16 %v2430_v62, %v2428_v27  ;;  %6231 = vmatmul.msk.bf16.vlgmr.msra.gmra.mxu3 %vm2509_vm8, %v2284_v61 }
 0x7a0   :  { %6215 = vmatmul.msk.bf16.vlgmr.msra.gmra.mxu2 %vm2509_vm8, %v2488_v17 }
 0x7a1   :  { %3872 = vmatpush.bf16.msra.mxu2 %v7847_v44  ;;  %v2261_v42 = vpop.f32.mrf.mxu2 }
 0x7a3   :  { %v2229_v29 = vpop.f32.mrf.mxu0  ;;  %v2465_v41 = vpop.f32.mrf.mxu3 }
 0x7a5   :  { %3873 = vmatpush.bf16.msra.mxu2 %v7853_v54  ;;  %v2433_v30 = vpop.f32.mrf.mxu1 }
 0x7a6   :  { %6317 = vmatmul.msk.bf16.gmra.mxu0 %vm2178_vm12, %v7063_v22 }
 0x7a9   :  { %3874 = vmatpush.bf16.msra.mxu2 %v7859_v40  ;;  %v8022_v57 = vpop.f32.mrf.mxu2 }
 0x7ab   :  { %v2231_v11 = vpop.f32.mrf.mxu0  ;;  %v8017_v55 = vpop.f32.mrf.mxu3 }
 0x7ac   :  { %v2285_v32 = vpack.c.bf16 %v2231_v11, %v2229_v29  ;;  %v2291_v29 = vpack.c.bf16 %v2261_v42, %v8006_v46 }
 0x7ad   :  { %v2435_v31 = vpop.f32.mrf.mxu1 }
 0x7ae   :  { %v2489_v24 = vpack.c.bf16 %v2435_v31, %v2433_v30  ;;  %6232 = vmatmul.msk.bf16.gmra.mxu3 %vm2509_vm8, %v2285_v32  ;;  %v2495_v30 = vpack.c.bf16 %v2465_v41, %v8002_v50 }
 0x7b0   :  { %6216 = vmatmul.msk.bf16.gmra.mxu2 %vm2509_vm8, %v2489_v24  ;;  %v7070_v24 = vld [vmem:[%s8933_s3 + $0x108] sm:$0xff] }
 0x7b1   :  { %v2266_v2 = vpop.f32.mrf.mxu2 }
 0x7b3   :  { %v2234_v34 = vpop.f32.mrf.mxu0  ;;  %v2470_v60 = vpop.f32.mrf.mxu3 }
 0x7b5   :  { %v2438_v18 = vpop.f32.mrf.mxu1 }
 0x7b6   :  { %6318 = vmatmul.msk.bf16.gmra.mxu0 %vm2178_vm12, %v7064_v33 }
 0x7b9   :  { %v2269_v9 = vpop.f32.mrf.mxu2 }
 0x7bb   :  { %v2236_v35 = vpop.f32.mrf.mxu0  ;;  %v2473_v6 = vpop.f32.mrf.mxu3 }
 0x7bc   :  { %v2286_v48 = vpack.c.bf16 %v2236_v35, %v2234_v34 }
 0x7bd   :  { %v2440_v47 = vpop.f32.mrf.mxu1 }
 0x7be   :  { %v2490_v49 = vpack.c.bf16 %v2440_v47, %v2438_v18  ;;  %6233 = vmatmul.msk.bf16.gmra.mxu3 %vm2509_vm8, %v2286_v48  ;;  %v2292_v47 = vpack.c.bf16 %v2266_v2, %v8022_v57  ;;  %v2496_v48 = vpack.c.bf16 %v2470_v60, %v8017_v55  ;;  %v7072_v57 = vld [vmem:[%s8933_s3 + $0x118] sm:$0xff] }
 0x7c0   :  { %6217 = vmatmul.msk.bf16.gmra.mxu2 %vm2509_vm8, %v2490_v49 }
 0x7c1   :  { %v2271_v16 = vpop.f32.mrf.mxu2 }
 0x7c3   :  { %v2239_v37 = vpop.f32.mrf.mxu0  ;;  %v2475_v15 = vpop.f32.mrf.mxu3 }
 0x7c5   :  { %v2443_v38 = vpop.f32.mrf.mxu1 }
 0x7c6   :  { %6319 = vmatmul.msk.bf16.gmra.mxu0 %vm2178_vm12, %v7065_v36 }
 0x7c9   :  { %v8039_v7 = vpop.f32.mrf.mxu2 }
 0x7cb   :  { %v2241_v43 = vpop.f32.mrf.mxu0  ;;  %v8037_v23 = vpop.f32.mrf.mxu3 }
 0x7cc   :  { %v2287_v52 = vpack.c.bf16 %v2241_v43, %v2239_v37  ;;  %v7071_v37 = vld [vmem:[%s8933_s3 + $0x110] sm:$0xff]  ;;  %v2293_v43 = vpack.c.bf16 %v2271_v16, %v2269_v9  ;;  %v7087_v9 = vld [vmem:[%s8933_s3 + $0x180] sm:$0xff] }
 0x7cd   :  { %v2445_v51 = vpop.f32.mrf.mxu1 }
 0x7ce   :  { %v2491_v53 = vpack.c.bf16 %v2445_v51, %v2443_v38  ;;  %6234 = vmatmul.msk.bf16.gmra.mxu3 %vm2509_vm8, %v2287_v52  ;;  %v2497_v51 = vpack.c.bf16 %v2475_v15, %v2473_v6 }
 0x7d0   :  { %6218 = vmatmul.msk.bf16.gmra.mxu2 %vm2509_vm8, %v2491_v53 }
 0x7d1   :  { %v2276_v17 = vpop.f32.mrf.mxu2 }
 0x7d3   :  { %v2244_v58 = vpop.f32.mrf.mxu0  ;;  %v2480_v61 = vpop.f32.mrf.mxu3 }
 0x7d4   :  { %v2498_v2 = vpack.c.bf16 %v2480_v61, %v8037_v23 }
 0x7d5   :  { %v2448_v59 = vpop.f32.mrf.mxu1 }
 0x7d6   :  { %6320 = vmatmul.msk.bf16.gmra.mxu0 %vm2178_vm12, %v7066_v56 }
 0x7d9   :  { %v8054_v32 = vpop.f32.mrf.mxu2 }
 0x7db   :  { %v2246_v63 = vpop.f32.mrf.mxu0  ;;  %v8049_v31 = vpop.f32.mrf.mxu3 }
 0x7dc   :  { %v2288_v0 = vpack.c.bf16 %v2246_v63, %v2244_v58  ;;  %v7086_v58 = vld [vmem:[%s8932_s6 + $0x18] sm:$0xff] }
 0x7dd   :  { %v2450_v39 = vpop.f32.mrf.mxu1  ;;  %3320 = vmatpush.bf16.msrb.mxu3 %v7086_v58 }
 0x7de   :  { %v2492_v1 = vpack.c.bf16 %v2450_v39, %v2448_v59  ;;  %6235 = vmatmul.msk.bf16.gmra.mxu3 %vm2509_vm8, %v2288_v0  ;;  %v7099_v39 = vld [vmem:[%s8932_s6 + $0x20] sm:$0xff] }
 0x7df   :  { %3660 = vmatpush.bf16.msrb.mxu1 %v7099_v39 }
 0x7e0   :  { %6219 = vmatmul.msk.bf16.gmra.mxu2 %vm2509_vm8, %v2492_v1  ;;  %v2294_v1 = vpack.c.bf16 %v2276_v17, %v8039_v7  ;;  %v7088_v7 = vld [vmem:[%s8933_s3 + $0x188] sm:$0xff] }
 0x7e1   :  { %v2281_v18 = vpop.f32.mrf.mxu2 }
 0x7e2   :  { %v2295_v15 = vpack.c.bf16 %v2281_v18, %v8054_v32 }
 0x7e3   :  { %v2249_v4 = vpop.f32.mrf.mxu0  ;;  %v2485_v34 = vpop.f32.mrf.mxu3 }
 0x7e4   :  { %v2499_v16 = vpack.c.bf16 %v2485_v34, %v8049_v31 }
 0x7e5   :  { %v2453_v5 = vpop.f32.mrf.mxu1 }
 0x7e6   :  { %6321 = vmatmul.msk.bf16.gmra.mxu0 %vm2178_vm12, %v7067_v3 }
 0x7eb   :  { %v2251_v10 = vpop.f32.mrf.mxu0 }
 0x7ec   :  { %v2289_v13 = vpack.c.bf16 %v2251_v10, %v2249_v4 }
 0x7ed   :  { %v2455_v12 = vpop.f32.mrf.mxu1 }
 0x7ee   :  { %v2493_v14 = vpack.c.bf16 %v2455_v12, %v2453_v5  ;;  %6236 = vmatmul.msk.bf16.gmra.mxu3 %vm2509_vm8, %v2289_v13 }
 0x7f0   :  { %6220 = vmatmul.msk.bf16.gmra.mxu2 %vm2509_vm8, %v2493_v14 }
 0x7f3   :  { %v2254_v20 = vpop.f32.mrf.mxu0 }
 0x7f5   :  { %v2458_v21 = vpop.f32.mrf.mxu1 }
 0x7f6   :  { %6322 = vmatmul.msk.bf16.gmra.mxu0 %vm2178_vm12, %v7068_v19 }
 0x7fb   :  { %v2256_v8 = vpop.f32.mrf.mxu0 }
 0x7fc   :  { %v2290_v25 = vpack.c.bf16 %v2256_v8, %v2254_v20 }
 0x7fd   :  { %v2460_v45 = vpop.f32.mrf.mxu1 }
 0x7fe   :  { %v2494_v27 = vpack.c.bf16 %v2460_v45, %v2458_v21  ;;  %6237 = vmatmul.msk.bf16.gmra.mxu3 %vm2509_vm8, %v2290_v25 }
 0x800   :  { %6221 = vmatmul.msk.bf16.gmra.mxu2 %vm2509_vm8, %v2494_v27  ;;  %v7074_v27 = vld [vmem:[%s8933_s3 + $0x120] sm:$0xff] }
 0x803   :  { %v2856_v62 = vpop.f32.mrf.mxu0 }
 0x806   :  { %6323 = vmatmul.msk.bf16.gmra.mxu0 %vm2178_vm12, %v7069_v28 }
 0x80b   :  { %v2858_v22 = vpop.f32.mrf.mxu0 }
 0x80c   :  { %v2916_v11 = vpack.c.bf16 %v2858_v22, %v2856_v62 }
 0x80e   :  { %6238 = vmatmul.msk.bf16.gmra.mxu3 %vm2509_vm8, %v2291_v29  ;;  %6333 = vmatmul.msk.bf16.vlgmr.msra.gmra.mxu1 %vm2509_vm8, %v2916_v11  ;;  %v7089_v29 = vld [vmem:[%s8933_s3 + $0x190] sm:$0xff] }
 0x810   :  { %6222 = vmatmul.msk.bf16.gmra.mxu2 %vm2509_vm8, %v2495_v30 }
 0x813   :  { %v2861_v33 = vpop.f32.mrf.mxu0 }
 0x816   :  { %6324 = vmatmul.msk.bf16.gmra.mxu0 %vm2178_vm12, %v7070_v24 }
 0x81b   :  { %v2863_v35 = vpop.f32.mrf.mxu0 }
 0x81c   :  { %v2917_v49 = vpack.c.bf16 %v2863_v35, %v2861_v33 }
 0x81e   :  { %6239 = vmatmul.msk.bf16.gmra.mxu3 %vm2509_vm8, %v2292_v47  ;;  %6334 = vmatmul.msk.bf16.gmra.mxu1 %vm2509_vm8, %v2917_v49 }
 0x820   :  { %6223 = vmatmul.msk.bf16.gmra.mxu2 %vm2509_vm8, %v2496_v48  ;;  %v7076_v48 = vld [vmem:[%s8933_s3 + $0x130] sm:$0xff] }
 0x821   :  { %v2666_v50 = vpop.f32.mrf.mxu3 }
 0x823   :  { %v2555_v46 = vpop.f32.mrf.mxu2  ;;  %v2866_v38 = vpop.f32.mrf.mxu0 }
 0x824   :  { %v8065_v36 = vadd.f32 %v2666_v50, %v2555_v46 }
 0x826   :  { %6325 = vmatmul.msk.bf16.gmra.mxu0 %vm2178_vm12, %v7071_v37 }
 0x829   :  { %v8071_v41 = vpop.f32.mrf.mxu3 }
 0x82b   :  { %v8073_v26 = vpop.f32.mrf.mxu2  ;;  %v2868_v42 = vpop.f32.mrf.mxu0 }
 0x82c   :  { %v2918_v52 = vpack.c.bf16 %v2868_v42, %v2866_v38  ;;  %v7091_v42 = vld [vmem:[%s8933_s3 + $0x1a0] sm:$0xff] }
 0x82e   :  { %6240 = vmatmul.msk.bf16.gmra.mxu3 %vm2509_vm8, %v2293_v43  ;;  %6335 = vmatmul.msk.bf16.gmra.mxu1 %vm2509_vm8, %v2918_v52 }
 0x830   :  { %6224 = vmatmul.msk.bf16.gmra.mxu2 %vm2509_vm8, %v2497_v51 }
 0x831   :  { %v2671_v55 = vpop.f32.mrf.mxu3 }
 0x833   :  { %v2560_v53 = vpop.f32.mrf.mxu2  ;;  %v2871_v59 = vpop.f32.mrf.mxu0 }
 0x834   :  { %v8078_v56 = vadd.f32 %v2671_v55, %v2560_v53  ;;  %v7077_v53 = vld [vmem:[%s8933_s3 + $0x138] sm:$0xff] }
 0x836   :  { %6326 = vmatmul.msk.bf16.gmra.mxu0 %vm2178_vm12, %v7072_v57 }
 0x839   :  { %v8089_v63 = vpop.f32.mrf.mxu3 }
 0x83b   :  { %v8087_v60 = vpop.f32.mrf.mxu2  ;;  %v2873_v0 = vpop.f32.mrf.mxu0 }
 0x83c   :  { %v2919_v3 = vpack.c.bf16 %v2873_v0, %v2871_v59 }
 0x83e   :  { %6241 = vmatmul.msk.bf16.gmra.mxu3 %vm2509_vm8, %v2294_v1  ;;  %6336 = vmatmul.msk.bf16.gmra.mxu1 %vm2509_vm8, %v2919_v3  ;;  %v2669_v3 = vadd.f32 %v8071_v41, %v8073_v26 }
 0x840   :  { %6225 = vmatmul.msk.bf16.gmra.mxu2 %vm2509_vm8, %v2498_v2  ;;  %v7092_v2 = vld [vmem:[%s8933_s3 + $0x1a8] sm:$0xff] }
 0x841   :  { %v2676_v5 = vpop.f32.mrf.mxu3 }
 0x843   :  { %v2565_v4 = vpop.f32.mrf.mxu2  ;;  %v2876_v10 = vpop.f32.mrf.mxu0 }
 0x844   :  { %v8099_v6 = vadd.f32 %v2676_v5, %v2565_v4 }
 0x846   :  { %6519 = vmatmul.msk.bf16.vlgmr.msrb.gmra.mxu0 %vm2178_vm12, %v7087_v9 }
 0x847   :  { %4892 = vmatpush.bf16.msrb.mxu0 %v7847_v44 }
 0x849   :  { %v8108_v13 = vpop.f32.mrf.mxu3 }
 0x84b   :  { %v8106_v12 = vpop.f32.mrf.mxu2  ;;  %4893 = vmatpush.bf16.msrb.mxu0 %v7853_v54  ;;  %v2878_v14 = vpop.f32.mrf.mxu0 }
 0x84c   :  { %v2920_v19 = vpack.c.bf16 %v2878_v14, %v2876_v10  ;;  %v7078_v14 = vld [vmem:[%s8933_s3 + $0x140] sm:$0xff] }
 0x84e   :  { %6242 = vmatmul.msk.bf16.gmra.mxu3 %vm2509_vm8, %v2295_v15  ;;  %6337 = vmatmul.msk.bf16.gmra.mxu1 %vm2509_vm8, %v2920_v19 }
 0x84f   :  { %4894 = vmatpush.bf16.msrb.mxu0 %v7859_v40 }
 0x850   :  { %6226 = vmatmul.msk.bf16.gmra.mxu2 %vm2509_vm8, %v2499_v16 }
 0x851   :  { %v2681_v21 = vpop.f32.mrf.mxu3 }
 0x853   :  { %v2570_v20 = vpop.f32.mrf.mxu2  ;;  %v2881_v8 = vpop.f32.mrf.mxu0 }
 0x854   :  { %v8117_v23 = vadd.f32 %v2681_v21, %v2570_v20 }
 0x856   :  { %6520 = vmatmul.msk.bf16.gmra.mxu0 %vm2178_vm12, %v7088_v7  ;;  %v7093_v7 = vld [vmem:[%s8933_s3 + $0x1b0] sm:$0xff] }
 0x859   :  { %v8125_v25 = vpop.f32.mrf.mxu3 }
 0x85b   :  { %v8123_v45 = vpop.f32.mrf.mxu2  ;;  %v2883_v28 = vpop.f32.mrf.mxu0 }
 0x85c   :  { %v2921_v61 = vpack.c.bf16 %v2883_v28, %v2881_v8  ;;  %v2674_v8 = vadd.f32 %v8089_v63, %v8087_v60 }
 0x85e   :  { %6338 = vmatmul.msk.bf16.gmra.mxu1 %vm2509_vm8, %v2921_v61 }
 0x860   :  { %6417 = vmatmul.msk.bf16.vlgmr.msrb.gmra.mxu2 %vm2178_vm12, %v7074_v27 }
 0x861   :  { %4552 = vmatpush.bf16.msrb.mxu2 %v7847_v44  ;;  %v2686_v17 = vpop.f32.mrf.mxu3  ;;  %v7075_v44 = vld [vmem:[%s8933_s3 + $0x128] sm:$0xff] }
 0x863   :  { %v2575_v62 = vpop.f32.mrf.mxu2  ;;  %v2886_v30 = vpop.f32.mrf.mxu0 }
 0x864   :  { %v8133_v22 = vadd.f32 %v2686_v17, %v2575_v62  ;;  %v7079_v17 = vld [vmem:[%s8933_s3 + $0x148] sm:$0xff] }
 0x865   :  { %4553 = vmatpush.bf16.msrb.mxu2 %v7853_v54 }
 0x866   :  { %6521 = vmatmul.msk.bf16.gmra.mxu0 %vm2178_vm12, %v7089_v29 }
 0x869   :  { %4554 = vmatpush.bf16.msrb.mxu2 %v7859_v40  ;;  %v8143_v31 = vpop.f32.mrf.mxu3  ;;  %v7090_v40 = vld [vmem:[%s8933_s3 + $0x198] sm:$0xff] }
 0x86b   :  { %v8141_v11 = vpop.f32.mrf.mxu2  ;;  %v2888_v32 = vpop.f32.mrf.mxu0 }
 0x86c   :  { %v2922_v24 = vpack.c.bf16 %v2888_v32, %v2886_v30 }
 0x86e   :  { %6339 = vmatmul.msk.bf16.gmra.mxu1 %vm2509_vm8, %v2922_v24 }
 0x870   :  { %6418 = vmatmul.msk.bf16.gmra.mxu2 %vm2178_vm12, %v7075_v44 }
 0x871   :  { %v2691_v33 = vpop.f32.mrf.mxu3 }
 0x873   :  { %v2580_v54 = vpop.f32.mrf.mxu2  ;;  %v2891_v18 = vpop.f32.mrf.mxu0 }
 0x874   :  { %v8150_v34 = vadd.f32 %v2691_v33, %v2580_v54  ;;  %v7094_v54 = vld [vmem:[%s8933_s3 + $0x1b8] sm:$0xff]  ;;  %v2679_v33 = vadd.f32 %v8108_v13, %v8106_v12 }
 0x876   :  { %6522 = vmatmul.msk.bf16.gmra.mxu0 %vm2178_vm12, %v7090_v40 }
 0x879   :  { %v8158_v47 = vpop.f32.mrf.mxu3 }
 0x87b   :  { %v8156_v35 = vpop.f32.mrf.mxu2  ;;  %v2893_v49 = vpop.f32.mrf.mxu0 }
 0x87c   :  { %v2923_v50 = vpack.c.bf16 %v2893_v49, %v2891_v18 }
 0x87e   :  { %6340 = vmatmul.msk.bf16.gmra.mxu1 %vm2509_vm8, %v2923_v50  ;;  %v7080_v50 = vld [vmem:[%s8933_s3 + $0x150] sm:$0xff] }
 0x880   :  { %6419 = vmatmul.msk.bf16.gmra.mxu2 %vm2178_vm12, %v7076_v48 }
 0x881   :  { %v2696_v37 = vpop.f32.mrf.mxu3 }
 0x883   :  { %v2585_v46 = vpop.f32.mrf.mxu2  ;;  %v2896_v43 = vpop.f32.mrf.mxu0 }
 0x884   :  { %v8165_v38 = vadd.f32 %v2696_v37, %v2585_v46 }
 0x886   :  { %6523 = vmatmul.msk.bf16.gmra.mxu0 %vm2178_vm12, %v7091_v42 }
 0x889   :  { %v8173_v52 = vpop.f32.mrf.mxu3 }
 0x88b   :  { %v8171_v51 = vpop.f32.mrf.mxu2  ;;  %v2898_v55 = vpop.f32.mrf.mxu0 }
 0x88c   :  { %v2924_v57 = vpack.c.bf16 %v2898_v55, %v2896_v43  ;;  %v2982_v58 = vpop.f32.mrf.mxu1  ;;  %v7095_v55 = vld [vmem:[%s8933_s3 + $0x1c0] sm:$0xff] }
 0x88d   :  { %v8179_v59 = vadd.f32 %v2982_v58, %v8065_v36 }
 0x88e   :  { %6341 = vmatmul.msk.bf16.gmra.mxu1 %vm2509_vm8, %v2924_v57  ;;  %v2684_v57 = vadd.f32 %v8125_v25, %v8123_v45 }
 0x890   :  { %6420 = vmatmul.msk.bf16.gmra.mxu2 %vm2178_vm12, %v7077_v53 }
 0x891   :  { %v2701_v0 = vpop.f32.mrf.mxu3 }
 0x893   :  { %v2590_v39 = vpop.f32.mrf.mxu2  ;;  %v2901_v4 = vpop.f32.mrf.mxu0 }
 0x894   :  { %v8183_v1 = vadd.f32 %v2701_v0, %v2590_v39  ;;  %v2984_v5 = vpop.f32.mrf.mxu1 }
 0x895   :  { %v8190_v9 = vadd.f32 %v2984_v5, %v2669_v3  ;;  %v7081_v3 = vld [vmem:[%s8933_s3 + $0x158] sm:$0xff] }
 0x896   :  { %6524 = vmatmul.msk.bf16.gmra.mxu0 %vm2178_vm12, %v7092_v2 }
 0x899   :  { %v8195_v10 = vpop.f32.mrf.mxu3 }
 0x89b   :  { %v8193_v36 = vpop.f32.mrf.mxu2  ;;  %v2903_v15 = vpop.f32.mrf.mxu0 }
 0x89c   :  { %v2925_v16 = vpack.c.bf16 %v2903_v15, %v2901_v4  ;;  %v2987_v19 = vpop.f32.mrf.mxu1 }
 0x89d   :  { %v8201_v20 = vadd.f32 %v2987_v19, %v8078_v56  ;;  %v7096_v19 = vld [vmem:[%s8933_s3 + $0x1c8] sm:$0xff] }
 0x89e   :  { %6342 = vmatmul.msk.bf16.gmra.mxu1 %vm2509_vm8, %v2925_v16 }
 0x8a0   :  { %6421 = vmatmul.msk.bf16.gmra.mxu2 %vm2178_vm12, %v7078_v14 }
 0x8a1   :  { %v2706_v26 = vpop.f32.mrf.mxu3 }
 0x8a3   :  { %v2595_v41 = vpop.f32.mrf.mxu2  ;;  %v2906_v27 = vpop.f32.mrf.mxu0 }
 0x8a4   :  { %v8205_v21 = vadd.f32 %v2706_v26, %v2595_v41  ;;  %v2989_v28 = vpop.f32.mrf.mxu1  ;;  %v2689_v41 = vadd.f32 %v8143_v31, %v8141_v11  ;;  %v7097_v31 = vld [vmem:[%s8933_s3 + $0x1d0] sm:$0xff] }
 0x8a5   :  { %v8212_v61 = vadd.f32 %v2989_v28, %v2674_v8 }
 0x8a6   :  { %6525 = vmatmul.msk.bf16.gmra.mxu0 %vm2178_vm12, %v7093_v7 }
 0x8a9   :  { %v8217_v62 = vpop.f32.mrf.mxu3 }
 0x8ab   :  { %v8215_v56 = vpop.f32.mrf.mxu2  ;;  %v2908_v29 = vpop.f32.mrf.mxu0 }
 0x8ac   :  { %v2926_v30 = vpack.c.bf16 %v2908_v29, %v2906_v27  ;;  %v2992_v44 = vpop.f32.mrf.mxu1  ;;  %v7082_v27 = vld [vmem:[%s8933_s3 + $0x160] sm:$0xff] }
 0x8ad   :  { %v8223_v32 = vadd.f32 %v2992_v44, %v8099_v6  ;;  %v2694_v44 = vadd.f32 %v8158_v47, %v8156_v35  ;;  %v7112_v47 = vld [vmem:[%s8932_s6 + $0x28] sm:$0xff] }
 0x8ae   :  { %6343 = vmatmul.msk.bf16.gmra.mxu1 %vm2509_vm8, %v2926_v30  ;;  %4000 = vmatpush.bf16.msra.mxu3 %v7112_v47 }
 0x8b0   :  { %6422 = vmatmul.msk.bf16.gmra.mxu2 %vm2178_vm12, %v7079_v17 }
 0x8b1   :  { %v2711_v63 = vpop.f32.mrf.mxu3 }
 0x8b3   :  { %v2600_v60 = vpop.f32.mrf.mxu2  ;;  %v2911_v40 = vpop.f32.mrf.mxu0 }
 0x8b4   :  { %v8227_v24 = vadd.f32 %v2711_v63, %v2600_v60  ;;  %v2994_v18 = vpop.f32.mrf.mxu1 }
 0x8b5   :  { %v8234_v48 = vadd.f32 %v2994_v18, %v2679_v33 }
 0x8b6   :  { %6526 = vmatmul.msk.bf16.gmra.mxu0 %vm2178_vm12, %v7094_v54 }
 0x8b9   :  { %v8239_v49 = vpop.f32.mrf.mxu3 }
 0x8bb   :  { %v8237_v6 = vpop.f32.mrf.mxu2  ;;  %v2913_v46 = vpop.f32.mrf.mxu0 }
 0x8bc   :  { %v2927_v37 = vpack.c.bf16 %v2913_v46, %v2911_v40  ;;  %v2997_v42 = vpop.f32.mrf.mxu1  ;;  %v7083_v40 = vld [vmem:[%s8933_s3 + $0x168] sm:$0xff] }
 0x8bd   :  { %v8245_v43 = vadd.f32 %v2997_v42, %v8117_v23  ;;  %v7098_v42 = vld [vmem:[%s8933_s3 + $0x1d8] sm:$0xff] }
 0x8be   :  { %6344 = vmatmul.msk.bf16.gmra.mxu1 %vm2509_vm8, %v2927_v37 }
 0x8c0   :  { %6423 = vmatmul.msk.bf16.gmra.mxu2 %vm2178_vm12, %v7080_v50 }
 0x8c1   :  { %v2716_v13 = vpop.f32.mrf.mxu3 }
 0x8c3   :  { %v2605_v12 = vpop.f32.mrf.mxu2  ;;  %v3536_v58 = vpop.f32.mrf.mxu0 }
 0x8c4   :  { %v8249_v53 = vadd.f32 %v2716_v13, %v2605_v12  ;;  %v2999_v39 = vpop.f32.mrf.mxu1  ;;  %v2699_v12 = vadd.f32 %v8173_v52, %v8171_v51 }
 0x8c5   :  { %v8256_v0 = vadd.f32 %v2999_v39, %v2684_v57  ;;  %v7084_v39 = vld [vmem:[%s8933_s3 + $0x170] sm:$0xff] }
 0x8c6   :  { %6527 = vmatmul.msk.bf16.gmra.mxu0 %vm2178_vm12, %v7095_v55 }
 0x8c9   :  { %v8261_v2 = vpop.f32.mrf.mxu3 }
 0x8cb   :  { %v8259_v23 = vpop.f32.mrf.mxu2  ;;  %v3538_v4 = vpop.f32.mrf.mxu0 }
 0x8cc   :  { %v3002_v5 = vpop.f32.mrf.mxu1  ;;  %v3596_v14 = vpack.c.bf16 %v3538_v4, %v3536_v58 }
 0x8cd   :  { %v8267_v15 = vadd.f32 %v3002_v5, %v8133_v22 }
 0x8ce   :  { %6537 = vmatmul.msk.bf16.vlgmr.msrb.gmra.mxu1 %vm2509_vm8, %v3596_v14 }
 0x8d0   :  { %6424 = vmatmul.msk.bf16.gmra.mxu2 %vm2178_vm12, %v7081_v3  ;;  %v7125_v3 = vld [vmem:[%s8932_s6 + $0x30] sm:$0xff] }
 0x8d1   :  { %v2721_v25 = vpop.f32.mrf.mxu3  ;;  %4340 = vmatpush.bf16.msra.mxu1 %v7125_v3 }
 0x8d3   :  { %v2610_v45 = vpop.f32.mrf.mxu2  ;;  %v3541_v26 = vpop.f32.mrf.mxu0 }
 0x8d4   :  { %v8271_v16 = vadd.f32 %v2721_v25, %v2610_v45  ;;  %v3004_v7 = vpop.f32.mrf.mxu1  ;;  %v7113_v45 = vld [vmem:[%s8933_s3 + $0x240] sm:$0xff]  ;;  %v2704_v25 = vadd.f32 %v8195_v10, %v8193_v36  ;;  %v7114_v10 = vld [vmem:[%s8933_s3 + $0x248] sm:$0xff] }
 0x8d5   :  { %v8278_v8 = vadd.f32 %v3004_v7, %v2689_v41 }
 0x8d6   :  { %6528 = vmatmul.msk.bf16.gmra.mxu0 %vm2178_vm12, %v7096_v19 }
 0x8db   :  { %v8281_v22 = vpop.f32.mrf.mxu2  ;;  %v3543_v28 = vpop.f32.mrf.mxu0 }
 0x8dc   :  { %v3007_v17 = vpop.f32.mrf.mxu1  ;;  %v3597_v29 = vpack.c.bf16 %v3543_v28, %v3541_v26 }
 0x8dd   :  { %v8287_v30 = vadd.f32 %v3007_v17, %v8150_v34 }
 0x8de   :  { %6538 = vmatmul.msk.bf16.gmra.mxu1 %vm2509_vm8, %v3597_v29 }
 0x8e0   :  { %6425 = vmatmul.msk.bf16.gmra.mxu2 %vm2178_vm12, %v7082_v27  ;;  %v7085_v27 = vld [vmem:[%s8933_s3 + $0x178] sm:$0xff] }
 0x8e3   :  { %v3196_v11 = vpop.f32.mrf.mxu2  ;;  %v3546_v60 = vpop.f32.mrf.mxu0 }
 0x8e4   :  { %v3009_v63 = vpop.f32.mrf.mxu1 }
 0x8e5   :  { %v8296_v54 = vadd.f32 %v3009_v63, %v2694_v44 }
 0x8e6   :  { %6529 = vmatmul.msk.bf16.gmra.mxu0 %vm2178_vm12, %v7097_v31  ;;  %v2709_v31 = vadd.f32 %v8217_v62, %v8215_v56  ;;  %v7115_v62 = vld [vmem:[%s8933_s3 + $0x250] sm:$0xff] }
 0x8eb   :  { %v3198_v34 = vpop.f32.mrf.mxu2  ;;  %v3548_v18 = vpop.f32.mrf.mxu0 }
 0x8ec   :  { %v3256_v33 = vpack.c.bf16 %v3198_v34, %v3196_v11  ;;  %v3012_v50 = vpop.f32.mrf.mxu1  ;;  %v3598_v46 = vpack.c.bf16 %v3548_v18, %v3546_v60 }
 0x8ed   :  { %v8304_v37 = vadd.f32 %v3012_v50, %v8165_v38 }
 0x8ee   :  { %6435 = vmatmul.msk.bf16.vlgmr.msrb.gmra.mxu3 %vm2509_vm8, %v3256_v33  ;;  %6539 = vmatmul.msk.bf16.gmra.mxu1 %vm2509_vm8, %v3598_v46  ;;  %v7100_v33 = vld [vmem:[%s8933_s3 + $0x1e0] sm:$0xff] }
 0x8f0   :  { %6426 = vmatmul.msk.bf16.gmra.mxu2 %vm2178_vm12, %v7083_v40 }
 0x8f3   :  { %v3201_v35 = vpop.f32.mrf.mxu2  ;;  %v3551_v13 = vpop.f32.mrf.mxu0 }
 0x8f4   :  { %v3014_v38 = vpop.f32.mrf.mxu1 }
 0x8f5   :  { %v8316_v55 = vadd.f32 %v3014_v38, %v2699_v12  ;;  %v7101_v38 = vld [vmem:[%s8933_s3 + $0x1e8] sm:$0xff] }
 0x8f6   :  { %6530 = vmatmul.msk.bf16.gmra.mxu0 %vm2178_vm12, %v7098_v42 }
 0x8fb   :  { %v3203_v57 = vpop.f32.mrf.mxu2  ;;  %v3553_v4 = vpop.f32.mrf.mxu0 }
 0x8fc   :  { %v3257_v58 = vpack.c.bf16 %v3203_v57, %v3201_v35  ;;  %v3017_v5 = vpop.f32.mrf.mxu1  ;;  %v3599_v51 = vpack.c.bf16 %v3553_v4, %v3551_v13  ;;  %v2714_v35 = vadd.f32 %v8239_v49, %v8237_v6  ;;  %v7116_v49 = vld [vmem:[%s8933_s3 + $0x258] sm:$0xff]  ;;  %v2719_v4 = vadd.f32 %v8261_v2, %v8259_v23  ;;  %v2723_v23 = vpop.f32.mrf.mxu3 }
 0x8fd   :  { %v8327_v52 = vadd.f32 %v3017_v5, %v8183_v1 }
 0x8fe   :  { %6436 = vmatmul.msk.bf16.gmra.mxu3 %vm2509_vm8, %v3257_v58  ;;  %6540 = vmatmul.msk.bf16.gmra.mxu1 %vm2509_vm8, %v3599_v51 }
 0x900   :  { %6427 = vmatmul.msk.bf16.gmra.mxu2 %vm2178_vm12, %v7084_v39 }
 0x903   :  { %v3206_v14 = vpop.f32.mrf.mxu2  ;;  %v3556_v19 = vpop.f32.mrf.mxu0 }
 0x904   :  { %v3019_v41 = vpop.f32.mrf.mxu1 }
 0x905   :  { %v8336_v26 = vadd.f32 %v3019_v41, %v2704_v25  ;;  %v7102_v25 = vld [vmem:[%s8933_s3 + $0x1f0] sm:$0xff] }
 0x906   :  { %6723 = vmatmul.msk.bf16.vlgmr.msra.gmra.mxu0 %vm2178_vm12, %v7113_v45 }
 0x90b   :  { %v3208_v1 = vpop.f32.mrf.mxu2  ;;  %v3558_v28 = vpop.f32.mrf.mxu0 }
 0x90c   :  { %v3258_v7 = vpack.c.bf16 %v3208_v1, %v3206_v14  ;;  %v3022_v17 = vpop.f32.mrf.mxu1  ;;  %v3600_v29 = vpack.c.bf16 %v3558_v28, %v3556_v19  ;;  %v2724_v28 = vadd.f32 %v2723_v23, %v8281_v22 }
 0x90d   :  { %v8344_v11 = vadd.f32 %v3022_v17, %v8205_v21 }
 0x90e   :  { %6437 = vmatmul.msk.bf16.gmra.mxu3 %vm2509_vm8, %v3258_v7  ;;  %6541 = vmatmul.msk.bf16.gmra.mxu1 %vm2509_vm8, %v3600_v29 }
 0x910   :  { %6428 = vmatmul.msk.bf16.gmra.mxu2 %vm2178_vm12, %v7085_v27  ;;  %v7117_v27 = vld [vmem:[%s8933_s3 + $0x260] sm:$0xff] }
 0x913   :  { %v3211_v36 = vpop.f32.mrf.mxu2  ;;  %v3561_v44 = vpop.f32.mrf.mxu0 }
 0x914   :  { %v3024_v60 = vpop.f32.mrf.mxu1 }
 0x915   :  { %v8353_v63 = vadd.f32 %v3024_v60, %v2709_v31  ;;  %v7103_v31 = vld [vmem:[%s8933_s3 + $0x1f8] sm:$0xff] }
 0x916   :  { %6724 = vmatmul.msk.bf16.gmra.mxu0 %vm2178_vm12, %v7114_v10 }
 0x91b   :  { %v3213_v21 = vpop.f32.mrf.mxu2  ;;  %v3563_v40 = vpop.f32.mrf.mxu0 }
 0x91c   :  { %v3259_v34 = vpack.c.bf16 %v3213_v21, %v3211_v36  ;;  %v3027_v18 = vpop.f32.mrf.mxu1  ;;  %v3601_v50 = vpack.c.bf16 %v3563_v40, %v3561_v44 }
 0x91d   :  { %v8361_v46 = vadd.f32 %v3027_v18, %v8227_v24 }
 0x91e   :  { %6438 = vmatmul.msk.bf16.gmra.mxu3 %vm2509_vm8, %v3259_v34  ;;  %6542 = vmatmul.msk.bf16.gmra.mxu1 %vm2509_vm8, %v3601_v50  ;;  %v7118_v34 = vld [vmem:[%s8933_s3 + $0x268] sm:$0xff] }
 0x920   :  { %6621 = vmatmul.msk.bf16.vlgmr.msra.gmra.mxu2 %vm2178_vm12, %v7100_v33 }
 0x923   :  { %v3216_v56 = vpop.f32.mrf.mxu2  ;;  %v3566_v47 = vpop.f32.mrf.mxu0 }
 0x924   :  { %v3029_v42 = vpop.f32.mrf.mxu1 }
 0x925   :  { %v8370_v12 = vadd.f32 %v3029_v42, %v2714_v35 }
 0x926   :  { %6725 = vmatmul.msk.bf16.gmra.mxu0 %vm2178_vm12, %v7115_v62 }
 0x92b   :  { %v3218_v24 = vpop.f32.mrf.mxu2  ;;  %v3568_v57 = vpop.f32.mrf.mxu0 }
 0x92c   :  { %v3260_v13 = vpack.c.bf16 %v3218_v24, %v3216_v56  ;;  %v3032_v58 = vpop.f32.mrf.mxu1  ;;  %v3602_v39 = vpack.c.bf16 %v3568_v57, %v3566_v47  ;;  %v7104_v56 = vld [vmem:[%s8933_s3 + $0x200] sm:$0xff]  ;;  %v7119_v24 = vld [vmem:[%s8933_s3 + $0x270] sm:$0xff] }
 0x92d   :  { %v8378_v3 = vadd.f32 %v3032_v58, %v8249_v53 }
 0x92e   :  { %6439 = vmatmul.msk.bf16.gmra.mxu3 %vm2509_vm8, %v3260_v13  ;;  %6543 = vmatmul.msk.bf16.gmra.mxu1 %vm2509_vm8, %v3602_v39  ;;  %v7105_v39 = vld [vmem:[%s8933_s3 + $0x208] sm:$0xff] }
 0x930   :  { %6622 = vmatmul.msk.bf16.gmra.mxu2 %vm2178_vm12, %v7101_v38 }
 0x933   :  { %v3221_v6 = vpop.f32.mrf.mxu2  ;;  %v3571_v5 = vpop.f32.mrf.mxu0 }
 0x934   :  { %v3034_v51 = vpop.f32.mrf.mxu1 }
 0x935   :  { %v8387_v14 = vadd.f32 %v3034_v51, %v2719_v4 }
 0x936   :  { %6726 = vmatmul.msk.bf16.gmra.mxu0 %vm2178_vm12, %v7116_v49 }
 0x93b   :  { %v3223_v53 = vpop.f32.mrf.mxu2  ;;  %v3573_v19 = vpop.f32.mrf.mxu0 }
 0x93c   :  { %v3261_v45 = vpack.c.bf16 %v3223_v53, %v3221_v6  ;;  %v3037_v41 = vpop.f32.mrf.mxu1  ;;  %v3603_v1 = vpack.c.bf16 %v3573_v19, %v3571_v5 }
 0x93d   :  { %v8395_v7 = vadd.f32 %v3037_v41, %v8271_v16 }
 0x93e   :  { %6440 = vmatmul.msk.bf16.gmra.mxu3 %vm2509_vm8, %v3261_v45  ;;  %6544 = vmatmul.msk.bf16.gmra.mxu1 %vm2509_vm8, %v3603_v1 }
 0x940   :  { %6623 = vmatmul.msk.bf16.gmra.mxu2 %vm2178_vm12, %v7102_v25  ;;  %v7120_v25 = vld [vmem:[%s8933_s3 + $0x278] sm:$0xff] }
 0x943   :  { %v3226_v2 = vpop.f32.mrf.mxu2  ;;  %v3576_v17 = vpop.f32.mrf.mxu0 }
 0x944   :  { %v3039_v29 = vpop.f32.mrf.mxu1 }
 0x945   :  { %v8403_v36 = vadd.f32 %v3039_v29, %v2724_v28 }
 0x946   :  { %6727 = vmatmul.msk.bf16.gmra.mxu0 %vm2178_vm12, %v7117_v27 }
 0x94b   :  { %v3228_v16 = vpop.f32.mrf.mxu2  ;;  %v3578_v44 = vpop.f32.mrf.mxu0 }
 0x94c   :  { %v3262_v10 = vpack.c.bf16 %v3228_v16, %v3226_v2  ;;  %v3604_v60 = vpack.c.bf16 %v3578_v44, %v3576_v17  ;;  %v3662_v21 = vpop.f32.mrf.mxu1 }
 0x94e   :  { %6441 = vmatmul.msk.bf16.gmra.mxu3 %vm2509_vm8, %v3262_v10  ;;  %6545 = vmatmul.msk.bf16.gmra.mxu1 %vm2509_vm8, %v3604_v60  ;;  %v7121_v60 = vld [vmem:[%s8933_s3 + $0x280] sm:$0xff] }
 0x950   :  { %6624 = vmatmul.msk.bf16.gmra.mxu2 %vm2178_vm12, %v7103_v31 }
 0x953   :  { %v3231_v22 = vpop.f32.mrf.mxu2  ;;  %v3581_v33 = vpop.f32.mrf.mxu0 }
 0x954   :  { %v3664_v40 = vpop.f32.mrf.mxu1 }
 0x956   :  { %6728 = vmatmul.msk.bf16.gmra.mxu0 %vm2178_vm12, %v7118_v34 }
 0x95b   :  { %v3233_v18 = vpop.f32.mrf.mxu2  ;;  %v3583_v62 = vpop.f32.mrf.mxu0 }
 0x95c   :  { %v3263_v50 = vpack.c.bf16 %v3233_v18, %v3231_v22  ;;  %v3605_v35 = vpack.c.bf16 %v3583_v62, %v3581_v33  ;;  %v3667_v47 = vpop.f32.mrf.mxu1 }
 0x95e   :  { %6442 = vmatmul.msk.bf16.gmra.mxu3 %vm2509_vm8, %v3263_v50  ;;  %6546 = vmatmul.msk.bf16.gmra.mxu1 %vm2509_vm8, %v3605_v35 }
 0x960   :  { %6625 = vmatmul.msk.bf16.gmra.mxu2 %vm2178_vm12, %v7104_v56 }
 0x963   :  { %v3236_v42 = vpop.f32.mrf.mxu2  ;;  %v3586_v13 = vpop.f32.mrf.mxu0 }
 0x964   :  { %v3669_v38 = vpop.f32.mrf.mxu1 }
 0x966   :  { %6729 = vmatmul.msk.bf16.gmra.mxu0 %vm2178_vm12, %v7119_v24 }
 0x96b   :  { %v3238_v57 = vpop.f32.mrf.mxu2  ;;  %v3588_v6 = vpop.f32.mrf.mxu0 }
 0x96c   :  { %v3264_v58 = vpack.c.bf16 %v3238_v57, %v3236_v42  ;;  %v3606_v49 = vpack.c.bf16 %v3588_v6, %v3586_v13  ;;  %v3672_v4 = vpop.f32.mrf.mxu1  ;;  %v7122_v13 = vld [vmem:[%s8933_s3 + $0x288] sm:$0xff] }
 0x96e   :  { %6443 = vmatmul.msk.bf16.gmra.mxu3 %vm2509_vm8, %v3264_v58  ;;  %6547 = vmatmul.msk.bf16.gmra.mxu1 %vm2509_vm8, %v3606_v49 }
 0x970   :  { %6626 = vmatmul.msk.bf16.gmra.mxu2 %vm2178_vm12, %v7105_v39 }
 0x971   :  { %v3322_v5 = vpop.f32.mrf.mxu3 }
 0x972   :  { %v3382_v51 = vadd.f32 %v3322_v5, %v8179_v59  ;;  %v7106_v59 = vld [vmem:[%s8933_s3 + $0x210] sm:$0xff] }
 0x973   :  { %v3241_v53 = vpop.f32.mrf.mxu2  ;;  %v3591_v19 = vpop.f32.mrf.mxu0 }
 0x974   :  { %v8433_v45 = vadd.f32 %v3662_v21, %v3382_v51  ;;  %v3674_v41 = vpop.f32.mrf.mxu1 }
 0x976   :  { %6730 = vmatmul.msk.bf16.gmra.mxu0 %vm2178_vm12, %v7120_v25 }
 0x979   :  { %v3324_v1 = vpop.f32.mrf.mxu3 }
 0x97a   :  { %v3383_v23 = vadd.f32 %v3324_v1, %v8190_v9 }
 0x97b   :  { %v3243_v2 = vpop.f32.mrf.mxu2  ;;  %v3593_v17 = vpop.f32.mrf.mxu0 }
 0x97c   :  { %v3265_v27 = vpack.c.bf16 %v3243_v2, %v3241_v53  ;;  %v8440_v28 = vadd.f32 %v3664_v40, %v3383_v23  ;;  %v3607_v29 = vpack.c.bf16 %v3593_v17, %v3591_v19  ;;  %v3677_v16 = vpop.f32.mrf.mxu1 }
 0x97e   :  { %6444 = vmatmul.msk.bf16.gmra.mxu3 %vm2509_vm8, %v3265_v27  ;;  %6548 = vmatmul.msk.bf16.gmra.mxu1 %vm2509_vm8, %v3607_v29 }
 0x980   :  { %6627 = vmatmul.msk.bf16.gmra.mxu2 %vm2178_vm12, %v7106_v59 }
 0x981   :  { %v3327_v10 = vpop.f32.mrf.mxu3 }
 0x982   :  { %v3384_v9 = vadd.f32 %v3327_v10, %v8201_v20  ;;  %v7107_v20 = vld [vmem:[%s8933_s3 + $0x218] sm:$0xff] }
 0x983   :  { %v3246_v31 = vpop.f32.mrf.mxu2  ;;  %v4216_v21 = vpop.f32.mrf.mxu0 }
 0x984   :  { %v8449_v44 = vadd.f32 %v3667_v47, %v3384_v9  ;;  %v3679_v22 = vpop.f32.mrf.mxu1 }
 0x986   :  { %6731 = vmatmul.msk.bf16.gmra.mxu0 %vm2178_vm12, %v7121_v60 }
 0x989   :  { %v3329_v34 = vpop.f32.mrf.mxu3 }
 0x98a   :  { %v3385_v33 = vadd.f32 %v3329_v34, %v8212_v61  ;;  %v7138_v34 = vld [vmem:[%s8932_s6 + $0x38] sm:$0xff] }
 0x98b   :  { %v3248_v40 = vpop.f32.mrf.mxu2  ;;  %v4218_v56 = vpop.f32.mrf.mxu0  ;;  %4680 = vmatpush.bf16.msrb.mxu3 %v7138_v34 }
 0x98c   :  { %v3266_v18 = vpack.c.bf16 %v3248_v40, %v3246_v31  ;;  %v8456_v50 = vadd.f32 %v3669_v38, %v3385_v33  ;;  %v3682_v62 = vpop.f32.mrf.mxu1  ;;  %v4276_v35 = vpack.c.bf16 %v4218_v56, %v4216_v21  ;;  %v7124_v33 = vld [vmem:[%s8933_s3 + $0x298] sm:$0xff] }
 0x98e   :  { %6445 = vmatmul.msk.bf16.gmra.mxu3 %vm2509_vm8, %v3266_v18  ;;  %6741 = vmatmul.msk.bf16.vlgmr.msra.gmra.mxu1 %vm2509_vm8, %v4276_v35 }
 0x990   :  { %6628 = vmatmul.msk.bf16.gmra.mxu2 %vm2178_vm12, %v7107_v20 }
 0x991   :  { %v3332_v47 = vpop.f32.mrf.mxu3 }
 0x992   :  { %v3386_v61 = vadd.f32 %v3332_v47, %v8223_v32  ;;  %v7108_v32 = vld [vmem:[%s8933_s3 + $0x220] sm:$0xff]  ;;  %v7110_v47 = vld [vmem:[%s8933_s3 + $0x230] sm:$0xff] }
 0x993   :  { %v3251_v42 = vpop.f32.mrf.mxu2  ;;  %v4221_v38 = vpop.f32.mrf.mxu0 }
 0x994   :  { %v8465_v24 = vadd.f32 %v3672_v4, %v3386_v61  ;;  %v3684_v57 = vpop.f32.mrf.mxu1  ;;  %v7151_v61 = vld [vmem:[%s8932_s6 + $0x40] sm:$0xff] }
 0x995   :  { %5020 = vmatpush.bf16.msrb.mxu1 %v7151_v61 }
 0x996   :  { %6732 = vmatmul.msk.bf16.gmra.mxu0 %vm2178_vm12, %v7122_v13 }
 0x999   :  { %v3334_v58 = vpop.f32.mrf.mxu3 }
 0x99a   :  { %v3387_v39 = vadd.f32 %v3334_v58, %v8234_v48 }
 0x99b   :  { %v3253_v6 = vpop.f32.mrf.mxu2  ;;  %v4223_v4 = vpop.f32.mrf.mxu0 }
 0x99c   :  { %v3267_v49 = vpack.c.bf16 %v3253_v6, %v3251_v42  ;;  %v8472_v5 = vadd.f32 %v3674_v41, %v3387_v39  ;;  %v3687_v51 = vpop.f32.mrf.mxu1  ;;  %v4277_v53 = vpack.c.bf16 %v4223_v4, %v4221_v38  ;;  %v7123_v41 = vld [vmem:[%s8933_s3 + $0x290] sm:$0xff]  ;;  %v7139_v6 = vld [vmem:[%s8933_s3 + $0x300] sm:$0xff] }
 0x99e   :  { %6446 = vmatmul.msk.bf16.gmra.mxu3 %vm2509_vm8, %v3267_v49  ;;  %6742 = vmatmul.msk.bf16.gmra.mxu1 %vm2509_vm8, %v4277_v53 }
 0x9a0   :  { %6629 = vmatmul.msk.bf16.gmra.mxu2 %vm2178_vm12, %v7108_v32 }
 0x9a1   :  { %v3337_v25 = vpop.f32.mrf.mxu3 }
 0x9a2   :  { %v3388_v48 = vadd.f32 %v3337_v25, %v8245_v43  ;;  %v7109_v43 = vld [vmem:[%s8933_s3 + $0x228] sm:$0xff] }
 0x9a3   :  { %v3876_v19 = vpop.f32.mrf.mxu2  ;;  %v4226_v23 = vpop.f32.mrf.mxu0 }
 0x9a4   :  { %v8481_v1 = vadd.f32 %v3677_v16, %v3388_v48  ;;  %v3689_v2 = vpop.f32.mrf.mxu1 }
 0x9a6   :  { %6733 = vmatmul.msk.bf16.gmra.mxu0 %vm2178_vm12, %v7123_v41 }
 0x9a9   :  { %v3339_v27 = vpop.f32.mrf.mxu3 }
 0x9aa   :  { %v3389_v59 = vadd.f32 %v3339_v27, %v8256_v0 }
 0x9ab   :  { %v3878_v17 = vpop.f32.mrf.mxu2  ;;  %v4228_v16 = vpop.f32.mrf.mxu0 }
 0x9ac   :  { %v8488_v29 = vadd.f32 %v3679_v22, %v3389_v59  ;;  %v3936_v10 = vpack.c.bf16 %v3878_v17, %v3876_v19  ;;  %v3692_v9 = vpop.f32.mrf.mxu1  ;;  %v4278_v31 = vpack.c.bf16 %v4228_v16, %v4226_v23  ;;  %v7140_v17 = vld [vmem:[%s8933_s3 + $0x308] sm:$0xff] }
 0x9ae   :  { %6639 = vmatmul.msk.bf16.vlgmr.msra.gmra.mxu3 %vm2509_vm8, %v3936_v10  ;;  %6743 = vmatmul.msk.bf16.gmra.mxu1 %vm2509_vm8, %v4278_v31 }
 0x9b0   :  { %6630 = vmatmul.msk.bf16.gmra.mxu2 %vm2178_vm12, %v7109_v43 }
 0x9b1   :  { %v3342_v60 = vpop.f32.mrf.mxu3 }
 0x9b2   :  { %v3390_v0 = vadd.f32 %v3342_v60, %v8267_v15 }
 0x9b3   :  { %v3881_v21 = vpop.f32.mrf.mxu2  ;;  %v4231_v40 = vpop.f32.mrf.mxu0 }
 0x9b4   :  { %v8497_v22 = vadd.f32 %v3682_v62, %v3390_v0  ;;  %v3694_v18 = vpop.f32.mrf.mxu1 }
 0x9b6   :  { %6734 = vmatmul.msk.bf16.gmra.mxu0 %vm2178_vm12, %v7124_v33 }
 0x9b9   :  { %v3344_v20 = vpop.f32.mrf.mxu3 }
 0x9ba   :  { %v3391_v56 = vadd.f32 %v3344_v20, %v8278_v8 }
 0x9bb   :  { %v3883_v15 = vpop.f32.mrf.mxu2  ;;  %v4233_v42 = vpop.f32.mrf.mxu0 }
 0x9bc   :  { %v8507_v35 = vadd.f32 %v3684_v57, %v3391_v56  ;;  %v3937_v62 = vpack.c.bf16 %v3883_v15, %v3881_v21  ;;  %v3697_v13 = vpop.f32.mrf.mxu1  ;;  %v4279_v38 = vpack.c.bf16 %v4233_v42, %v4231_v40  ;;  %v7141_v56 = vld [vmem:[%s8933_s3 + $0x310] sm:$0xff] }
 0x9be   :  { %6640 = vmatmul.msk.bf16.gmra.mxu3 %vm2509_vm8, %v3937_v62  ;;  %6744 = vmatmul.msk.bf16.gmra.mxu1 %vm2509_vm8, %v4279_v38 }
 0x9c0   :  { %6631 = vmatmul.msk.bf16.gmra.mxu2 %vm2178_vm12, %v7110_v47 }
 0x9c1   :  { %v3347_v8 = vpop.f32.mrf.mxu3 }
 0x9c2   :  { %v3392_v57 = vadd.f32 %v3347_v8, %v8287_v30  ;;  %v7111_v30 = vld [vmem:[%s8933_s3 + $0x238] sm:$0xff] }
 0x9c3   :  { %v3886_v58 = vpop.f32.mrf.mxu2  ;;  %v4236_v49 = vpop.f32.mrf.mxu0 }
 0x9c4   :  { %v8519_v39 = vadd.f32 %v3687_v51, %v3392_v57  ;;  %v3699_v32 = vpop.f32.mrf.mxu1 }
 0x9c6   :  { %6927 = vmatmul.msk.bf16.vlgmr.msrb.gmra.mxu0 %vm2178_vm12, %v7139_v6 }
 0x9c9   :  { %v3349_v4 = vpop.f32.mrf.mxu3 }
 0x9ca   :  { %v3393_v53 = vadd.f32 %v3349_v4, %v8296_v54  ;;  %v7142_v4 = vld [vmem:[%s8933_s3 + $0x318] sm:$0xff] }
 0x9cb   :  { %v3888_v25 = vpop.f32.mrf.mxu2  ;;  %v4238_v51 = vpop.f32.mrf.mxu0 }
 0x9cc   :  { %v8526_v48 = vadd.f32 %v3689_v2, %v3393_v53  ;;  %v3938_v19 = vpack.c.bf16 %v3888_v25, %v3886_v58  ;;  %v3702_v41 = vpop.f32.mrf.mxu1  ;;  %v4280_v23 = vpack.c.bf16 %v4238_v51, %v4236_v49 }
 0x9ce   :  { %6641 = vmatmul.msk.bf16.gmra.mxu3 %vm2509_vm8, %v3938_v19  ;;  %6745 = vmatmul.msk.bf16.gmra.mxu1 %vm2509_vm8, %v4280_v23 }
 0x9d0   :  { %6632 = vmatmul.msk.bf16.gmra.mxu2 %vm2178_vm12, %v7111_v30 }
 0x9d1   :  { %v3352_v27 = vpop.f32.mrf.mxu3 }
 0x9d2   :  { %v3394_v54 = vadd.f32 %v3352_v27, %v8304_v37  ;;  %v7126_v37 = vld [vmem:[%s8933_s3 + $0x2a0] sm:$0xff] }
 0x9d3   :  { %v3891_v59 = vpop.f32.mrf.mxu2  ;;  %v4241_v10 = vpop.f32.mrf.mxu0 }
 0x9d4   :  { %v8535_v2 = vadd.f32 %v3692_v9, %v3394_v54  ;;  %v3704_v43 = vpop.f32.mrf.mxu1 }
 0x9d6   :  { %6928 = vmatmul.msk.bf16.gmra.mxu0 %vm2178_vm12, %v7140_v17 }
 0x9d9   :  { %v3354_v16 = vpop.f32.mrf.mxu3 }
 0x9da   :  { %v3395_v31 = vadd.f32 %v3354_v16, %v8316_v55  ;;  %v7143_v16 = vld [vmem:[%s8933_s3 + $0x320] sm:$0xff] }
 0x9db   :  { %v3893_v60 = vpop.f32.mrf.mxu2  ;;  %v4243_v9 = vpop.f32.mrf.mxu0 }
 0x9dc   :  { %v8542_v0 = vadd.f32 %v3694_v18, %v3395_v31  ;;  %v3939_v21 = vpack.c.bf16 %v3893_v60, %v3891_v59  ;;  %v3707_v34 = vpop.f32.mrf.mxu1  ;;  %v4281_v33 = vpack.c.bf16 %v4243_v9, %v4241_v10 }
 0x9de   :  { %6642 = vmatmul.msk.bf16.gmra.mxu3 %vm2509_vm8, %v3939_v21  ;;  %6746 = vmatmul.msk.bf16.gmra.mxu1 %vm2509_vm8, %v4281_v33 }
 0x9e0   :  { %6825 = vmatmul.msk.bf16.vlgmr.msrb.gmra.mxu2 %vm2178_vm12, %v7126_v37 }
 0x9e1   :  { %v3357_v40 = vpop.f32.mrf.mxu3 }
 0x9e2   :  { %v3396_v55 = vadd.f32 %v3357_v40, %v8327_v52  ;;  %v7127_v52 = vld [vmem:[%s8933_s3 + $0x2a8] sm:$0xff] }
 0x9e3   :  { %v3896_v20 = vpop.f32.mrf.mxu2  ;;  %v4246_v15 = vpop.f32.mrf.mxu0 }
 0x9e4   :  { %v8551_v18 = vadd.f32 %v3697_v13, %v3396_v55  ;;  %v3709_v62 = vpop.f32.mrf.mxu1 }
 0x9e6   :  { %6929 = vmatmul.msk.bf16.gmra.mxu0 %vm2178_vm12, %v7141_v56 }
 0x9e9   :  { %v3359_v47 = vpop.f32.mrf.mxu3 }
 0x9ea   :  { %v3397_v61 = vadd.f32 %v3359_v47, %v8336_v26  ;;  %v7144_v47 = vld [vmem:[%s8933_s3 + $0x328] sm:$0xff] }
 0x9eb   :  { %v3898_v42 = vpop.f32.mrf.mxu2  ;;  %v4248_v13 = vpop.f32.mrf.mxu0 }
 0x9ec   :  { %v8558_v38 = vadd.f32 %v3699_v32, %v3397_v61  ;;  %v3940_v8 = vpack.c.bf16 %v3898_v42, %v3896_v20  ;;  %v3712_v57 = vpop.f32.mrf.mxu1  ;;  %v4282_v58 = vpack.c.bf16 %v4248_v13, %v4246_v15 }
 0x9ee   :  { %6643 = vmatmul.msk.bf16.gmra.mxu3 %vm2509_vm8, %v3940_v8  ;;  %6747 = vmatmul.msk.bf16.gmra.mxu1 %vm2509_vm8, %v4282_v58 }
 0x9f0   :  { %6826 = vmatmul.msk.bf16.gmra.mxu2 %vm2178_vm12, %v7127_v52 }
 0x9f1   :  { %v3362_v6 = vpop.f32.mrf.mxu3 }
 0x9f2   :  { %v3398_v26 = vadd.f32 %v3362_v6, %v8344_v11  ;;  %v7128_v11 = vld [vmem:[%s8933_s3 + $0x2b0] sm:$0xff] }
 0x9f3   :  { %v3901_v49 = vpop.f32.mrf.mxu2  ;;  %v4251_v53 = vpop.f32.mrf.mxu0 }
 0x9f4   :  { %v8567_v32 = vadd.f32 %v3702_v41, %v3398_v26  ;;  %v3714_v25 = vpop.f32.mrf.mxu1 }
 0x9f6   :  { %6930 = vmatmul.msk.bf16.gmra.mxu0 %vm2178_vm12, %v7142_v4 }
 0x9f9   :  { %v3364_v19 = vpop.f32.mrf.mxu3 }
 0x9fa   :  { %v3399_v30 = vadd.f32 %v3364_v19, %v8353_v63  ;;  %v7145_v19 = vld [vmem:[%s8933_s3 + $0x330] sm:$0xff] }
 0x9fb   :  { %v3903_v51 = vpop.f32.mrf.mxu2  ;;  %v4253_v41 = vpop.f32.mrf.mxu0 }
 0x9fc   :  { %v8574_v23 = vadd.f32 %v3704_v43, %v3399_v30  ;;  %v3941_v27 = vpack.c.bf16 %v3903_v51, %v3901_v49  ;;  %v3717_v54 = vpop.f32.mrf.mxu1  ;;  %v4283_v59 = vpack.c.bf16 %v4253_v41, %v4251_v53 }
 0x9fe   :  { %6644 = vmatmul.msk.bf16.gmra.mxu3 %vm2509_vm8, %v3941_v27  ;;  %6748 = vmatmul.msk.bf16.gmra.mxu1 %vm2509_vm8, %v4283_v59 }
 0xa00   :  { %6827 = vmatmul.msk.bf16.gmra.mxu2 %vm2178_vm12, %v7128_v11 }
 0xa01   :  { %v3367_v17 = vpop.f32.mrf.mxu3 }
 0xa02   :  { %v3400_v63 = vadd.f32 %v3367_v17, %v8361_v46  ;;  %v7129_v46 = vld [vmem:[%s8933_s3 + $0x2b8] sm:$0xff] }
 0xa03   :  { %v3906_v10 = vpop.f32.mrf.mxu2  ;;  %v4256_v31 = vpop.f32.mrf.mxu0 }
 0xa04   :  { %v8583_v43 = vadd.f32 %v3707_v34, %v3400_v63  ;;  %v3719_v60 = vpop.f32.mrf.mxu1 }
 0xa06   :  { %6931 = vmatmul.msk.bf16.gmra.mxu0 %vm2178_vm12, %v7143_v16 }
 0xa09   :  { %v3369_v21 = vpop.f32.mrf.mxu3 }
 0xa0a   :  { %v3401_v37 = vadd.f32 %v3369_v21, %v8370_v12  ;;  %v7146_v21 = vld [vmem:[%s8933_s3 + $0x338] sm:$0xff] }
 0xa0b   :  { %v3908_v9 = vpop.f32.mrf.mxu2  ;;  %v4258_v34 = vpop.f32.mrf.mxu0 }
 0xa0c   :  { %v8590_v33 = vadd.f32 %v3709_v62, %v3401_v37  ;;  %v3942_v40 = vpack.c.bf16 %v3908_v9, %v3906_v10  ;;  %v4284_v55 = vpack.c.bf16 %v4258_v34, %v4256_v31  ;;  %v4342_v20 = vpop.f32.mrf.mxu1 }
 0xa0e   :  { %6645 = vmatmul.msk.bf16.gmra.mxu3 %vm2509_vm8, %v3942_v40  ;;  %6749 = vmatmul.msk.bf16.gmra.mxu1 %vm2509_vm8, %v4284_v55 }
 0xa10   :  { %6828 = vmatmul.msk.bf16.gmra.mxu2 %vm2178_vm12, %v7129_v46 }
 0xa11   :  { %v3372_v56 = vpop.f32.mrf.mxu3 }
 0xa12   :  { %v3402_v12 = vadd.f32 %v3372_v56, %v8378_v3  ;;  %v7130_v3 = vld [vmem:[%s8933_s3 + $0x2c0] sm:$0xff] }
 0xa13   :  { %v3911_v15 = vpop.f32.mrf.mxu2  ;;  %v4261_v61 = vpop.f32.mrf.mxu0 }
 0xa14   :  { %v8599_v62 = vadd.f32 %v3712_v57, %v3402_v12  ;;  %v4344_v42 = vpop.f32.mrf.mxu1 }
 0xa16   :  { %6932 = vmatmul.msk.bf16.gmra.mxu0 %vm2178_vm12, %v7144_v47 }
 0xa19   :  { %v3374_v8 = vpop.f32.mrf.mxu3 }
 0xa1a   :  { %v3403_v52 = vadd.f32 %v3374_v8, %v8387_v14 }
 0xa1b   :  { %v3913_v13 = vpop.f32.mrf.mxu2  ;;  %v4263_v57 = vpop.f32.mrf.mxu0 }
 0xa1c   :  { %v8606_v58 = vadd.f32 %v3714_v25, %v3403_v52  ;;  %v3943_v6 = vpack.c.bf16 %v3913_v13, %v3911_v15  ;;  %v4285_v26 = vpack.c.bf16 %v4263_v57, %v4261_v61  ;;  %v4347_v49 = vpop.f32.mrf.mxu1 }
 0xa1e   :  { %6646 = vmatmul.msk.bf16.gmra.mxu3 %vm2509_vm8, %v3943_v6  ;;  %6750 = vmatmul.msk.bf16.gmra.mxu1 %vm2509_vm8, %v4285_v26 }
 0xa20   :  { %6829 = vmatmul.msk.bf16.gmra.mxu2 %vm2178_vm12, %v7130_v3 }
 0xa21   :  { %v3377_v4 = vpop.f32.mrf.mxu3 }
 0xa22   :  { %v3404_v14 = vadd.f32 %v3377_v4, %v8395_v7  ;;  %v7131_v7 = vld [vmem:[%s8933_s3 + $0x2c8] sm:$0xff] }
 0xa23   :  { %v3916_v53 = vpop.f32.mrf.mxu2  ;;  %v4266_v30 = vpop.f32.mrf.mxu0 }
 0xa24   :  { %v8615_v25 = vadd.f32 %v3717_v54, %v3404_v14  ;;  %v4349_v51 = vpop.f32.mrf.mxu1 }
 0xa26   :  { %6933 = vmatmul.msk.bf16.gmra.mxu0 %vm2178_vm12, %v7145_v19 }
 0xa29   :  { %v3379_v27 = vpop.f32.mrf.mxu3 }
 0xa2a   :  { %v3405_v11 = vadd.f32 %v3379_v27, %v8403_v36 }
 0xa2b   :  { %v3918_v41 = vpop.f32.mrf.mxu2  ;;  %v4268_v54 = vpop.f32.mrf.mxu0 }
 0xa2c   :  { %v8622_v59 = vadd.f32 %v3719_v60, %v3405_v11  ;;  %v3944_v17 = vpack.c.bf16 %v3918_v41, %v3916_v53  ;;  %v4286_v63 = vpack.c.bf16 %v4268_v54, %v4266_v30  ;;  %v4352_v10 = vpop.f32.mrf.mxu1 }
 0xa2e   :  { %6647 = vmatmul.msk.bf16.gmra.mxu3 %vm2509_vm8, %v3944_v17  ;;  %6751 = vmatmul.msk.bf16.gmra.mxu1 %vm2509_vm8, %v4286_v63 }
 0xa30   :  { %6830 = vmatmul.msk.bf16.gmra.mxu2 %vm2178_vm12, %v7131_v7 }
 0xa31   :  { %v4002_v16 = vpop.f32.mrf.mxu3 }
 0xa32   :  { %v4062_v36 = vadd.f32 %v4002_v16, %v8433_v45  ;;  %v7132_v45 = vld [vmem:[%s8933_s3 + $0x2d0] sm:$0xff] }
 0xa33   :  { %v3921_v31 = vpop.f32.mrf.mxu2  ;;  %v4271_v37 = vpop.f32.mrf.mxu0 }
 0xa34   :  { %v8631_v60 = vadd.f32 %v4342_v20, %v4062_v36  ;;  %v4354_v9 = vpop.f32.mrf.mxu1 }
 0xa36   :  { %6934 = vmatmul.msk.bf16.gmra.mxu0 %vm2178_vm12, %v7146_v21 }
 0xa39   :  { %v4004_v40 = vpop.f32.mrf.mxu3 }
 0xa3a   :  { %v4063_v46 = vadd.f32 %v4004_v40, %v8440_v28 }
 0xa3b   :  { %v3923_v34 = vpop.f32.mrf.mxu2  ;;  %v4273_v20 = vpop.f32.mrf.mxu0 }
 0xa3c   :  { %v3945_v55 = vpack.c.bf16 %v3923_v34, %v3921_v31  ;;  %v8638_v56 = vadd.f32 %v4344_v42, %v4063_v46  ;;  %v4287_v12 = vpack.c.bf16 %v4273_v20, %v4271_v37  ;;  %v4357_v15 = vpop.f32.mrf.mxu1  ;;  %v7147_v42 = vld [vmem:[%s8933_s3 + $0x340] sm:$0xff] }
 0xa3e   :  { %6648 = vmatmul.msk.bf16.gmra.mxu3 %vm2509_vm8, %v3945_v55  ;;  %6752 = vmatmul.msk.bf16.gmra.mxu1 %vm2509_vm8, %v4287_v12 }
 0xa40   :  { %6831 = vmatmul.msk.bf16.gmra.mxu2 %vm2178_vm12, %v7132_v45 }
 0xa41   :  { %v4007_v47 = vpop.f32.mrf.mxu3 }
 0xa42   :  { %v4064_v28 = vadd.f32 %v4007_v47, %v8449_v44  ;;  %v7133_v44 = vld [vmem:[%s8933_s3 + $0x2d8] sm:$0xff] }
 0xa43   :  { %v3926_v61 = vpop.f32.mrf.mxu2  ;;  %v4896_v52 = vpop.f32.mrf.mxu0 }
 0xa44   :  { %v8647_v8 = vadd.f32 %v4347_v49, %v4064_v28  ;;  %v4359_v13 = vpop.f32.mrf.mxu1 }
 0xa46   :  { %6935 = vmatmul.msk.bf16.gmra.mxu0 %vm2178_vm12, %v7147_v42 }
 0xa49   :  { %v4009_v6 = vpop.f32.mrf.mxu3 }
 0xa4a   :  { %v4065_v3 = vadd.f32 %v4009_v6, %v8456_v50  ;;  %v7150_v6 = vld [vmem:[%s8933_s3 + $0x358] sm:$0xff] }
 0xa4b   :  { %v3928_v57 = vpop.f32.mrf.mxu2  ;;  %v4898_v49 = vpop.f32.mrf.mxu0 }
 0xa4c   :  { %v3946_v26 = vpack.c.bf16 %v3928_v57, %v3926_v61  ;;  %v8654_v4 = vadd.f32 %v4349_v51, %v4065_v3  ;;  %v4362_v14 = vpop.f32.mrf.mxu1  ;;  %v4956_v53 = vpack.c.bf16 %v4898_v49, %v4896_v52  ;;  %v7148_v51 = vld [vmem:[%s8933_s3 + $0x348] sm:$0xff] }
 0xa4e   :  { %6649 = vmatmul.msk.bf16.gmra.mxu3 %vm2509_vm8, %v3946_v26  ;;  %6945 = vmatmul.msk.bf16.vlgmr.msrb.gmra.mxu1 %vm2509_vm8, %v4956_v53 }
 0xa50   :  { %6832 = vmatmul.msk.bf16.gmra.mxu2 %vm2178_vm12, %v7133_v44 }
 0xa51   :  { %v4012_v19 = vpop.f32.mrf.mxu3 }
 0xa52   :  { %v4066_v50 = vadd.f32 %v4012_v19, %v8465_v24  ;;  %v7134_v24 = vld [vmem:[%s8933_s3 + $0x2e0] sm:$0xff] }
 0xa53   :  { %v3931_v30 = vpop.f32.mrf.mxu2  ;;  %v4901_v11 = vpop.f32.mrf.mxu0 }
 0xa54   :  { %v8663_v27 = vadd.f32 %v4352_v10, %v4066_v50  ;;  %v4364_v41 = vpop.f32.mrf.mxu1 }
 0xa56   :  { %6936 = vmatmul.msk.bf16.gmra.mxu0 %vm2178_vm12, %v7148_v51 }
 0xa59   :  { %v4014_v17 = vpop.f32.mrf.mxu3 }
 0xa5a   :  { %v4067_v7 = vadd.f32 %v4014_v17, %v8472_v5 }
 0xa5b   :  { %v3933_v54 = vpop.f32.mrf.mxu2  ;;  %v4903_v10 = vpop.f32.mrf.mxu0 }
 0xa5c   :  { %v3947_v63 = vpack.c.bf16 %v3933_v54, %v3931_v30  ;;  %v8670_v16 = vadd.f32 %v4354_v9, %v4067_v7  ;;  %v4367_v36 = vpop.f32.mrf.mxu1  ;;  %v4957_v31 = vpack.c.bf16 %v4903_v10, %v4901_v11  ;;  %v7149_v9 = vld [vmem:[%s8933_s3 + $0x350] sm:$0xff] }
 0xa5e   :  { %6650 = vmatmul.msk.bf16.gmra.mxu3 %vm2509_vm8, %v3947_v63  ;;  %6946 = vmatmul.msk.bf16.gmra.mxu1 %vm2509_vm8, %v4957_v31 }
 0xa60   :  { %6833 = vmatmul.msk.bf16.gmra.mxu2 %vm2178_vm12, %v7134_v24 }
 0xa61   :  { %v4017_v21 = vpop.f32.mrf.mxu3 }
 0xa62   :  { %v4068_v5 = vadd.f32 %v4017_v21, %v8481_v1  ;;  %v7135_v1 = vld [vmem:[%s8933_s3 + $0x2e8] sm:$0xff]  ;;  %v7137_v21 = vld [vmem:[%s8933_s3 + $0x2f8] sm:$0xff] }
 0xa63   :  { %v4556_v37 = vpop.f32.mrf.mxu2  ;;  %v4906_v46 = vpop.f32.mrf.mxu0 }
 0xa64   :  { %v8679_v40 = vadd.f32 %v4357_v15, %v4068_v5  ;;  %v4369_v34 = vpop.f32.mrf.mxu1 }
 0xa66   :  { %6937 = vmatmul.msk.bf16.gmra.mxu0 %vm2178_vm12, %v7149_v9 }
 0xa69   :  { %v4019_v55 = vpop.f32.mrf.mxu3 }
 0xa6a   :  { %v4069_v45 = vadd.f32 %v4019_v55, %v8488_v29 }
 0xa6b   :  { %v4558_v20 = vpop.f32.mrf.mxu2  ;;  %v4908_v15 = vpop.f32.mrf.mxu0 }
 0xa6c   :  { %v8686_v12 = vadd.f32 %v4359_v13, %v4069_v45  ;;  %v4616_v47 = vpack.c.bf16 %v4558_v20, %v4556_v37  ;;  %v4372_v28 = vpop.f32.mrf.mxu1  ;;  %v4958_v61 = vpack.c.bf16 %v4908_v15, %v4906_v46 }
 0xa6e   :  { %6843 = vmatmul.msk.bf16.vlgmr.msrb.gmra.mxu3 %vm2509_vm8, %v4616_v47  ;;  %6947 = vmatmul.msk.bf16.gmra.mxu1 %vm2509_vm8, %v4958_v61 }
 0xa70   :  { %6834 = vmatmul.msk.bf16.gmra.mxu2 %vm2178_vm12, %v7135_v1 }
 0xa71   :  { %v4022_v42 = vpop.f32.mrf.mxu3 }
 0xa72   :  { %v4070_v29 = vadd.f32 %v4022_v42, %v8497_v22  ;;  %v7136_v22 = vld [vmem:[%s8933_s3 + $0x2f0] sm:$0xff] }
 0xa73   :  { %v4561_v52 = vpop.f32.mrf.mxu2  ;;  %v4911_v3 = vpop.f32.mrf.mxu0 }
 0xa74   :  { %v8695_v13 = vadd.f32 %v4362_v14, %v4070_v29  ;;  %v4374_v57 = vpop.f32.mrf.mxu1 }
 0xa76   :  { %6938 = vmatmul.msk.bf16.gmra.mxu0 %vm2178_vm12, %v7150_v6 }
 0xa79   :  { %v4024_v26 = vpop.f32.mrf.mxu3 }
 0xa7a   :  { %v4071_v44 = vadd.f32 %v4024_v26, %v8507_v35 }
 0xa7b   :  { %v4563_v49 = vpop.f32.mrf.mxu2  ;;  %v4913_v14 = vpop.f32.mrf.mxu0 }
 0xa7c   :  { %v8702_v53 = vadd.f32 %v4364_v41, %v4071_v44  ;;  %v4617_v19 = vpack.c.bf16 %v4563_v49, %v4561_v52  ;;  %v4377_v50 = vpop.f32.mrf.mxu1  ;;  %v4959_v30 = vpack.c.bf16 %v4913_v14, %v4911_v3 }
 0xa7e   :  { %6844 = vmatmul.msk.bf16.gmra.mxu3 %vm2509_vm8, %v4617_v19  ;;  %6948 = vmatmul.msk.bf16.gmra.mxu1 %vm2509_vm8, %v4959_v30 }
 0xa80   :  { %6835 = vmatmul.msk.bf16.gmra.mxu2 %vm2178_vm12, %v7136_v22 }
 0xa81   :  { %v4027_v51 = vpop.f32.mrf.mxu3 }
 0xa82   :  { %v4072_v35 = vadd.f32 %v4027_v51, %v8519_v39 }
 0xa83   :  { %v4566_v11 = vpop.f32.mrf.mxu2  ;;  %v4916_v17 = vpop.f32.mrf.mxu0 }
 0xa84   :  { %v8711_v41 = vadd.f32 %v4367_v36, %v4072_v35  ;;  %v4379_v7 = vpop.f32.mrf.mxu1 }
 0xa89   :  { %v4029_v54 = vpop.f32.mrf.mxu3 }
 0xa8a   :  { %v4073_v63 = vadd.f32 %v4029_v54, %v8526_v48 }
 0xa8b   :  { %v4568_v24 = vpop.f32.mrf.mxu2  ;;  %v4918_v5 = vpop.f32.mrf.mxu0 }
 0xa8c   :  { %v8714_v10 = vadd.f32 %v4369_v34, %v4073_v63  ;;  %v4618_v31 = vpack.c.bf16 %v4568_v24, %v4566_v11  ;;  %v4382_v39 = vpop.f32.mrf.mxu1  ;;  %v4960_v37 = vpack.c.bf16 %v4918_v5, %v4916_v17 }
 0xa8e   :  { %6845 = vmatmul.msk.bf16.gmra.mxu3 %vm2509_vm8, %v4618_v31  ;;  %6949 = vmatmul.msk.bf16.gmra.mxu1 %vm2509_vm8, %v4960_v37 }
 0xa90   :  { %6836 = vmatmul.msk.bf16.gmra.mxu2 %vm2178_vm12, %v7137_v21 }
 0xa91   :  { %v4032_v36 = vpop.f32.mrf.mxu3 }
 0xa92   :  { %v4074_v48 = vadd.f32 %v4032_v36, %v8535_v2 }
 0xa93   :  { %v4571_v9 = vpop.f32.mrf.mxu2  ;;  %v4921_v34 = vpop.f32.mrf.mxu0 }
 0xa94   :  { %v8723_v46 = vadd.f32 %v4372_v28, %v4074_v48  ;;  %v4384_v55 = vpop.f32.mrf.mxu1 }
 0xa99   :  { %v4034_v45 = vpop.f32.mrf.mxu3 }
 0xa9a   :  { %v4075_v20 = vadd.f32 %v4034_v45, %v8542_v0 }
 0xa9b   :  { %v4573_v47 = vpop.f32.mrf.mxu2  ;;  %v4923_v61 = vpop.f32.mrf.mxu0 }
 0xa9c   :  { %v8726_v1 = vadd.f32 %v4374_v57, %v4075_v20  ;;  %v4619_v15 = vpack.c.bf16 %v4573_v47, %v4571_v9  ;;  %v4387_v42 = vpop.f32.mrf.mxu1  ;;  %v4961_v29 = vpack.c.bf16 %v4923_v61, %v4921_v34 }
 0xa9e   :  { %6846 = vmatmul.msk.bf16.gmra.mxu3 %vm2509_vm8, %v4619_v15  ;;  %6950 = vmatmul.msk.bf16.gmra.mxu1 %vm2509_vm8, %v4961_v29 }
 0xaa1   :  { %v4037_v52 = vpop.f32.mrf.mxu3 }
 0xaa2   :  { %v4076_v2 = vadd.f32 %v4037_v52, %v8551_v18 }
 0xaa3   :  { %v4576_v28 = vpop.f32.mrf.mxu2  ;;  %v4926_v3 = vpop.f32.mrf.mxu0 }
 0xaa4   :  { %v8731_v6 = vadd.f32 %v4377_v50, %v4076_v2  ;;  %v4389_v26 = vpop.f32.mrf.mxu1 }
 0xaa9   :  { %v4039_v0 = vpop.f32.mrf.mxu3 }
 0xaaa   :  { %v4077_v57 = vadd.f32 %v4039_v0, %v8558_v38 }
 0xaab   :  { %v4578_v44 = vpop.f32.mrf.mxu2  ;;  %v4928_v22 = vpop.f32.mrf.mxu0 }
 0xaac   :  { %v8734_v49 = vadd.f32 %v4379_v7, %v4077_v57  ;;  %v4620_v19 = vpack.c.bf16 %v4578_v44, %v4576_v28  ;;  %v4392_v14 = vpop.f32.mrf.mxu1  ;;  %v4962_v30 = vpack.c.bf16 %v4928_v22, %v4926_v3 }
 0xaae   :  { %6847 = vmatmul.msk.bf16.gmra.mxu3 %vm2509_vm8, %v4620_v19  ;;  %6951 = vmatmul.msk.bf16.gmra.mxu1 %vm2509_vm8, %v4962_v30 }
 0xab1   :  { %v4042_v51 = vpop.f32.mrf.mxu3 }
 0xab2   :  { %v4078_v18 = vadd.f32 %v4042_v51, %v8567_v32 }
 0xab3   :  { %v4581_v50 = vpop.f32.mrf.mxu2  ;;  %v4931_v11 = vpop.f32.mrf.mxu0 }
 0xab4   :  { %v8739_v35 = vadd.f32 %v4382_v39, %v4078_v18  ;;  %v4394_v17 = vpop.f32.mrf.mxu1 }
 0xab9   :  { %v4044_v38 = vpop.f32.mrf.mxu3 }
 0xaba   :  { %v4079_v7 = vadd.f32 %v4044_v38, %v8574_v23 }
 0xabb   :  { %v4583_v54 = vpop.f32.mrf.mxu2  ;;  %v4933_v31 = vpop.f32.mrf.mxu0 }
 0xabc   :  { %v8742_v63 = vadd.f32 %v4384_v55, %v4079_v7  ;;  %v4621_v24 = vpack.c.bf16 %v4583_v54, %v4581_v50  ;;  %v4397_v21 = vpop.f32.mrf.mxu1  ;;  %v4963_v5 = vpack.c.bf16 %v4933_v31, %v4931_v11 }
 0xabe   :  { %6848 = vmatmul.msk.bf16.gmra.mxu3 %vm2509_vm8, %v4621_v24  ;;  %6952 = vmatmul.msk.bf16.gmra.mxu1 %vm2509_vm8, %v4963_v5 }
 0xac1   :  { %v4047_v37 = vpop.f32.mrf.mxu3 }
 0xac2   :  { %v4080_v32 = vadd.f32 %v4047_v37, %v8583_v43 }
 0xac3   :  { %v4586_v39 = vpop.f32.mrf.mxu2  ;;  %v4936_v48 = vpop.f32.mrf.mxu0 }
 0xac4   :  { %v8747_v36 = vadd.f32 %v4387_v42, %v4080_v32  ;;  %v4399_v9 = vpop.f32.mrf.mxu1 }
 0xac9   :  { %v4049_v23 = vpop.f32.mrf.mxu3 }
 0xaca   :  { %v4081_v34 = vadd.f32 %v4049_v23, %v8590_v33 }
 0xacb   :  { %v4588_v55 = vpop.f32.mrf.mxu2  ;;  %v4938_v47 = vpop.f32.mrf.mxu0 }
 0xacc   :  { %v8750_v45 = vadd.f32 %v4389_v26, %v4081_v34  ;;  %v4622_v20 = vpack.c.bf16 %v4588_v55, %v4586_v39  ;;  %v4964_v15 = vpack.c.bf16 %v4938_v47, %v4936_v48  ;;  %v5022_v61 = vpop.f32.mrf.mxu1 }
 0xace   :  { %6849 = vmatmul.msk.bf16.gmra.mxu3 %vm2509_vm8, %v4622_v20  ;;  %6953 = vmatmul.msk.bf16.gmra.mxu1 %vm2509_vm8, %v4964_v15 }
 0xad1   :  { %v4052_v29 = vpop.f32.mrf.mxu3 }
 0xad2   :  { %v4082_v43 = vadd.f32 %v4052_v29, %v8599_v62 }
 0xad3   :  { %v4591_v42 = vpop.f32.mrf.mxu2  ;;  %v4941_v2 = vpop.f32.mrf.mxu0 }
 0xad4   :  { %v8755_v52 = vadd.f32 %v4392_v14, %v4082_v43  ;;  %v5024_v28 = vpop.f32.mrf.mxu1 }
 0xad9   :  { %v4054_v33 = vpop.f32.mrf.mxu3 }
 0xada   :  { %v4083_v3 = vadd.f32 %v4054_v33, %v8606_v58 }
 0xadb   :  { %v4593_v26 = vpop.f32.mrf.mxu2  ;;  %v4943_v44 = vpop.f32.mrf.mxu0 }
 0xadc   :  { %v8758_v0 = vadd.f32 %v4394_v17, %v4083_v3  ;;  %v4623_v57 = vpack.c.bf16 %v4593_v26, %v4591_v42  ;;  %v4965_v19 = vpack.c.bf16 %v4943_v44, %v4941_v2  ;;  %v5027_v22 = vpop.f32.mrf.mxu1 }
 0xade   :  { %6850 = vmatmul.msk.bf16.gmra.mxu3 %vm2509_vm8, %v4623_v57  ;;  %6954 = vmatmul.msk.bf16.gmra.mxu1 %vm2509_vm8, %v4965_v19 }
 0xae1   :  { %v4057_v30 = vpop.f32.mrf.mxu3 }
 0xae2   :  { %v4084_v62 = vadd.f32 %v4057_v30, %v8615_v25 }
 0xae3   :  { %v4596_v14 = vpop.f32.mrf.mxu2  ;;  %v4946_v18 = vpop.f32.mrf.mxu0 }
 0xae4   :  { %v8763_v51 = vadd.f32 %v4397_v21, %v4084_v62  ;;  %v5029_v50 = vpop.f32.mrf.mxu1 }
 0xae9   :  { %v4059_v58 = vpop.f32.mrf.mxu3 }
 0xaea   :  { %v4085_v11 = vadd.f32 %v4059_v58, %v8622_v59  ;;  %v8776_v59 = vld [vmem:[%s8927_s1 + $0x7] ss:$0 sm:$0xff] }
 0xaeb   :  { %v4598_v17 = vpop.f32.mrf.mxu2  ;;  %v4948_v54 = vpop.f32.mrf.mxu0 }
 0xaec   :  { %v8766_v38 = vadd.f32 %v4399_v9, %v4085_v11  ;;  %v4624_v7 = vpack.c.bf16 %v4598_v17, %v4596_v14  ;;  %v4966_v24 = vpack.c.bf16 %v4948_v54, %v4946_v18  ;;  %v8769_v31 = vpop.f32.mrf.mxu1 }
 0xaee   :  { %6851 = vmatmul.msk.bf16.gmra.mxu3 %vm2509_vm8, %v4624_v7  ;;  %6955 = vmatmul.msk.bf16.gmra.mxu1 %vm2509_vm8, %v4966_v24 }
 0xaf1   :  { %v4682_v5 = vpop.f32.mrf.mxu3 }
 0xaf2   :  { %v4742_v25 = vadd.f32 %v4682_v5, %v8631_v60 }
 0xaf3   :  { %v4601_v21 = vpop.f32.mrf.mxu2  ;;  %v4951_v32 = vpop.f32.mrf.mxu0 }
 0xaf4   :  { %v5082_v37 = vadd.f32 %v5022_v61, %v4742_v25  ;;  %v8779_v23 = vpop.f32.mrf.mxu1 }
 0xaf6   :  { %v5107_v39 = vadd.f32 %v8776_v59, %v5082_v37 }
 0xaf8   :  { %v6957_v48 = vmul.f32 -1.442695, %v5107_v39 }
 0xaf9   :  { %v4684_v9 = vpop.f32.mrf.mxu3 }
 0xafa   :  { %7159 = vpow2.f32 %v6957_v48  ;;  %v4743_v34 = vadd.f32 %v4684_v9, %v8638_v56 }
 0xafb   :  { %v4603_v55 = vpop.f32.mrf.mxu2  ;;  %v4953_v47 = vpop.f32.mrf.mxu0 }
 0xafc   :  { %v4625_v20 = vpack.c.bf16 %v4603_v55, %v4601_v21  ;;  %v5083_v60 = vadd.f32 %v5024_v28, %v4743_v34  ;;  %v4967_v29 = vpack.c.bf16 %v4953_v47, %v4951_v32  ;;  %v8786_v3 = vpop.f32.mrf.mxu1 }
 0xafe   :  { %v5108_v15 = vadd.f32 %v8776_v59, %v5083_v60  ;;  %6852 = vmatmul.msk.bf16.gmra.mxu3 %vm2509_vm8, %v4625_v20  ;;  %6956 = vmatmul.msk.bf16.gmra.mxu1 %vm2509_vm8, %v4967_v29 }
 0xb00   :  { %v7160_v61 = vpop.eup %7159  ;;  %v6958_v43 = vmul.f32 -1.442695, %v5108_v15 }
 0xb01   :  { %v5203_v42 = vadd.f32 1.0, %v7160_v61  ;;  %v4687_v2 = vpop.f32.mrf.mxu3 }
 0xb02   :  { %7161 = vpow2.f32 %v6958_v43  ;;  %v4744_v33 = vadd.f32 %v4687_v2, %v8647_v8 }
 0xb03   :  { %7163 = vrcp.f32 %v5203_v42  ;;  %v4606_v56 = vpop.f32.mrf.mxu2  ;;  %v5238_v7 = vand.u32 2147483648, %v5203_v42  ;;  %v5236_v24 = vand.u32 2147483647, %v5203_v42  ;;  %vm5232_vm11 = vweird.f32 %v5203_v42 }
 0xb04   :  { %v5084_v28 = vadd.f32 %v5027_v22, %v4744_v33  ;;  %v8790_v54 = vpop.f32.mrf.mxu1 }
 0xb05   :  { %v5239_v32 = vor.u32 1.1754944e-38, %v5238_v7  ;;  %vm5237_vm0 = vcmp.eq.f32.partialorder %v5236_v24, 8.507059e+37 }
 0xb06   :  { %v5109_v26 = vadd.f32 %v8776_v59, %v5084_v28 }
 0xb08   :  { %v7162_v57 = vpop.eup %7161  ;;  %v6959_v44 = vmul.f32 -1.442695, %v5109_v26 }
 0xb09   :  { %v7164_v19 = vpop.eup %7163  ;;  %v5204_v30 = vadd.f32 1.0, %v7162_v57  ;;  %v4689_v62 = vpop.f32.mrf.mxu3 }
 0xb0a   :  { %v5228_v14 = vmul.f32 %v7164_v19, %v5203_v42  ;;  %7165 = vpow2.f32 %v6959_v44  ;;  %v4745_v18 = vadd.f32 %v4689_v62, %v8654_v4  ;;  %vm5233_vm13 = vweird.f32 %v7164_v19 }
 0xb0b   :  { %7167 = vrcp.f32 %v5204_v30  ;;  %v4608_v58 = vpop.f32.mrf.mxu2  ;;  %vm5234_vm1 = vmor %vm5232_vm11, %vm5233_vm13  ;;  %v5253_v47 = vand.u32 2147483648, %v5204_v30  ;;  %v5251_v29 = vand.u32 2147483647, %v5204_v30  ;;  %vm5247_vm15 = vweird.f32 %v5204_v30 }
 0xb0c   :  { %v5229_v11 = vsub.f32 1.0, %v5228_v14  ;;  %v4626_v8 = vpack.c.bf16 %v4608_v58, %v4606_v56  ;;  %v5085_v17 = vadd.f32 %v5029_v50, %v4745_v18  ;;  %v8799_v43 = vpop.f32.mrf.mxu1 }
 0xb0d   :  { %v5254_v28 = vor.u32 1.1754944e-38, %v5253_v47  ;;  %vm5252_vm3 = vcmp.eq.f32.partialorder %v5251_v29, 8.507059e+37 }
 0xb0e   :  { %v5230_v22 = vmul.f32 %v7164_v19, %v5229_v11  ;;  %v5110_v5 = vadd.f32 %v8776_v59, %v5085_v17  ;;  %6853 = vmatmul.msk.bf16.gmra.mxu3 %vm2509_vm8, %v4626_v8 }
 0xb10   :  { %v7166_v25 = vpop.eup %7165  ;;  %v5231_v21 = vadd.f32 %v7164_v19, %v5230_v22  ;;  %v6960_v37 = vmul.f32 -1.442695, %v5110_v5 }
 0xb11   :  { %v7168_v4 = vpop.eup %7167  ;;  %v5205_v39 = vadd.f32 1.0, %v7166_v25  ;;  %v4692_v48 = vpop.f32.mrf.mxu3 }
 0xb12   :  { %v5235_v50 = vsel %vm5234_vm1, %v7164_v19, %v5231_v21  ;;  %v5243_v9 = vmul.f32 %v7168_v4, %v5204_v30  ;;  %7169 = vpow2.f32 %v6960_v37  ;;  %v4746_v60 = vadd.f32 %v4692_v48, %v8663_v27 }
 0xb13   :  { %v5240_v34 = vsel %vm5237_vm0, %v5239_v32, %v5235_v50  ;;  %7171 = vrcp.f32 %v5205_v39  ;;  %v4611_v55 = vpop.f32.mrf.mxu2  ;;  %vm5248_vm14 = vweird.f32 %v7168_v4  ;;  %v5268_v18 = vand.u32 2147483648, %v5205_v39 }
 0xb14   :  { %5587 = vst [vmem:[%s8934_s7] sm:$0xff] %v5240_v34  ;;  %v5244_v20 = vsub.f32 1.0, %v5243_v9  ;;  %v5086_v61 = vadd.f32 %v8769_v31, %v4746_v60  ;;  %vm5249_vm2 = vmor %vm5247_vm15, %vm5248_vm14  ;;  %v5266_v8 = vand.u32 2147483647, %v5205_v39  ;;  %vm5262_vm5 = vweird.f32 %v5205_v39  ;;  %v8809_v21 = vpop.f32.mrf.mxu1 }
 0xb15   :  { %v5269_v5 = vor.u32 1.1754944e-38, %v5268_v18 }
 0xb16   :  { %v5245_v15 = vmul.f32 %v7168_v4, %v5244_v20  ;;  %v5111_v33 = vadd.f32 %v8776_v59, %v5086_v61  ;;  %vm5267_vm7 = vcmp.eq.f32.partialorder %v5266_v8, 8.507059e+37 }
 0xb18   :  { %v7170_v42 = vpop.eup %7169  ;;  %v5246_v2 = vadd.f32 %v7168_v4, %v5245_v15  ;;  %v6961_v19 = vmul.f32 -1.442695, %v5111_v33 }
 0xb19   :  { %v7172_v56 = vpop.eup %7171  ;;  %v5206_v26 = vadd.f32 1.0, %v7170_v42  ;;  %v4694_v57 = vpop.f32.mrf.mxu3 }
 0xb1a   :  { %v5250_v44 = vsel %vm5249_vm2, %v7168_v4, %v5246_v2  ;;  %v5258_v27 = vmul.f32 %v7172_v56, %v5205_v39  ;;  %v4747_v30 = vadd.f32 %v4694_v57, %v8670_v16  ;;  %vm5263_vm4 = vweird.f32 %v7172_v56 }
 0xb1b   :  { %v5255_v62 = vsel %vm5252_vm3, %v5254_v28, %v5250_v44  ;;  %7173 = vrcp.f32 %v5206_v26  ;;  %v4613_v14 = vpop.f32.mrf.mxu2  ;;  %vm5264_vm6 = vmor %vm5262_vm5, %vm5263_vm4  ;;  %v5283_v9 = vand.u32 2147483648, %v5206_v26  ;;  %vm5277_vm10 = vweird.f32 %v5206_v26 }
 0xb1c   :  { %5588 = vst [vmem:[%s8934_s7 + $0x8] sm:$0xff] %v5255_v62  ;;  %v5259_v31 = vsub.f32 1.0, %v5258_v27  ;;  %7175 = vpow2.f32 %v6961_v19  ;;  %v4627_v58 = vpack.c.bf16 %v4613_v14, %v4611_v55  ;;  %v5087_v17 = vadd.f32 %v8779_v23, %v4747_v30  ;;  %v8818_v57 = vpop.f32.mrf.mxu1 }
 0xb1d   :  { %v5281_v55 = vand.u32 2147483647, %v5206_v26  ;;  %v5284_v15 = vor.u32 1.1754944e-38, %v5283_v9 }
 0xb1e   :  { %v5260_v11 = vmul.f32 %v7172_v56, %v5259_v31  ;;  %6854 = vmatmul.msk.bf16.gmra.mxu3 %vm2509_vm8, %v4627_v58  ;;  %v5112_v22 = vadd.f32 %v8776_v59, %v5087_v17 }
 0xb1f   :  { %vm5282_vm8 = vcmp.eq.f32.partialorder %v5281_v55, 8.507059e+37 }
 0xb20   :  { %v5261_v7 = vadd.f32 %v7172_v56, %v5260_v11  ;;  %v6962_v32 = vmul.f32 -1.442695, %v5112_v22 }
 0xb21   :  { %v7174_v24 = vpop.eup %7173  ;;  %v4697_v25 = vpop.f32.mrf.mxu3 }
 0xb22   :  { %v7176_v16 = vpop.eup %7175  ;;  %v5265_v37 = vsel %vm5264_vm6, %v7172_v56, %v5261_v7  ;;  %v5273_v4 = vmul.f32 %v7174_v24, %v5206_v26  ;;  %v4748_v23 = vadd.f32 %v4697_v25, %v8679_v40  ;;  %7177 = vpow2.f32 %v6962_v32 }
 0xb23   :  { %v5270_v48 = vsel %vm5267_vm7, %v5269_v5, %v5265_v37  ;;  %v5207_v50 = vadd.f32 1.0, %v7176_v16  ;;  %vm5278_vm9 = vweird.f32 %v7174_v24 }
 0xb24   :  { %5589 = vst [vmem:[%s8934_s7 + $0x10] sm:$0xff] %v5270_v48  ;;  %v5274_v39 = vsub.f32 1.0, %v5273_v4  ;;  %v5088_v20 = vadd.f32 %v8786_v3, %v4748_v23  ;;  %vm5279_vm12 = vmor %vm5277_vm10, %vm5278_vm9  ;;  %v8827_v5 = vpop.f32.mrf.mxu1 }
 0xb25   :  { %7179 = vrcp.f32 %v5207_v50  ;;  %v5298_v19 = vand.u32 2147483648, %v5207_v50  ;;  %vm5292_vm11 = vweird.f32 %v5207_v50 }
 0xb26   :  { %v5275_v34 = vmul.f32 %v7174_v24, %v5274_v39  ;;  %v5113_v47 = vadd.f32 %v8776_v59, %v5088_v20 }
 0xb27   :  { %v5299_v8 = vor.u32 1.1754944e-38, %v5298_v19 }
 0xb28   :  { %v5276_v60 = vadd.f32 %v7174_v24, %v5275_v34  ;;  %v7178_v29 = vpop.eup %7177  ;;  %v6963_v42 = vmul.f32 -1.442695, %v5113_v47 }
 0xb29   :  { %v4699_v40 = vpop.f32.mrf.mxu3  ;;  %v5208_v28 = vadd.f32 1.0, %v7178_v29 }
 0xb2a   :  { %v5280_v61 = vsel %vm5279_vm12, %v7174_v24, %v5276_v60  ;;  %v4749_v2 = vadd.f32 %v4699_v40, %v8686_v12  ;;  %7181 = vpow2.f32 %v6963_v42  ;;  %v5296_v12 = vand.u32 2147483647, %v5207_v50 }
 0xb2b   :  { %v7180_v33 = vpop.eup %7179  ;;  %v5285_v56 = vsel %vm5282_vm8, %v5284_v15, %v5280_v61  ;;  %7183 = vrcp.f32 %v5208_v28  ;;  %v5313_v16 = vand.u32 2147483648, %v5208_v28  ;;  %v5311_v32 = vand.u32 2147483647, %v5208_v28 }
 0xb2c   :  { %5590 = vst [vmem:[%s8934_s7 + $0x18] sm:$0xff] %v5285_v56  ;;  %v5288_v3 = vmul.f32 %v7180_v33, %v5207_v50  ;;  %v5089_v26 = vadd.f32 %v8790_v54, %v4749_v2  ;;  %vm5293_vm13 = vweird.f32 %v7180_v33  ;;  %vm5297_vm0 = vcmp.eq.f32.partialorder %v5296_v12, 8.507059e+37  ;;  %v8839_v61 = vpop.f32.mrf.mxu1 }
 0xb2d   :  { %vm5294_vm1 = vmor %vm5292_vm11, %vm5293_vm13  ;;  %vm5307_vm15 = vweird.f32 %v5208_v28  ;;  %v5314_v34 = vor.u32 1.1754944e-38, %v5313_v16  ;;  %vm5312_vm3 = vcmp.eq.f32.partialorder %v5311_v32, 8.507059e+37 }
 0xb2e   :  { %v5289_v44 = vsub.f32 1.0, %v5288_v3  ;;  %v5114_v27 = vadd.f32 %v8776_v59, %v5089_v26 }
 0xb30   :  { %v5290_v62 = vmul.f32 %v7180_v33, %v5289_v44  ;;  %v6964_v14 = vmul.f32 -1.442695, %v5114_v27  ;;  %v7182_v30 = vpop.eup %7181 }
 0xb31   :  { %v4702_v31 = vpop.f32.mrf.mxu3  ;;  %v7184_v11 = vpop.eup %7183  ;;  %v5209_v54 = vadd.f32 1.0, %v7182_v30 }
 0xb32   :  { %v5291_v18 = vadd.f32 %v7180_v33, %v5290_v62  ;;  %7185 = vpow2.f32 %v6964_v14  ;;  %v4750_v58 = vadd.f32 %v4702_v31, %v8695_v13  ;;  %v5303_v7 = vmul.f32 %v7184_v11, %v5208_v28 }
 0xb33   :  { %7187 = vrcp.f32 %v5209_v54  ;;  %vm5308_vm14 = vweird.f32 %v7184_v11  ;;  %v5328_v29 = vand.u32 2147483648, %v5209_v54  ;;  %v5326_v2 = vand.u32 2147483647, %v5209_v54 }
 0xb34   :  { %v5295_v17 = vsel %vm5294_vm1, %v7180_v33, %v5291_v18  ;;  %v5090_v22 = vadd.f32 %v8799_v43, %v4750_v58  ;;  %v5304_v25 = vsub.f32 1.0, %v5303_v7  ;;  %vm5309_vm2 = vmor %vm5307_vm15, %vm5308_vm14  ;;  %vm5322_vm5 = vweird.f32 %v5209_v54 }
 0xb35   :  { %v5300_v24 = vsel %vm5297_vm0, %v5299_v8, %v5295_v17  ;;  %v5329_v44 = vor.u32 1.1754944e-38, %v5328_v29  ;;  %vm5327_vm7 = vcmp.eq.f32.partialorder %v5326_v2, 8.507059e+37 }
 0xb36   :  { %5591 = vst [vmem:[%s8934_s7 + $0x20] sm:$0xff] %v5300_v24  ;;  %v5115_v13 = vadd.f32 %v8776_v59, %v5090_v22  ;;  %v5305_v4 = vmul.f32 %v7184_v11, %v5304_v25  ;;  %v5054_v22 = vpop.f32.mrf.mxu1 }
 0xb38   :  { %v7186_v37 = vpop.eup %7185  ;;  %v6965_v48 = vmul.f32 -1.442695, %v5115_v13  ;;  %v5306_v43 = vadd.f32 %v7184_v11, %v5305_v4 }
 0xb39   :  { %v5210_v50 = vadd.f32 1.0, %v7186_v37  ;;  %v4704_v23 = vpop.f32.mrf.mxu3  ;;  %v7188_v9 = vpop.eup %7187 }
 0xb3a   :  { %7189 = vpow2.f32 %v6965_v48  ;;  %v4751_v39 = vadd.f32 %v4704_v23, %v8702_v53  ;;  %v5310_v55 = vsel %vm5309_vm2, %v7184_v11, %v5306_v43  ;;  %v5318_v20 = vmul.f32 %v7188_v9, %v5209_v54 }
 0xb3b   :  { %7191 = vrcp.f32 %v5210_v50  ;;  %v5315_v47 = vsel %vm5312_vm3, %v5314_v34, %v5310_v55  ;;  %vm5323_vm4 = vweird.f32 %v7188_v9  ;;  %v5343_v14 = vand.u32 2147483648, %v5210_v50 }
 0xb3c   :  { %v5091_v60 = vadd.f32 %v8809_v21, %v4751_v39  ;;  %5592 = vst [vmem:[%s8934_s7 + $0x28] sm:$0xff] %v5315_v47  ;;  %v5319_v15 = vsub.f32 1.0, %v5318_v20  ;;  %vm5324_vm6 = vmor %vm5322_vm5, %vm5323_vm4  ;;  %v5341_v30 = vand.u32 2147483647, %v5210_v50  ;;  %vm5337_vm10 = vweird.f32 %v5210_v50 }
 0xb3d   :  { %v5344_v17 = vor.u32 1.1754944e-38, %v5343_v14 }
 0xb3e   :  { %v5116_v40 = vadd.f32 %v8776_v59, %v5091_v60  ;;  %v5320_v42 = vmul.f32 %v7188_v9, %v5319_v15  ;;  %vm5342_vm8 = vcmp.eq.f32.partialorder %v5341_v30, 8.507059e+37  ;;  %v5057_v29 = vpop.f32.mrf.mxu1 }
 0xb40   :  { %v7190_v53 = vpop.eup %7189  ;;  %v6966_v33 = vmul.f32 -1.442695, %v5116_v40  ;;  %v5321_v21 = vadd.f32 %v7188_v9, %v5320_v42 }
 0xb41   :  { %v7192_v56 = vpop.eup %7191  ;;  %v5211_v28 = vadd.f32 1.0, %v7190_v53  ;;  %v4707_v3 = vpop.f32.mrf.mxu3 }
 0xb42   :  { %v5333_v26 = vmul.f32 %v7192_v56, %v5210_v50  ;;  %7193 = vpow2.f32 %v6966_v33  ;;  %v5325_v27 = vsel %vm5324_vm6, %v7188_v9, %v5321_v21  ;;  %v4752_v62 = vadd.f32 %v4707_v3, %v8711_v41 }
 0xb43   :  { %7195 = vrcp.f32 %v5211_v28  ;;  %v5330_v12 = vsel %vm5327_vm7, %v5329_v44, %v5325_v27  ;;  %vm5338_vm9 = vweird.f32 %v7192_v56  ;;  %v5358_v4 = vand.u32 2147483648, %v5211_v28 }
 0xb44   :  { %v5334_v19 = vsub.f32 1.0, %v5333_v26  ;;  %5593 = vst [vmem:[%s8934_s7 + $0x30] sm:$0xff] %v5330_v12  ;;  %v5092_v18 = vadd.f32 %v8818_v57, %v4752_v62  ;;  %vm5339_vm12 = vmor %vm5337_vm10, %vm5338_vm9  ;;  %v5356_v48 = vand.u32 2147483647, %v5211_v28  ;;  %vm5352_vm11 = vweird.f32 %v5211_v28 }
 0xb45   :  { %v5359_v9 = vor.u32 1.1754944e-38, %v5358_v4 }
 0xb46   :  { %v5335_v31 = vmul.f32 %v7192_v56, %v5334_v19  ;;  %v5117_v8 = vadd.f32 %v8776_v59, %v5092_v18  ;;  %vm5357_vm0 = vcmp.eq.f32.partialorder %v5356_v48, 8.507059e+37 }
 0xb48   :  { %v7194_v58 = vpop.eup %7193  ;;  %v5336_v11 = vadd.f32 %v7192_v56, %v5335_v31  ;;  %v6967_v13 = vmul.f32 -1.442695, %v5117_v8  ;;  %v5059_v31 = vpop.f32.mrf.mxu1 }
 0xb49   :  { %v7196_v54 = vpop.eup %7195  ;;  %v5212_v41 = vadd.f32 1.0, %v7194_v58  ;;  %v4709_v7 = vpop.f32.mrf.mxu3 }
 0xb4a   :  { %v5340_v24 = vsel %vm5339_vm12, %v7192_v56, %v5336_v11  ;;  %v5348_v25 = vmul.f32 %v7196_v54, %v5211_v28  ;;  %v4753_v37 = vadd.f32 %v4709_v7, %v8714_v10  ;;  %vm5353_vm13 = vweird.f32 %v7196_v54 }
 0xb4b   :  { %v5345_v16 = vsel %vm5342_vm8, %v5344_v17, %v5340_v24  ;;  %7197 = vrcp.f32 %v5212_v41  ;;  %vm5354_vm1 = vmor %vm5352_vm11, %vm5353_vm13  ;;  %v5373_v53 = vand.u32 2147483648, %v5212_v41  ;;  %v5371_v2 = vand.u32 2147483647, %v5212_v41 }
 0xb4c   :  { %5594 = vst [vmem:[%s8934_s7 + $0x38] sm:$0xff] %v5345_v16  ;;  %v5349_v57 = vsub.f32 1.0, %v5348_v25  ;;  %7199 = vpow2.f32 %v6967_v13  ;;  %v5093_v50 = vadd.f32 %v8827_v5, %v4753_v37  ;;  %vm5367_vm15 = vweird.f32 %v5212_v41 }
 0xb4d   :  { %vm5372_vm3 = vcmp.eq.f32.partialorder %v5371_v2, 8.507059e+37 }
 0xb4e   :  { %v5350_v32 = vmul.f32 %v7196_v54, %v5349_v57  ;;  %v5118_v43 = vadd.f32 %v8776_v59, %v5093_v50 }
 0xb50   :  { %v5351_v23 = vadd.f32 %v7196_v54, %v5350_v32  ;;  %v6968_v47 = vmul.f32 -1.442695, %v5118_v43  ;;  %v5062_v50 = vpop.f32.mrf.mxu1 }
 0xb51   :  { %v7198_v39 = vpop.eup %7197  ;;  %v4712_v34 = vpop.f32.mrf.mxu3 }
 0xb52   :  { %v7200_v55 = vpop.eup %7199  ;;  %v5355_v20 = vsel %vm5354_vm1, %v7196_v54, %v5351_v23  ;;  %v5363_v60 = vmul.f32 %v7198_v39, %v5212_v41  ;;  %v4754_v40 = vadd.f32 %v4712_v34, %v8723_v46  ;;  %7201 = vpow2.f32 %v6968_v47 }
 0xb53   :  { %v5360_v10 = vsel %vm5357_vm0, %v5359_v9, %v5355_v20  ;;  %v5213_v15 = vadd.f32 1.0, %v7200_v55  ;;  %vm5368_vm14 = vweird.f32 %v7198_v39  ;;  %v5374_v46 = vor.u32 1.1754944e-38, %v5373_v53 }
 0xb54   :  { %5595 = vst [vmem:[%s8934_s7 + $0x40] sm:$0xff] %v5360_v10  ;;  %v5364_v5 = vsub.f32 1.0, %v5363_v60  ;;  %v5094_v33 = vadd.f32 %v8839_v61, %v4754_v40  ;;  %vm5369_vm2 = vmor %vm5367_vm15, %vm5368_vm14 }
 0xb55   :  { %7203 = vrcp.f32 %v5213_v15  ;;  %v5388_v58 = vand.u32 2147483648, %v5213_v15  ;;  %v5386_v8 = vand.u32 2147483647, %v5213_v15  ;;  %vm5382_vm5 = vweird.f32 %v5213_v15 }
 0xb56   :  { %v5365_v42 = vmul.f32 %v7198_v39, %v5364_v5  ;;  %v5119_v28 = vadd.f32 %v8776_v59, %v5094_v33 }
 0xb57   :  { %vm5387_vm7 = vcmp.eq.f32.partialorder %v5386_v8, 8.507059e+37 }
 0xb58   :  { %v5366_v56 = vadd.f32 %v7198_v39, %v5365_v42  ;;  %v7202_v21 = vpop.eup %7201  ;;  %v6969_v44 = vmul.f32 -1.442695, %v5119_v28 }
 0xb59   :  { %v4714_v3 = vpop.f32.mrf.mxu3  ;;  %v5214_v12 = vadd.f32 1.0, %v7202_v21  ;;  %v5064_v21 = vpop.f32.mrf.mxu1 }
 0xb5a   :  { %v5370_v26 = vsel %vm5369_vm2, %v7198_v39, %v5366_v56  ;;  %v4755_v27 = vadd.f32 %v4714_v3, %v8726_v1  ;;  %7205 = vpow2.f32 %v6969_v44 }
 0xb5b   :  { %v7204_v19 = vpop.eup %7203  ;;  %v5375_v62 = vsel %vm5372_vm3, %v5374_v46, %v5370_v26  ;;  %7207 = vrcp.f32 %v5214_v12  ;;  %v5403_v48 = vand.u32 2147483648, %v5214_v12  ;;  %v5401_v43 = vand.u32 2147483647, %v5214_v12 }
 0xb5c   :  { %5596 = vst [vmem:[%s8934_s7 + $0x48] sm:$0xff] %v5375_v62  ;;  %v5378_v61 = vmul.f32 %v7204_v19, %v5213_v15  ;;  %v5095_v14 = vadd.f32 %v5054_v22, %v4755_v27  ;;  %vm5383_vm4 = vweird.f32 %v7204_v19  ;;  %v5389_v22 = vor.u32 1.1754944e-38, %v5388_v58 }
 0xb5d   :  { %vm5384_vm6 = vmor %vm5382_vm5, %vm5383_vm4  ;;  %vm5397_vm10 = vweird.f32 %v5214_v12  ;;  %v5404_v47 = vor.u32 1.1754944e-38, %v5403_v48  ;;  %vm5402_vm8 = vcmp.eq.f32.partialorder %v5401_v43, 8.507059e+37 }
 0xb5e   :  { %v5379_v30 = vsub.f32 1.0, %v5378_v61  ;;  %v5120_v18 = vadd.f32 %v8776_v59, %v5095_v14 }
 0xb60   :  { %v5380_v11 = vmul.f32 %v7204_v19, %v5379_v30  ;;  %v6970_v1 = vmul.f32 -1.442695, %v5120_v18  ;;  %v7206_v17 = vpop.eup %7205 }
 0xb61   :  { %v4717_v54 = vpop.f32.mrf.mxu3  ;;  %v7208_v24 = vpop.eup %7207  ;;  %v5215_v25 = vadd.f32 1.0, %v7206_v17 }
 0xb62   :  { %v5381_v41 = vadd.f32 %v7204_v19, %v5380_v11  ;;  %7209 = vpow2.f32 %v6970_v1  ;;  %v4756_v7 = vadd.f32 %v4717_v54, %v8731_v6  ;;  %v5393_v16 = vmul.f32 %v7208_v24, %v5214_v12 }
 0xb63   :  { %7211 = vrcp.f32 %v5215_v25  ;;  %vm5398_vm9 = vweird.f32 %v7208_v24  ;;  %v5418_v42 = vand.u32 2147483648, %v5215_v25  ;;  %vm5412_vm11 = vweird.f32 %v5215_v25 }
 0xb64   :  { %v5385_v13 = vsel %vm5384_vm6, %v7204_v19, %v5381_v41  ;;  %v5096_v57 = vadd.f32 %v5057_v29, %v4756_v7  ;;  %v5394_v4 = vsub.f32 1.0, %v5393_v16  ;;  %vm5399_vm12 = vmor %vm5397_vm10, %vm5398_vm9 }
 0xb65   :  { %v5390_v37 = vsel %vm5387_vm7, %v5389_v22, %v5385_v13  ;;  %v5419_v27 = vor.u32 1.1754944e-38, %v5418_v42 }
 0xb66   :  { %5597 = vst [vmem:[%s8934_s7 + $0x50] sm:$0xff] %v5390_v37  ;;  %v5121_v32 = vadd.f32 %v8776_v59, %v5096_v57  ;;  %v5395_v23 = vmul.f32 %v7208_v24, %v5394_v4 }
 0xb68   :  { %v7210_v6 = vpop.eup %7209  ;;  %v6971_v39 = vmul.f32 -1.442695, %v5121_v32  ;;  %v5396_v55 = vadd.f32 %v7208_v24, %v5395_v23 }
 0xb69   :  { %v5216_v9 = vadd.f32 1.0, %v7210_v6  ;;  %v4719_v34 = vpop.f32.mrf.mxu3  ;;  %v7212_v60 = vpop.eup %7211 }
 0xb6a   :  { %7213 = vpow2.f32 %v6971_v39  ;;  %v4757_v20 = vadd.f32 %v4719_v34, %v8734_v49  ;;  %v5400_v10 = vsel %vm5399_vm12, %v7208_v24, %v5396_v55  ;;  %v5408_v15 = vmul.f32 %v7212_v60, %v5215_v25 }
 0xb6b   :  { %7215 = vrcp.f32 %v5216_v9  ;;  %v5405_v29 = vsel %vm5402_vm8, %v5404_v47, %v5400_v10  ;;  %vm5413_vm13 = vweird.f32 %v7212_v60  ;;  %v5416_v49 = vand.u32 2147483647, %v5215_v25  ;;  %v5067_v25 = vpop.f32.mrf.mxu1 }
 0xb6c   :  { %v5097_v40 = vadd.f32 %v5059_v31, %v4757_v20  ;;  %5598 = vst [vmem:[%s8934_s7 + $0x58] sm:$0xff] %v5405_v29  ;;  %v5409_v5 = vsub.f32 1.0, %v5408_v15  ;;  %vm5414_vm1 = vmor %vm5412_vm11, %vm5413_vm13  ;;  %v5433_v14 = vand.u32 2147483648, %v5216_v9  ;;  %v5431_v30 = vand.u32 2147483647, %v5216_v9 }
 0xb6d   :  { %vm5417_vm0 = vcmp.eq.f32.partialorder %v5416_v49, 8.507059e+37  ;;  %vm5427_vm15 = vweird.f32 %v5216_v9 }
 0xb6e   :  { %v5122_v53 = vadd.f32 %v8776_v59, %v5097_v40  ;;  %v5410_v33 = vmul.f32 %v7212_v60, %v5409_v5  ;;  %v5434_v54 = vor.u32 1.1754944e-38, %v5433_v14  ;;  %vm5432_vm3 = vcmp.eq.f32.partialorder %v5431_v30, 8.507059e+37 }
 0xb70   :  { %v7214_v2 = vpop.eup %7213  ;;  %v6972_v56 = vmul.f32 -1.442695, %v5122_v53  ;;  %v5411_v26 = vadd.f32 %v7212_v60, %v5410_v33 }
 0xb71   :  { %v7216_v28 = vpop.eup %7215  ;;  %v5217_v46 = vadd.f32 1.0, %v7214_v2  ;;  %v4722_v3 = vpop.f32.mrf.mxu3 }
 0xb72   :  { %v5423_v44 = vmul.f32 %v7216_v28, %v5216_v9  ;;  %7217 = vpow2.f32 %v6972_v56  ;;  %v5415_v19 = vsel %vm5414_vm1, %v7212_v60, %v5411_v26  ;;  %v4758_v12 = vadd.f32 %v4722_v3, %v8739_v35 }
 0xb73   :  { %7219 = vrcp.f32 %v5217_v46  ;;  %v5420_v61 = vsel %vm5417_vm0, %v5419_v27, %v5415_v19  ;;  %vm5428_vm14 = vweird.f32 %v7216_v28  ;;  %v5448_v57 = vand.u32 2147483648, %v5217_v46  ;;  %v5069_v15 = vpop.f32.mrf.mxu1 }
 0xb74   :  { %v5424_v62 = vsub.f32 1.0, %v5423_v44  ;;  %5599 = vst [vmem:[%s8934_s7 + $0x60] sm:$0xff] %v5420_v61  ;;  %v5098_v18 = vadd.f32 %v5062_v50, %v4758_v12  ;;  %vm5429_vm2 = vmor %vm5427_vm15, %vm5428_vm14  ;;  %v5446_v4 = vand.u32 2147483647, %v5217_v46  ;;  %vm5442_vm5 = vweird.f32 %v5217_v46 }
 0xb75   :  { %v5449_v23 = vor.u32 1.1754944e-38, %v5448_v57 }
 0xb76   :  { %v5425_v31 = vmul.f32 %v7216_v28, %v5424_v62  ;;  %v5123_v8 = vadd.f32 %v8776_v59, %v5098_v18  ;;  %vm5447_vm7 = vcmp.eq.f32.partialorder %v5446_v4, 8.507059e+37 }
 0xb78   :  { %v7218_v58 = vpop.eup %7217  ;;  %v5426_v11 = vadd.f32 %v7216_v28, %v5425_v31  ;;  %v6973_v24 = vmul.f32 -1.442695, %v5123_v8 }
 0xb79   :  { %v7220_v1 = vpop.eup %7219  ;;  %v5218_v17 = vadd.f32 1.0, %v7218_v58  ;;  %v4724_v35 = vpop.f32.mrf.mxu3 }
 0xb7a   :  { %v5430_v41 = vsel %vm5429_vm2, %v7216_v28, %v5426_v11  ;;  %v5438_v7 = vmul.f32 %v7220_v1, %v5217_v46  ;;  %v4759_v16 = vadd.f32 %v4724_v35, %v8742_v63  ;;  %vm5443_vm4 = vweird.f32 %v7220_v1 }
 0xb7b   :  { %v5435_v22 = vsel %vm5432_vm3, %v5434_v54, %v5430_v41  ;;  %7221 = vrcp.f32 %v5218_v17  ;;  %vm5444_vm6 = vmor %vm5442_vm5, %vm5443_vm4  ;;  %v5463_v10 = vand.u32 2147483648, %v5218_v17  ;;  %v5461_v29 = vand.u32 2147483647, %v5218_v17  ;;  %v5072_v12 = vpop.f32.mrf.mxu1 }
 0xb7c   :  { %5600 = vst [vmem:[%s8934_s7 + $0x68] sm:$0xff] %v5435_v22  ;;  %v5439_v13 = vsub.f32 1.0, %v5438_v7  ;;  %7223 = vpow2.f32 %v6973_v24  ;;  %v5099_v32 = vadd.f32 %v5064_v21, %v4759_v16  ;;  %vm5457_vm10 = vweird.f32 %v5218_v17 }
 0xb7d   :  { %v5464_v2 = vor.u32 1.1754944e-38, %v5463_v10  ;;  %vm5462_vm8 = vcmp.eq.f32.partialorder %v5461_v29, 8.507059e+37 }
 0xb7e   :  { %v5440_v37 = vmul.f32 %v7220_v1, %v5439_v13  ;;  %v5124_v50 = vadd.f32 %v8776_v59, %v5099_v32 }
 0xb80   :  { %v5441_v48 = vadd.f32 %v7220_v1, %v5440_v37  ;;  %v6974_v55 = vmul.f32 -1.442695, %v5124_v50 }
 0xb81   :  { %v7222_v6 = vpop.eup %7221  ;;  %v4727_v43 = vpop.f32.mrf.mxu3 }
 0xb82   :  { %v7224_v39 = vpop.eup %7223  ;;  %v5445_v9 = vsel %vm5444_vm6, %v7220_v1, %v5441_v48  ;;  %v5453_v34 = vmul.f32 %v7222_v6, %v5218_v17  ;;  %v4760_v60 = vadd.f32 %v4727_v43, %v8747_v36  ;;  %7225 = vpow2.f32 %v6974_v55 }
 0xb83   :  { %v5450_v20 = vsel %vm5447_vm7, %v5449_v23, %v5445_v9  ;;  %v5219_v63 = vadd.f32 1.0, %v7224_v39  ;;  %vm5458_vm9 = vweird.f32 %v7222_v6  ;;  %v5074_v4 = vpop.f32.mrf.mxu1 }
 0xb84   :  { %5601 = vst [vmem:[%s8934_s7 + $0x70] sm:$0xff] %v5450_v20  ;;  %v5454_v47 = vsub.f32 1.0, %v5453_v34  ;;  %v5100_v5 = vadd.f32 %v5067_v25, %v4760_v60  ;;  %vm5459_vm12 = vmor %vm5457_vm10, %vm5458_vm9 }
 0xb85   :  { %7227 = vrcp.f32 %v5219_v63  ;;  %v5478_v62 = vand.u32 2147483648, %v5219_v63  ;;  %v5476_v14 = vand.u32 2147483647, %v5219_v63  ;;  %vm5472_vm11 = vweird.f32 %v5219_v63 }
 0xb86   :  { %v5455_v40 = vmul.f32 %v7222_v6, %v5454_v47  ;;  %v5125_v42 = vadd.f32 %v8776_v59, %v5100_v5 }
 0xb87   :  { %v5479_v8 = vor.u32 1.1754944e-38, %v5478_v62  ;;  %vm5477_vm0 = vcmp.eq.f32.partialorder %v5476_v14, 8.507059e+37 }
 0xb88   :  { %v5456_v53 = vadd.f32 %v7222_v6, %v5455_v40  ;;  %v7226_v33 = vpop.eup %7225  ;;  %v6975_v56 = vmul.f32 -1.442695, %v5125_v42 }
 0xb89   :  { %v4729_v36 = vpop.f32.mrf.mxu3  ;;  %v5220_v21 = vadd.f32 1.0, %v7226_v33 }
 0xb8a   :  { %v5460_v49 = vsel %vm5459_vm12, %v7222_v6, %v5456_v53  ;;  %v4761_v28 = vadd.f32 %v4729_v36, %v8750_v45  ;;  %7229 = vpow2.f32 %v6975_v56 }
 0xb8b   :  { %v7228_v46 = vpop.eup %7227  ;;  %v5465_v3 = vsel %vm5462_vm8, %v5464_v2, %v5460_v49  ;;  %7231 = vrcp.f32 %v5220_v21  ;;  %v5493_v22 = vand.u32 2147483648, %v5220_v21  ;;  %v5491_v13 = vand.u32 2147483647, %v5220_v21  ;;  %v5077_v42 = vpop.f32.mrf.mxu1 }
 0xb8c   :  { %5602 = vst [vmem:[%s8934_s7 + $0x78] sm:$0xff] %v5465_v3  ;;  %v5468_v26 = vmul.f32 %v7228_v46, %v5219_v63  ;;  %v5101_v44 = vadd.f32 %v5069_v15, %v4761_v28  ;;  %vm5473_vm13 = vweird.f32 %v7228_v46  ;;  %vm5487_vm15 = vweird.f32 %v5220_v21 }
 0xb8d   :  { %vm5474_vm1 = vmor %vm5472_vm11, %vm5473_vm13  ;;  %v5494_v6 = vor.u32 1.1754944e-38, %v5493_v22  ;;  %vm5492_vm3 = vcmp.eq.f32.partialorder %v5491_v13, 8.507059e+37 }
 0xb8e   :  { %v5469_v27 = vsub.f32 1.0, %v5468_v26  ;;  %v5126_v19 = vadd.f32 %v8776_v59, %v5101_v44  ;;  %v7255_v26 = vld [vmem:[%s8927_s1 + $0x7] ss:$0 sm:$0xff] }
 0xb90   :  { %v5470_v61 = vmul.f32 %v7228_v46, %v5469_v27  ;;  %v6976_v45 = vmul.f32 -1.442695, %v5126_v19  ;;  %v7230_v30 = vpop.eup %7229 }
 0xb91   :  { %v4732_v31 = vpop.f32.mrf.mxu3  ;;  %v7232_v11 = vpop.eup %7231  ;;  %v5221_v1 = vadd.f32 1.0, %v7230_v30 }
 0xb92   :  { %v5471_v18 = vadd.f32 %v7228_v46, %v5470_v61  ;;  %7233 = vpow2.f32 %v6976_v45  ;;  %v4762_v58 = vadd.f32 %v4732_v31, %v8755_v52  ;;  %v5483_v17 = vmul.f32 %v7232_v11, %v5220_v21 }
 0xb93   :  { %7235 = vrcp.f32 %v5221_v1  ;;  %vm5488_vm14 = vweird.f32 %v7232_v11  ;;  %v5508_v20 = vand.u32 2147483648, %v5221_v1  ;;  %vm5502_vm5 = vweird.f32 %v5221_v1 }
 0xb94   :  { %v5475_v54 = vsel %vm5474_vm1, %v7228_v46, %v5471_v18  ;;  %v5102_v35 = vadd.f32 %v5072_v12, %v4762_v58  ;;  %v5484_v7 = vsub.f32 1.0, %v5483_v17  ;;  %vm5489_vm2 = vmor %vm5487_vm15, %vm5488_vm14  ;;  %v5079_v58 = vpop.f32.mrf.mxu1 }
 0xb95   :  { %v5480_v41 = vsel %vm5477_vm0, %v5479_v8, %v5475_v54  ;;  %v5509_v53 = vor.u32 1.1754944e-38, %v5508_v20 }
 0xb96   :  { %5603 = vst [vmem:[%s8934_s7 + $0x80] sm:$0xff] %v5480_v41  ;;  %v5127_v24 = vadd.f32 %v8776_v59, %v5102_v35  ;;  %v5485_v52 = vmul.f32 %v7232_v11, %v5484_v7 }
 0xb98   :  { %v7234_v25 = vpop.eup %7233  ;;  %v6977_v16 = vmul.f32 -1.442695, %v5127_v24  ;;  %v5486_v32 = vadd.f32 %v7232_v11, %v5485_v52 }
 0xb99   :  { %v5222_v57 = vadd.f32 1.0, %v7234_v25  ;;  %v4734_v37 = vpop.f32.mrf.mxu3  ;;  %v7236_v50 = vpop.eup %7235 }
 0xb9a   :  { %7237 = vpow2.f32 %v6977_v16  ;;  %v4763_v48 = vadd.f32 %v4734_v37, %v8758_v0  ;;  %v5490_v23 = vsel %vm5489_vm2, %v7232_v11, %v5486_v32  ;;  %v5498_v43 = vmul.f32 %v7236_v50, %v5221_v1 }
 0xb9b   :  { %7239 = vrcp.f32 %v5222_v57  ;;  %v5495_v9 = vsel %vm5492_vm3, %v5494_v6, %v5490_v23  ;;  %vm5503_vm4 = vweird.f32 %v7236_v50  ;;  %v5506_v0 = vand.u32 2147483647, %v5221_v1 }
 0xb9c   :  { %v5103_v39 = vadd.f32 %v5074_v4, %v4763_v48  ;;  %5604 = vst [vmem:[%s8934_s7 + $0x88] sm:$0xff] %v5495_v9  ;;  %v5499_v34 = vsub.f32 1.0, %v5498_v43  ;;  %vm5504_vm6 = vmor %vm5502_vm5, %vm5503_vm4  ;;  %v5523_v49 = vand.u32 2147483648, %v5222_v57  ;;  %v5521_v28 = vand.u32 2147483647, %v5222_v57 }
 0xb9d   :  { %vm5507_vm7 = vcmp.eq.f32.partialorder %v5506_v0, 8.507059e+37  ;;  %vm5517_vm10 = vweird.f32 %v5222_v57 }
 0xb9e   :  { %v5128_v55 = vadd.f32 %v8776_v59, %v5103_v39  ;;  %v5500_v60 = vmul.f32 %v7236_v50, %v5499_v34  ;;  %vm5522_vm8 = vcmp.eq.f32.partialorder %v5521_v28, 8.507059e+37 }
 0xba0   :  { %v7238_v63 = vpop.eup %7237  ;;  %v6978_v47 = vmul.f32 -1.442695, %v5128_v55  ;;  %v5501_v40 = vadd.f32 %v7236_v50, %v5500_v60 }
 0xba1   :  { %v7240_v10 = vpop.eup %7239  ;;  %v5223_v15 = vadd.f32 1.0, %v7238_v63  ;;  %v4737_v5 = vpop.f32.mrf.mxu3 }
 0xba2   :  { %v5513_v29 = vmul.f32 %v7240_v10, %v5222_v57  ;;  %7241 = vpow2.f32 %v6978_v47  ;;  %v5505_v2 = vsel %vm5504_vm6, %v7236_v50, %v5501_v40  ;;  %v4764_v36 = vadd.f32 %v4737_v5, %v8763_v51 }
 0xba3   :  { %7243 = vrcp.f32 %v5223_v15  ;;  %v5510_v33 = vsel %vm5507_vm7, %v5509_v53, %v5505_v2  ;;  %vm5518_vm9 = vweird.f32 %v7240_v10  ;;  %v5524_v51 = vor.u32 1.1754944e-38, %v5523_v49 }
 0xba4   :  { %v5514_v59 = vsub.f32 1.0, %v5513_v29  ;;  %5605 = vst [vmem:[%s8934_s7 + $0x90] sm:$0xff] %v5510_v33  ;;  %v5104_v46 = vadd.f32 %v5077_v42, %v4764_v36  ;;  %vm5519_vm12 = vmor %vm5517_vm10, %vm5518_vm9  ;;  %v5538_v18 = vand.u32 2147483648, %v5223_v15  ;;  %v5536_v8 = vand.u32 2147483647, %v5223_v15 }
 0xba5   :  { %vm5532_vm11 = vweird.f32 %v5223_v15 }
 0xba6   :  { %v5515_v56 = vmul.f32 %v7240_v10, %v5514_v59  ;;  %v5129_v44 = vadd.f32 %v7255_v26, %v5104_v46  ;;  %v5539_v41 = vor.u32 1.1754944e-38, %v5538_v18  ;;  %vm5537_vm0 = vcmp.eq.f32.partialorder %v5536_v8, 8.507059e+37 }
 0xba8   :  { %v7242_v3 = vpop.eup %7241  ;;  %v5516_v21 = vadd.f32 %v7240_v10, %v5515_v56  ;;  %v6979_v61 = vmul.f32 -1.442695, %v5129_v44 }
 0xba9   :  { %v7244_v27 = vpop.eup %7243  ;;  %v5224_v19 = vadd.f32 1.0, %v7242_v3  ;;  %v4739_v14 = vpop.f32.mrf.mxu3 }
 0xbaa   :  { %v5520_v62 = vsel %vm5519_vm12, %v7240_v10, %v5516_v21  ;;  %v5528_v12 = vmul.f32 %v7244_v27, %v5223_v15  ;;  %v4765_v30 = vadd.f32 %v4739_v14, %v8766_v38  ;;  %vm5533_vm13 = vweird.f32 %v7244_v27 }
 0xbab   :  { %v5525_v45 = vsel %vm5522_vm8, %v5524_v51, %v5520_v62  ;;  %7245 = vrcp.f32 %v5224_v19  ;;  %vm5534_vm1 = vmor %vm5532_vm11, %vm5533_vm13  ;;  %v5553_v16 = vand.u32 2147483648, %v5224_v19  ;;  %v5551_v37 = vand.u32 2147483647, %v5224_v19 }
 0xbac   :  { %5606 = vst [vmem:[%s8934_s7 + $0x98] sm:$0xff] %v5525_v45  ;;  %v5529_v31 = vsub.f32 1.0, %v5528_v12  ;;  %7247 = vpow2.f32 %v6979_v61  ;;  %v5105_v1 = vadd.f32 %v5079_v58, %v4765_v30  ;;  %vm5547_vm15 = vweird.f32 %v5224_v19 }
 0xbad   :  { %v5554_v32 = vor.u32 1.1754944e-38, %v5553_v16  ;;  %vm5552_vm3 = vcmp.eq.f32.partialorder %v5551_v37, 8.507059e+37 }
 0xbae   :  { %v5530_v11 = vmul.f32 %v7244_v27, %v5529_v31  ;;  %v5130_v17 = vadd.f32 %v7255_v26, %v5105_v1 }
 0xbb0   :  { %v5531_v54 = vadd.f32 %v7244_v27, %v5530_v11  ;;  %v6980_v25 = vmul.f32 -1.442695, %v5130_v17 }
 0xbb1   :  { %v7246_v35 = vpop.eup %7245 }
 0xbb2   :  { %v7248_v7 = vpop.eup %7247  ;;  %v5535_v24 = vsel %vm5534_vm1, %v7244_v27, %v5531_v54  ;;  %v5543_v22 = vmul.f32 %v7246_v35, %v5224_v19  ;;  %7249 = vpow2.f32 %v6980_v25  ;;  %vm5548_vm14 = vweird.f32 %v7246_v35 }
 0xbb3   :  { %v5540_v52 = vsel %vm5537_vm0, %v5539_v41, %v5535_v24  ;;  %v5225_v13 = vadd.f32 1.0, %v7248_v7  ;;  %vm5549_vm2 = vmor %vm5547_vm15, %vm5548_vm14 }
 0xbb4   :  { %5607 = vst [vmem:[%s8934_s7 + $0xa0] sm:$0xff] %v5540_v52  ;;  %v5544_v38 = vsub.f32 1.0, %v5543_v22 }
 0xbb5   :  { %7251 = vrcp.f32 %v5225_v13  ;;  %v5568_v34 = vand.u32 2147483648, %v5225_v13  ;;  %v5566_v20 = vand.u32 2147483647, %v5225_v13  ;;  %vm5562_vm5 = vweird.f32 %v5225_v13 }
 0xbb6   :  { %v5545_v57 = vmul.f32 %v7246_v35, %v5544_v38 }
 0xbb7   :  { %v5569_v0 = vor.u32 1.1754944e-38, %v5568_v34  ;;  %vm5567_vm7 = vcmp.eq.f32.partialorder %v5566_v20, 8.507059e+37 }
 0xbb8   :  { %v5546_v4 = vadd.f32 %v7246_v35, %v5545_v57  ;;  %v7250_v48 = vpop.eup %7249 }
 0xbb9   :  { %v5226_v43 = vadd.f32 1.0, %v7250_v48 }
 0xbba   :  { %v5550_v50 = vsel %vm5549_vm2, %v7246_v35, %v5546_v4 }
 0xbbb   :  { %v7252_v6 = vpop.eup %7251  ;;  %v5555_v23 = vsel %vm5552_vm3, %v5554_v32, %v5550_v50  ;;  %7253 = vrcp.f32 %v5226_v43  ;;  %v5583_v29 = vand.u32 2147483648, %v5226_v43  ;;  %v5581_v53 = vand.u32 2147483647, %v5226_v43 }
 0xbbc   :  { %5608 = vst [vmem:[%s8934_s7 + $0xa8] sm:$0xff] %v5555_v23  ;;  %v5558_v39 = vmul.f32 %v7252_v6, %v5225_v13  ;;  %vm5563_vm4 = vweird.f32 %v7252_v6  ;;  %vm5577_vm10 = vweird.f32 %v5226_v43 }
 0xbbd   :  { %vm5564_vm6 = vmor %vm5562_vm5, %vm5563_vm4  ;;  %v5584_v2 = vor.u32 1.1754944e-38, %v5583_v29  ;;  %vm5582_vm8 = vcmp.eq.f32.partialorder %v5581_v53, 8.507059e+37 }
 0xbbe   :  { %v5559_v9 = vsub.f32 1.0, %v5558_v39 }
 0xbc0   :  { %v5560_v55 = vmul.f32 %v7252_v6, %v5559_v9 }
 0xbc1   :  { %v7254_v60 = vpop.eup %7253 }
 0xbc2   :  { %v5561_v63 = vadd.f32 %v7252_v6, %v5560_v55  ;;  %v5573_v10 = vmul.f32 %v7254_v60, %v5226_v43  ;;  %vm5578_vm9 = vweird.f32 %v7254_v60 }
 0xbc3   :  { %vm5579_vm12 = vmor %vm5577_vm10, %vm5578_vm9 }
 0xbc4   :  { %v5565_v47 = vsel %vm5564_vm6, %v7252_v6, %v5561_v63  ;;  %v5574_v40 = vsub.f32 1.0, %v5573_v10 }
 0xbc5   :  { %v5570_v15 = vsel %vm5567_vm7, %v5569_v0, %v5565_v47 }
 0xbc6   :  { %5609 = vst [vmem:[%s8934_s7 + $0xb0] sm:$0xff] %v5570_v15  ;;  %v5575_v5 = vmul.f32 %v7254_v60, %v5574_v40 }
 0xbc8   :  { %v5576_v42 = vadd.f32 %v7254_v60, %v5575_v5 }
 0xbca   :  { %v5580_v59 = vsel %vm5579_vm12, %v7254_v60, %v5576_v42 }
 0xbcb   :  { %v5585_v36 = vsel %vm5582_vm8, %v5584_v2, %v5580_v59 }
 0xbcc   :  { %5610 = vst [vmem:[%s8934_s7 + $0xb8] sm:$0xff] %v5585_v36 }

</bundles_post_ra>
